<compile_context>
chip_gen: v6e
topology: v6e:2x2x1
jax: 0.10.0
libtpu: 0.0.40
codegen_flags: <defaults>
</compile_context>

<pallas_src>
import jax
import jax.numpy as jnp
from jax.experimental import pallas as pl
from jax.experimental.pallas import tpu as pltpu

IMG_DIM = 28 * 28          # 784
Z_DIM = 50
Z_PAD = 64                 # lane-padded latent width fed to the kernel
H1, H2, H3 = 256, 512, 1024


def _round_up(x, m):
    return ((x + m - 1) // m) * m


def generator_kernel(x_ref,
                     w1_ref, b1_ref,
                     w2_ref, b2_ref,
                     w3_ref, b3_ref,
                     w4_ref, b4_ref,
                     o_ref):
    # fc1 + relu  (bf16 operands on the MXU, f32 accumulation)
    h = jnp.dot(x_ref[...], w1_ref[...], preferred_element_type=jnp.float32)
    h = jnp.maximum(h + b1_ref[...], 0.0).astype(jnp.bfloat16)
    # fc2 + relu
    h = jnp.dot(h, w2_ref[...], preferred_element_type=jnp.float32)
    h = jnp.maximum(h + b2_ref[...], 0.0).astype(jnp.bfloat16)
    # fc3 + relu
    h = jnp.dot(h, w3_ref[...], preferred_element_type=jnp.float32)
    h = jnp.maximum(h + b3_ref[...], 0.0).astype(jnp.bfloat16)
    # fc4 + sigmoid.  sigmoid(x) = 0.5*tanh(x/2) + 0.5 is overflow-free and
    # keeps the transcendental work on the EUP slot.
    h = jnp.dot(h, w4_ref[...], preferred_element_type=jnp.float32)
    h = h + b4_ref[...]
    o_ref[...] = 0.5 * jnp.tanh(0.5 * h) + 0.5


def _prepare_params(params):
    """Cast weights to bf16; zero-pad fc1's K to the lane-padded latent width."""
    w1, b1, w2, b2, w3, b3, w4, b4 = params
    w1p = jnp.pad(w1, ((0, Z_PAD - Z_DIM), (0, 0)))
    return (w1p.astype(jnp.bfloat16), b1.astype(jnp.float32),
            w2.astype(jnp.bfloat16), b2.astype(jnp.float32),
            w3.astype(jnp.bfloat16), b3.astype(jnp.float32),
            w4.astype(jnp.bfloat16), b4.astype(jnp.float32))


def _vmem_limit_bytes():
    """64 MiB on 128-MiB-VMEM chips (v5e/v6e), 32 MiB on v7x; safe fallback."""
    limit = 32 * 1024 * 1024
    try:
        cap = pltpu.get_tpu_info().vmem_capacity_bytes
        limit = min(64 * 1024 * 1024, max(limit, cap // 2))
    except Exception:
        pass
    return limit


def _choose_batch_tile(B, batch_tile):
    """Pick TB (multiple of 8): >=2 grid steps when possible, minimal padding."""
    B8 = _round_up(B, 8)
    # Cap so the grid has at least 2 steps when the batch allows (v7x megacore).
    half = _round_up(-(-B8 // 2), 8)
    cap = min(max(8, batch_tile), max(8, half))
    best_tb, best_pad = 8, _round_up(B, 8) - B
    tb = 8
    while tb <= cap:
        pad = _round_up(B, tb) - B
        if pad < best_pad or (pad == best_pad and tb > best_tb):
            best_tb, best_pad = tb, pad
        tb += 8
    return best_tb


def generator_forward(z, params, *, batch_tile=1024):
    """z: (B, Z_DIM) float32 -> (B, 1, 28, 28) float32."""
    B = z.shape[0]
    z2d = z.reshape(B, -1).astype(jnp.float32)   # x.view(x.size(0), -1)
    # Pad latent features 50 -> 64 lanes and pre-cast to bf16.
    z2d = jnp.pad(z2d, ((0, 0), (0, Z_PAD - Z_DIM))).astype(jnp.bfloat16)

    TB = _choose_batch_tile(B, batch_tile)
    Bp = _round_up(B, TB)
    if Bp != B:
        z2d = jnp.pad(z2d, ((0, Bp - B), (0, 0)))

    w1, b1, w2, b2, w3, b3, w4, b4 = _prepare_params(params)

    # Weight/bias blocks are whole-array and grid-invariant (fetched once,
    # resident across grid steps); x/out blocks advance with the batch tile.
    resident = lambda shape: pl.BlockSpec(shape, lambda i: (0,) * len(shape))

    out = pl.pallas_call(
        generator_kernel,
        out_shape=jax.ShapeDtypeStruct((Bp, IMG_DIM), jnp.float32),
        grid=(Bp // TB,),
        in_specs=[
            pl.BlockSpec((TB, Z_PAD), lambda i: (i, 0)),
            resident((Z_PAD, H1)), resident((1, H1)),
            resident((H1, H2)), resident((1, H2)),
            resident((H2, H3)), resident((1, H3)),
            resident((H3, IMG_DIM)), resident((1, IMG_DIM)),
        ],
        out_specs=pl.BlockSpec((TB, IMG_DIM), lambda i: (i, 0)),
        compiler_params=pltpu.CompilerParams(
            dimension_semantics=("parallel",),
            vmem_limit_bytes=_vmem_limit_bytes(),
        ),
    )(z2d, w1, b1, w2, b2, w3, b3, w4, b4)

    # Drop batch padding only if any was added; no lane-dim slice copy needed.
    if Bp != B:
        out = out[:B]
    return out.reshape(-1, 1, 28, 28)


def init_params(key):
    """Deterministic synthetic f32 params. Weights stored as (in, out)."""
    ks = jax.random.split(key, 8)

    def lin(kw, kb, fan_in, fan_out):
        # Match nn.Linear's default init scale: U(-1/sqrt(fan_in), +1/sqrt(fan_in))
        bound = 1.0 / jnp.sqrt(fan_in)
        w = jax.random.uniform(kw, (fan_in, fan_out), jnp.float32, -bound, bound)
        b = jax.random.uniform(kb, (1, fan_out), jnp.float32, -bound, bound)
        return w, b

    w1, b1 = lin(ks[0], ks[1], Z_DIM, H1)
    w2, b2 = lin(ks[2], ks[3], H1, H2)
    w3, b3 = lin(ks[4], ks[5], H2, H3)
    w4, b4 = lin(ks[6], ks[7], H3, IMG_DIM)
    return (w1, b1, w2, b2, w3, b3, w4, b4)


def generator_ref(z, params):
    """Pure-JAX f32 reference for correctness check."""
    w1, b1, w2, b2, w3, b3, w4, b4 = params
    x = z.reshape(z.shape[0], -1)
    x = jax.nn.relu(x @ w1 + b1)
    x = jax.nn.relu(x @ w2 + b2)
    x = jax.nn.relu(x @ w3 + b3)
    x = jax.nn.sigmoid(x @ w4 + b4)
    return x.reshape(-1, 1, 28, 28)


if __name__ == "__main__":
    key = jax.random.PRNGKey(0)
    kp, kz = jax.random.split(key)
    params = init_params(kp)

    B = 8
    z = jax.random.normal(kz, (B, Z_DIM), dtype=jnp.float32)

    out = generator_forward(z, params)
    out = jax.block_until_ready(out)

    ref = generator_ref(z, params)
    assert out.shape == (B, 1, 28, 28), out.shape
    # bf16 weights/activations -> loosened tolerance.
    max_err = float(jnp.max(jnp.abs(out - ref)))
    assert jnp.allclose(out, ref, atol=2e-2, rtol=2e-2), max_err

    print("KERNEL_OK")
</pallas_src>

<mosaic_0001>
module attributes {stable_mosaic.version = 11 : i64} {
  func.func @generator_kernel(%arg0: i32, %arg1: memref<8x64xbf16, #tpu.memory_space<vmem>>, %arg2: memref<64x256xbf16, #tpu.memory_space<vmem>>, %arg3: memref<1x256xf32, #tpu.memory_space<vmem>>, %arg4: memref<256x512xbf16, #tpu.memory_space<vmem>>, %arg5: memref<1x512xf32, #tpu.memory_space<vmem>>, %arg6: memref<512x1024xbf16, #tpu.memory_space<vmem>>, %arg7: memref<1x1024xf32, #tpu.memory_space<vmem>>, %arg8: memref<1024x784xbf16, #tpu.memory_space<vmem>>, %arg9: memref<1x784xf32, #tpu.memory_space<vmem>>, %arg10: memref<8x784xf32, #tpu.memory_space<vmem>>) attributes {dimension_semantics = [#tpu.dimension_semantics<parallel>], iteration_bounds = array<i64: 1>, scalar_prefetch = 0 : i64, scratch_operands = 0 : i64, tpu.core_type = #tpu.core_type<tc>, window_params = [{transform_indices = @transform_0, window_bounds = array<i64: 8, 64>}, {pipeline_mode = #tpu.pipeline_mode<synchronous>, transform_indices = @transform_1, window_bounds = array<i64: 64, 256>}, {pipeline_mode = #tpu.pipeline_mode<synchronous>, transform_indices = @transform_2, window_bounds = array<i64: 1, 256>}, {pipeline_mode = #tpu.pipeline_mode<synchronous>, transform_indices = @transform_3, window_bounds = array<i64: 256, 512>}, {pipeline_mode = #tpu.pipeline_mode<synchronous>, transform_indices = @transform_4, window_bounds = array<i64: 1, 512>}, {pipeline_mode = #tpu.pipeline_mode<synchronous>, transform_indices = @transform_5, window_bounds = array<i64: 512, 1024>}, {pipeline_mode = #tpu.pipeline_mode<synchronous>, transform_indices = @transform_6, window_bounds = array<i64: 1, 1024>}, {pipeline_mode = #tpu.pipeline_mode<synchronous>, transform_indices = @transform_7, window_bounds = array<i64: 1024, 784>}, {pipeline_mode = #tpu.pipeline_mode<synchronous>, transform_indices = @transform_8, window_bounds = array<i64: 1, 784>}, {transform_indices = @transform_9, window_bounds = array<i64: 8, 784>}]} {
    %c0 = arith.constant 0 : index
    %c0_0 = arith.constant 0 : index
    %0 = vector.load %arg1[%c0, %c0_0] : memref<8x64xbf16, #tpu.memory_space<vmem>>, vector<8x64xbf16>
    %c0_1 = arith.constant 0 : index
    %c0_2 = arith.constant 0 : index
    %1 = vector.load %arg2[%c0_1, %c0_2] : memref<64x256xbf16, #tpu.memory_space<vmem>>, vector<64x256xbf16>
    %cst = arith.constant dense<0.000000e+00> : vector<8x256xf32>
    %2 = tpu.matmul %0, %1, %cst {dimension_numbers = #tpu.dot_dimension_numbers<[1], [0], [0], [1], [0, 0, 1, 1], [], []>} : vector<8x64xbf16>, vector<64x256xbf16>, vector<8x256xf32> -> vector<8x256xf32>
    %c0_3 = arith.constant 0 : index
    %c0_4 = arith.constant 0 : index
    %3 = vector.load %arg3[%c0_3, %c0_4] : memref<1x256xf32, #tpu.memory_space<vmem>>, vector<1x256xf32>
    %4 = vector.broadcast %3 : vector<1x256xf32> to vector<8x256xf32>
    %5 = arith.addf %2, %4 : vector<8x256xf32>
    %cst_5 = arith.constant 0.000000e+00 : f32
    %6 = vector.broadcast %cst_5 : f32 to vector<8x256xf32>
    %7 = arith.maximumf %5, %6 : vector<8x256xf32>
    %8 = arith.truncf %7 : vector<8x256xf32> to vector<8x256xbf16>
    %c0_6 = arith.constant 0 : index
    %c0_7 = arith.constant 0 : index
    %9 = vector.load %arg4[%c0_6, %c0_7] : memref<256x512xbf16, #tpu.memory_space<vmem>>, vector<256x512xbf16>
    %cst_8 = arith.constant dense<0.000000e+00> : vector<8x512xf32>
    %10 = tpu.matmul %8, %9, %cst_8 {dimension_numbers = #tpu.dot_dimension_numbers<[1], [0], [0], [1], [0, 0, 1, 1], [], []>} : vector<8x256xbf16>, vector<256x512xbf16>, vector<8x512xf32> -> vector<8x512xf32>
    %c0_9 = arith.constant 0 : index
    %c0_10 = arith.constant 0 : index
    %11 = vector.load %arg5[%c0_9, %c0_10] : memref<1x512xf32, #tpu.memory_space<vmem>>, vector<1x512xf32>
    %12 = vector.broadcast %11 : vector<1x512xf32> to vector<8x512xf32>
    %13 = arith.addf %10, %12 : vector<8x512xf32>
    %cst_11 = arith.constant 0.000000e+00 : f32
    %14 = vector.broadcast %cst_11 : f32 to vector<8x512xf32>
    %15 = arith.maximumf %13, %14 : vector<8x512xf32>
    %16 = arith.truncf %15 : vector<8x512xf32> to vector<8x512xbf16>
    %c0_12 = arith.constant 0 : index
    %c0_13 = arith.constant 0 : index
    %17 = vector.load %arg6[%c0_12, %c0_13] : memref<512x1024xbf16, #tpu.memory_space<vmem>>, vector<512x1024xbf16>
    %cst_14 = arith.constant dense<0.000000e+00> : vector<8x1024xf32>
    %18 = tpu.matmul %16, %17, %cst_14 {dimension_numbers = #tpu.dot_dimension_numbers<[1], [0], [0], [1], [0, 0, 1, 1], [], []>} : vector<8x512xbf16>, vector<512x1024xbf16>, vector<8x1024xf32> -> vector<8x1024xf32>
    %c0_15 = arith.constant 0 : index
    %c0_16 = arith.constant 0 : index
    %19 = vector.load %arg7[%c0_15, %c0_16] : memref<1x1024xf32, #tpu.memory_space<vmem>>, vector<1x1024xf32>
    %20 = vector.broadcast %19 : vector<1x1024xf32> to vector<8x1024xf32>
    %21 = arith.addf %18, %20 : vector<8x1024xf32>
    %cst_17 = arith.constant 0.000000e+00 : f32
    %22 = vector.broadcast %cst_17 : f32 to vector<8x1024xf32>
    %23 = arith.maximumf %21, %22 : vector<8x1024xf32>
    %24 = arith.truncf %23 : vector<8x1024xf32> to vector<8x1024xbf16>
    %c0_18 = arith.constant 0 : index
    %c0_19 = arith.constant 0 : index
    %25 = vector.load %arg8[%c0_18, %c0_19] : memref<1024x784xbf16, #tpu.memory_space<vmem>>, vector<1024x784xbf16>
    %cst_20 = arith.constant dense<0.000000e+00> : vector<8x784xf32>
    %26 = tpu.matmul %24, %25, %cst_20 {dimension_numbers = #tpu.dot_dimension_numbers<[1], [0], [0], [1], [0, 0, 1, 1], [], []>} : vector<8x1024xbf16>, vector<1024x784xbf16>, vector<8x784xf32> -> vector<8x784xf32>
    %c0_21 = arith.constant 0 : index
    %c0_22 = arith.constant 0 : index
    %27 = vector.load %arg9[%c0_21, %c0_22] : memref<1x784xf32, #tpu.memory_space<vmem>>, vector<1x784xf32>
    %28 = vector.broadcast %27 : vector<1x784xf32> to vector<8x784xf32>
    %29 = arith.addf %26, %28 : vector<8x784xf32>
    %cst_23 = arith.constant 5.000000e-01 : f32
    %30 = vector.broadcast %cst_23 : f32 to vector<8x784xf32>
    %31 = arith.mulf %30, %29 : vector<8x784xf32>
    %32 = math.tanh %31 : vector<8x784xf32>
    %cst_24 = arith.constant 5.000000e-01 : f32
    %33 = vector.broadcast %cst_24 : f32 to vector<8x784xf32>
    %34 = arith.mulf %33, %32 : vector<8x784xf32>
    %cst_25 = arith.constant 5.000000e-01 : f32
    %35 = vector.broadcast %cst_25 : f32 to vector<8x784xf32>
    %36 = arith.addf %34, %35 : vector<8x784xf32>
    %c0_26 = arith.constant 0 : index
    %c0_27 = arith.constant 0 : index
    %37 = vector.load %arg10[%c0_26, %c0_27] : memref<8x784xf32, #tpu.memory_space<vmem>>, vector<8x784xf32>
    tpu.vector_store %arg10[%c0_26, %c0_27], %36 {strides = array<i32>} : memref<8x784xf32, #tpu.memory_space<vmem>>, vector<8x784xf32>,
    return
  }
  func.func @transform_0(%arg0: i32) -> (i32, i32) {
    %c0_i32 = arith.constant 0 : i32
    %c0_i32_0 = arith.constant 0 : i32
    return %arg0, %c0_i32 : i32, i32
  }
  func.func @transform_1(%arg0: i32) -> (i32, i32) {
    %c0_i32 = arith.constant 0 : i32
    %c0_i32_0 = arith.constant 0 : i32
    %c0_i32_1 = arith.constant 0 : i32
    return %c0_i32, %c0_i32_0 : i32, i32
  }
  func.func @transform_2(%arg0: i32) -> (i32, i32) {
    %c0_i32 = arith.constant 0 : i32
    %c0_i32_0 = arith.constant 0 : i32
    %c0_i32_1 = arith.constant 0 : i32
    return %c0_i32, %c0_i32_0 : i32, i32
  }
  func.func @transform_3(%arg0: i32) -> (i32, i32) {
    %c0_i32 = arith.constant 0 : i32
    %c0_i32_0 = arith.constant 0 : i32
    %c0_i32_1 = arith.constant 0 : i32
    return %c0_i32, %c0_i32_0 : i32, i32
  }
  func.func @transform_4(%arg0: i32) -> (i32, i32) {
    %c0_i32 = arith.constant 0 : i32
    %c0_i32_0 = arith.constant 0 : i32
    %c0_i32_1 = arith.constant 0 : i32
    return %c0_i32, %c0_i32_0 : i32, i32
  }
  func.func @transform_5(%arg0: i32) -> (i32, i32) {
    %c0_i32 = arith.constant 0 : i32
    %c0_i32_0 = arith.constant 0 : i32
    %c0_i32_1 = arith.constant 0 : i32
    return %c0_i32, %c0_i32_0 : i32, i32
  }
  func.func @transform_6(%arg0: i32) -> (i32, i32) {
    %c0_i32 = arith.constant 0 : i32
    %c0_i32_0 = arith.constant 0 : i32
    %c0_i32_1 = arith.constant 0 : i32
    return %c0_i32, %c0_i32_0 : i32, i32
  }
  func.func @transform_7(%arg0: i32) -> (i32, i32) {
    %c0_i32 = arith.constant 0 : i32
    %c0_i32_0 = arith.constant 0 : i32
    %c0_i32_1 = arith.constant 0 : i32
    return %c0_i32, %c0_i32_0 : i32, i32
  }
  func.func @transform_8(%arg0: i32) -> (i32, i32) {
    %c0_i32 = arith.constant 0 : i32
    %c0_i32_0 = arith.constant 0 : i32
    %c0_i32_1 = arith.constant 0 : i32
    return %c0_i32, %c0_i32_0 : i32, i32
  }
  func.func @transform_9(%arg0: i32) -> (i32, i32) {
    %c0_i32 = arith.constant 0 : i32
    %c0_i32_0 = arith.constant 0 : i32
    return %arg0, %c0_i32 : i32, i32
  }
}

</mosaic_0001>

<bundles_post_ra>
// kernel: tpu_custom_call.1
= control target key start
LH: loop header
LB: loop body
LE: loop exit
PB: predicated region body
PF: predicated region fallthrough
CT: control target
= control target key end

     0   :  { %v7769_v2 = vmov 0   ;;  %vm95_vm0 = vcmask 523264   ;;  %s10339_s0 = inlined_call_operand.vmem [shape: bf16[8,64], index: 0, kind: input, shape index: {}]   ;;  %s10340_s1 = inlined_call_operand.vmem [shape: bf16[64,256], index: 1, kind: input, shape index: {}]   ;;  %s10341_s2 = inlined_call_operand.vmem [shape: f32[1,256], index: 2, kind: input, shape index: {}]   ;;  %s10342_s3 = inlined_call_operand.vmem [shape: bf16[256,512], index: 3, kind: input, shape index: {}]   ;;  %s10343_s4 = inlined_call_operand.vmem [shape: f32[1,512], index: 4, kind: input, shape index: {}]   ;;  %s10344_s5 = inlined_call_operand.vmem [shape: bf16[512,1024], index: 5, kind: input, shape index: {}]   ;;  %s10345_s6 = inlined_call_operand.vmem [shape: f32[1,1024], index: 6, kind: input, shape index: {}]   ;;  %s10346_s7 = inlined_call_operand.vmem [shape: bf16[1024,784], index: 7, kind: input, shape index: {}]   ;;  %s10347_s8 = inlined_call_operand.vmem [shape: f32[1,784], index: 8, kind: input, shape index: {}]   ;;  %s10348_s9 = inlined_call_operand.hbm [shape: f32[8,784], index: 9, kind: output, shape index: {}]  }
   0x1   :  { %v6984_v0 = vld [vmem:[%s10340_s1 + $0x34] ss:$8 sps:$4 sm:$0xff]   ;;  %v6986_v1 = vld [vmem:[%s10340_s1 + $0x30] ss:$8 sps:$4 sm:$0xff]   ;;  %131 = vmatprep.mubr.bf16.mxu0 %v7769_v2  ;;  %v6987_v3 = vld [vmem:[%s10340_s1 + $0x24] ss:$8 sps:$4 sm:$0xff]  }
   0x2   :  { %107 = vmatprep.subr.bf16.mxu0 %v6984_v0  ;;  %v6989_v4 = vld [vmem:[%s10340_s1 + $0x20] ss:$8 sps:$4 sm:$0xff]   ;;  %v6990_v5 = vld [vmem:[%s10340_s1 + $0x14] ss:$8 sps:$4 sm:$0xff]   ;;  %v6992_v7 = vld [vmem:[%s10340_s1 + $0x10] ss:$8 sps:$4 sm:$0xff]  }
   0x3   :  { %108 = vmatpush1.bf16.msra.mxu0 %v6986_v1  ;;  %v6996_v6 = vld [vmem:[%s10342_s3 + $0xe4] ss:$16 sps:$4 sm:$0xff]   ;;  %v7001_v9 = vld [vmem:[%s10342_s3 + $0xe0] ss:$16 sps:$4 sm:$0xff]   ;;  %v7000_v14 = vld [vmem:[%s10342_s3 + $0xec] ss:$16 sps:$4 sm:$0xff]  }
   0x4   :  { %109 = vmatprep.subr.bf16.mxu0 %v6987_v3  ;;  %v6993_v8 = vld [vmem:[%s10340_s1 + $0x4] ss:$8 sps:$4 sm:$0xff]   ;;  %550 = vmatprep.subr.bf16.mxu1 %v6996_v6  ;;  %v6995_v11 = vld [vmem:[%s10340_s1] ss:$8 sps:$4 sm:$0xff]  }
   0x5   :  { %v7002_v10 = vld [vmem:[%s10342_s3 + $0xc4] ss:$16 sps:$4 sm:$0xff]   ;;  %551 = vmatpush1.bf16.msra.mxu1 %v7001_v9  ;;  %v7007_v12 = vld [vmem:[%s10342_s3 + $0xc0] ss:$16 sps:$4 sm:$0xff]   ;;  %v6998_v17 = vld [vmem:[%s10342_s3 + $0xe8] ss:$16 sps:$4 sm:$0xff]  }
   0x6   :  { %552 = vmatprep.subr.bf16.mxu1 %v7002_v10  ;;  %v7008_v13 = vld [vmem:[%s10342_s3 + $0xa4] ss:$16 sps:$4 sm:$0xff]   ;;  %v34_v15 = vld [vmem:[%s10339_s0] sm:$0xf]  ;;  %v7006_v19 = vld [vmem:[%s10342_s3 + $0xcc] ss:$16 sps:$4 sm:$0xff]  }
   0x7   :  { %110 = vmatpush1.bf16.msra.mxu0 %v6989_v4  ;;  %v7013_v16 = vld [vmem:[%s10342_s3 + $0xa0] ss:$16 sps:$4 sm:$0xff]   ;;  %v7014_v18 = vld [vmem:[%s10342_s3 + $0x84] ss:$16 sps:$4 sm:$0xff]   ;;  %v7004_v20 = vld [vmem:[%s10342_s3 + $0xc8] ss:$16 sps:$4 sm:$0xff]  }
   0x8   :  { %111 = vmatprep.subr.bf16.mxu0 %v6990_v5  ;;  %v7019_v21 = vld [vmem:[%s10342_s3 + $0x80] ss:$16 sps:$4 sm:$0xff]   ;;  %v7020_v22 = vld [vmem:[%s10342_s3 + $0x64] ss:$16 sps:$4 sm:$0xff]   ;;  %v7012_v23 = vld [vmem:[%s10342_s3 + $0xac] ss:$16 sps:$4 sm:$0xff]  }
   0x9   :  { %553 = vmatpush1.bf16.msra.mxu1 %v7007_v12  ;;  %v7025_v24 = vld [vmem:[%s10342_s3 + $0x60] ss:$16 sps:$4 sm:$0xff]   ;;  %v7010_v25 = vld [vmem:[%s10342_s3 + $0xa8] ss:$16 sps:$4 sm:$0xff]   ;;  %v7026_v26 = vld [vmem:[%s10342_s3 + $0x44] ss:$16 sps:$4 sm:$0xff]  }
   0xa   :  { %554 = vmatprep.subr.bf16.mxu1 %v7008_v13  ;;  %v7018_v27 = vld [vmem:[%s10342_s3 + $0x8c] ss:$16 sps:$4 sm:$0xff]   ;;  %v7016_v28 = vld [vmem:[%s10342_s3 + $0x88] ss:$16 sps:$4 sm:$0xff]   ;;  %v7031_v29 = vld [vmem:[%s10342_s3 + $0x40] ss:$16 sps:$4 sm:$0xff]  }
   0xb   :  { %112 = vmatpush1.bf16.msra.mxu0 %v6992_v7  ;;  %v7032_v30 = vld [vmem:[%s10342_s3 + $0x24] ss:$16 sps:$4 sm:$0xff]   ;;  %v7024_v31 = vld [vmem:[%s10342_s3 + $0x6c] ss:$16 sps:$4 sm:$0xff]   ;;  %v7037_v32 = vld [vmem:[%s10342_s3 + $0x20] ss:$16 sps:$4 sm:$0xff]  }
   0xc   :  { %113 = vmatprep.subr.bf16.mxu0 %v6993_v8  ;;  %v7022_v33 = vld [vmem:[%s10342_s3 + $0x68] ss:$16 sps:$4 sm:$0xff]   ;;  %v7038_v34 = vld [vmem:[%s10342_s3 + $0x4] ss:$16 sps:$4 sm:$0xff]   ;;  %v7030_v35 = vld [vmem:[%s10342_s3 + $0x4c] ss:$16 sps:$4 sm:$0xff]  }
   0xd   :  { %555 = vmatpush1.bf16.msra.mxu1 %v7013_v16  ;;  %v7028_v36 = vld [vmem:[%s10342_s3 + $0x48] ss:$16 sps:$4 sm:$0xff]   ;;  %v7043_v37 = vld [vmem:[%s10342_s3] ss:$16 sps:$4 sm:$0xff]   ;;  %v7044_v38 = vld [vmem:[%s10342_s3 + $0x1e4] ss:$16 sps:$4 sm:$0xff]  }
   0xe   :  { %556 = vmatprep.subr.bf16.mxu1 %v7014_v18  ;;  %v7036_v39 = vld [vmem:[%s10342_s3 + $0x2c] ss:$16 sps:$4 sm:$0xff]   ;;  %v7049_v40 = vld [vmem:[%s10342_s3 + $0x1e0] ss:$16 sps:$4 sm:$0xff]   ;;  %v7034_v41 = vld [vmem:[%s10342_s3 + $0x28] ss:$16 sps:$4 sm:$0xff]   ;;  %v45_v18 = vlaneseq }
   0xf   :  { %114 = vmatpush1.bf16.msra.mxu0 %v6995_v11  ;;  %v7050_v42 = vld [vmem:[%s10342_s3 + $0x1c4] ss:$16 sps:$4 sm:$0xff]   ;;  %v7042_v43 = vld [vmem:[%s10342_s3 + $0xc] ss:$16 sps:$4 sm:$0xff]   ;;  %v7040_v44 = vld [vmem:[%s10342_s3 + $0x8] ss:$16 sps:$4 sm:$0xff]  }
  0x10   :  { %591 = vmatprep.subr.bf16.mxu0 %v7000_v14  ;;  %v7048_v45 = vld [vmem:[%s10342_s3 + $0x1ec] ss:$16 sps:$4 sm:$0xff]   ;;  %v7055_v46 = vld [vmem:[%s10342_s3 + $0x1c0] ss:$16 sps:$4 sm:$0xff]   ;;  %v7056_v47 = vld [vmem:[%s10342_s3 + $0x1a4] ss:$16 sps:$4 sm:$0xff]  }
  0x11   :  { %557 = vmatpush1.bf16.msra.mxu1 %v7019_v21  ;;  %v7061_v48 = vld [vmem:[%s10342_s3 + $0x1a0] ss:$16 sps:$4 sm:$0xff]   ;;  %v7046_v49 = vld [vmem:[%s10342_s3 + $0x1e8] ss:$16 sps:$4 sm:$0xff]   ;;  %v7062_v50 = vld [vmem:[%s10342_s3 + $0x184] ss:$16 sps:$4 sm:$0xff]  }
  0x12   :  { %6125 = vmatmul.mubr.msk.bf16.vlgmr.msra.gmra.mxu0 %vm95_vm0, %v34_v15  ;;  %558 = vmatprep.subr.bf16.mxu1 %v7020_v22  ;;  %v7054_v51 = vld [vmem:[%s10342_s3 + $0x1cc] ss:$16 sps:$4 sm:$0xff]   ;;  %v7067_v52 = vld [vmem:[%s10342_s3 + $0x180] ss:$16 sps:$4 sm:$0xff]   ;;  %v7052_v53 = vld [vmem:[%s10342_s3 + $0x1c8] ss:$16 sps:$4 sm:$0xff]  }
  0x13   :  { %592 = vmatpush1.bf16.msra.mxu0 %v6998_v17  ;;  %v7068_v54 = vld [vmem:[%s10342_s3 + $0x164] ss:$16 sps:$4 sm:$0xff]   ;;  %v7060_v55 = vld [vmem:[%s10342_s3 + $0x1ac] ss:$16 sps:$4 sm:$0xff]   ;;  %v7073_v56 = vld [vmem:[%s10342_s3 + $0x160] ss:$16 sps:$4 sm:$0xff]  }
  0x14   :  { %593 = vmatprep.subr.bf16.mxu0 %v7006_v19  ;;  %v7058_v57 = vld [vmem:[%s10342_s3 + $0x1a8] ss:$16 sps:$4 sm:$0xff]   ;;  %v7074_v58 = vld [vmem:[%s10342_s3 + $0x144] ss:$16 sps:$4 sm:$0xff]   ;;  %v7066_v59 = vld [vmem:[%s10342_s3 + $0x18c] ss:$16 sps:$4 sm:$0xff]  }
  0x15   :  { %559 = vmatpush1.bf16.msra.mxu1 %v7025_v24  ;;  %v7079_v60 = vld [vmem:[%s10342_s3 + $0x140] ss:$16 sps:$4 sm:$0xff]   ;;  %v7064_v61 = vld [vmem:[%s10342_s3 + $0x188] ss:$16 sps:$4 sm:$0xff]   ;;  %v7072_v62 = vld [vmem:[%s10342_s3 + $0x16c] ss:$16 sps:$4 sm:$0xff]  }
  0x16   :  { %560 = vmatprep.subr.bf16.mxu1 %v7026_v26  ;;  %v7070_v63 = vld [vmem:[%s10342_s3 + $0x168] ss:$16 sps:$4 sm:$0xff]   ;;  %v7078_v0 = vld [vmem:[%s10342_s3 + $0x14c] ss:$16 sps:$4 sm:$0xff]   ;;  %v7080_v2 = vld [vmem:[%s10342_s3 + $0x124] ss:$16 sps:$4 sm:$0xff]  }
  0x17   :  { %594 = vmatpush1.bf16.msra.mxu0 %v7004_v20  ;;  %v7076_v1 = vld [vmem:[%s10342_s3 + $0x148] ss:$16 sps:$4 sm:$0xff]   ;;  %v7084_v3 = vld [vmem:[%s10342_s3 + $0x12c] ss:$16 sps:$4 sm:$0xff]   ;;  %v7085_v5 = vld [vmem:[%s10342_s3 + $0x120] ss:$16 sps:$4 sm:$0xff]  }
  0x18   :  { %595 = vmatprep.subr.bf16.mxu0 %v7012_v23  ;;  %v7082_v4 = vld [vmem:[%s10342_s3 + $0x128] ss:$16 sps:$4 sm:$0xff]   ;;  %v7086_v6 = vld [vmem:[%s10342_s3 + $0x104] ss:$16 sps:$4 sm:$0xff]   ;;  %v7090_v7 = vld [vmem:[%s10342_s3 + $0x10c] ss:$16 sps:$4 sm:$0xff]  }
  0x19   :  { %561 = vmatpush1.bf16.msra.mxu1 %v7031_v29  ;;  %v7088_v8 = vld [vmem:[%s10342_s3 + $0x108] ss:$16 sps:$4 sm:$0xff]   ;;  %v7091_v9 = vld [vmem:[%s10342_s3 + $0x100] ss:$16 sps:$4 sm:$0xff]   ;;  %v8052_v19 = vshrl.u32 %v45_v18, 7 }
  0x1a   :  { %562 = vmatprep.subr.bf16.mxu1 %v7032_v30  ;;  %v696_v10 = vld [vmem:[%s10344_s5 + $0x1c0] sm:$0xff] }
  0x1b   :  { %596 = vmatpush1.bf16.msra.mxu0 %v7010_v25  ;;  %v700_v11 = vld [vmem:[%s10344_s5 + $0x1e0] sm:$0xff]  ;;  %v8058_v21 = vsub.s32 0, %v8052_v19  ;;  %v8061_v22 = vsub.s32 1, %v8052_v19 }
  0x1c   :  { %597 = vmatprep.subr.bf16.mxu0 %v7018_v27  ;;  %v824_v12 = vld [vmem:[%s10344_s5 + $0x5c0] sm:$0xff]  ;;  %v6246_v13 = vcombine.low %v696_v10, %v700_v11  ;;  %v6247_v14 = vcombine.high %v696_v10, %v700_v11 }
  0x1d   :  { %563 = vmatpush1.bf16.msra.mxu1 %v7037_v32  ;;  %v828_v15 = vld [vmem:[%s10344_s5 + $0x5e0] sm:$0xff] }
  0x1e   :  { %564 = vmatprep.subr.bf16.mxu1 %v7038_v34  ;;  %v6374_v16 = vcombine.low %v824_v12, %v828_v15  ;;  %v6375_v17 = vcombine.high %v824_v12, %v828_v15  ;;  %v43_v20 = vld [vmem:[%s10341_s2] sm:$0x3] }
  0x1f   :  { %598 = vmatpush1.bf16.msra.mxu0 %v7016_v28  ;;  %v48_v23 = vrot.slane %v43_v20, %v8058_v21  ;;  %v52_v24 = vrot.slane %v43_v20, %v8061_v22  ;;  %v688_v30 = vld [vmem:[%s10344_s5 + $0x180] sm:$0xff] }
  0x20   :  { %599 = vmatprep.subr.bf16.mxu0 %v7024_v31  ;;  %v692_v31 = vld [vmem:[%s10344_s5 + $0x1a0] sm:$0xff] }
  0x21   :  { %565 = vmatpush1.bf16.msra.mxu1 %v7043_v37  ;;  %v816_v32 = vld [vmem:[%s10344_s5 + $0x580] sm:$0xff] }
  0x22   :  { %566 = vmatprep.subr.bf16.mxu1 %v7044_v38  ;;  %v680_v38 = vld [vmem:[%s10344_s5 + $0x140] sm:$0xff] }
  0x23   :  { %600 = vmatpush1.bf16.msra.mxu0 %v7022_v33  ;;  %v820_v33 = vld [vmem:[%s10344_s5 + $0x5a0] sm:$0xff] }
  0x24   :  { %601 = vmatprep.subr.bf16.mxu0 %v7030_v35  ;;  %v780_v10 = vld [vmem:[%s10344_s5 + $0x460] sm:$0xff] }
  0x25   :  { %567 = vmatpush2.bf16.msra.mxu1 %v7049_v40  ;;  %v808_v40 = vld [vmem:[%s10344_s5 + $0x540] sm:$0xff] }
  0x26   :  { %568 = vmatprep.subr.bf16.mxu1 %v7050_v42 }
  0x27   :  { %602 = vmatpush1.bf16.msra.mxu0 %v7028_v36 }
  0x28   :  { %603 = vmatprep.subr.bf16.mxu0 %v7036_v39  ;;  %v684_v39 = vld [vmem:[%s10344_s5 + $0x160] sm:$0xff] }
  0x29   :  { %569 = vmatpush2.bf16.msra.mxu1 %v7055_v46  ;;  %v6366_v46 = vcombine.low %v816_v32, %v820_v33 }
  0x2a   :  { %570 = vmatprep.subr.bf16.mxu1 %v7056_v47  ;;  %v672_v47 = vld [vmem:[%s10344_s5 + $0x100] sm:$0xff] }
  0x2b   :  { %604 = vmatpush1.bf16.msra.mxu0 %v7034_v41  ;;  %v812_v41 = vld [vmem:[%s10344_s5 + $0x560] sm:$0xff] }
  0x2c   :  { %605 = vmatprep.subr.bf16.mxu0 %v7042_v43  ;;  %v6239_v43 = vcombine.high %v688_v30, %v692_v31 }
  0x2d   :  { %571 = vmatpush2.bf16.msra.mxu1 %v7061_v48  ;;  %v676_v48 = vld [vmem:[%s10344_s5 + $0x120] sm:$0xff] }
  0x2e   :  { %572 = vmatprep.subr.bf16.mxu1 %v7062_v50  ;;  %v804_v50 = vld [vmem:[%s10344_s5 + $0x520] sm:$0xff] }
  0x2f   :  { %606 = vmatpush1.bf16.msra.mxu0 %v7040_v44  ;;  %v6367_v44 = vcombine.high %v816_v32, %v820_v33 }
  0x30   :  { %607 = vmatprep.subr.bf16.mxu0 %v7048_v45  ;;  %v6238_v45 = vcombine.low %v688_v30, %v692_v31 }
  0x31   :  { %573 = vmatpush2.bf16.msra.mxu1 %v7067_v52  ;;  %v6359_v52 = vcombine.high %v808_v40, %v812_v41 }
  0x32   :  { %574 = vmatprep.subr.bf16.mxu1 %v7068_v54  ;;  %v6358_v54 = vcombine.low %v808_v40, %v812_v41 }
  0x33   :  { %608 = vmatpush2.bf16.msra.mxu0 %v7046_v49  ;;  %v800_v49 = vld [vmem:[%s10344_s5 + $0x500] sm:$0xff] }
  0x34   :  { %609 = vmatprep.subr.bf16.mxu0 %v7054_v51  ;;  %v6231_v51 = vcombine.high %v680_v38, %v684_v39 }
  0x35   :  { %575 = vmatpush2.bf16.msra.mxu1 %v7073_v56  ;;  %v668_v56 = vld [vmem:[%s10344_s5 + $0xe0] sm:$0xff] }
  0x36   :  { %576 = vmatprep.subr.bf16.mxu1 %v7074_v58  ;;  %v796_v58 = vld [vmem:[%s10344_s5 + $0x4e0] sm:$0xff] }
  0x37   :  { %610 = vmatpush2.bf16.msra.mxu0 %v7052_v53  ;;  %v6230_v53 = vcombine.low %v680_v38, %v684_v39 }
  0x38   :  { %611 = vmatprep.subr.bf16.mxu0 %v7060_v55  ;;  %v664_v55 = vld [vmem:[%s10344_s5 + $0xc0] sm:$0xff] }
  0x39   :  { %577 = vmatpush2.bf16.msra.mxu1 %v7079_v60  ;;  %v6351_v60 = vcombine.high %v800_v49, %v804_v50 }
  0x3a   :  { %578 = vmatprep.subr.bf16.mxu1 %v7080_v2  ;;  %v788_v2 = vld [vmem:[%s10344_s5 + $0x4a0] sm:$0xff] }
  0x3b   :  { %612 = vmatpush2.bf16.msra.mxu0 %v7058_v57  ;;  %v792_v57 = vld [vmem:[%s10344_s5 + $0x4c0] sm:$0xff] }
  0x3c   :  { %613 = vmatprep.subr.bf16.mxu0 %v7066_v59  ;;  %v6223_v59 = vcombine.high %v672_v47, %v676_v48 }
  0x3d   :  { %579 = vmatpush2.bf16.msra.mxu1 %v7085_v5  ;;  %v6214_v5 = vcombine.low %v664_v55, %v668_v56 }
  0x3e   :  { %580 = vmatprep.subr.bf16.mxu1 %v7086_v6  ;;  %v6342_v6 = vcombine.low %v792_v57, %v796_v58 }
  0x3f   :  { %614 = vmatpush2.bf16.msra.mxu0 %v7064_v61  ;;  %v6222_v61 = vcombine.low %v672_v47, %v676_v48 }
  0x40   :  { %615 = vmatprep.subr.bf16.mxu0 %v7072_v62  ;;  %v6350_v62 = vcombine.low %v800_v49, %v804_v50 }
  0x41   :  { %581 = vmatpush2.bf16.msra.mxu1 %v7091_v9  ;;  %v776_v9 = vld [vmem:[%s10344_s5 + $0x440] sm:$0xff] }
  0x42   :  { %2218 = vmatprep.subr.bf16.mxu1 %v6247_v14 }
  0x43   :  { %616 = vmatpush2.bf16.msra.mxu0 %v7070_v63  ;;  %v656_v63 = vld [vmem:[%s10344_s5 + $0x80] sm:$0xff] }
  0x44   :  { %617 = vmatprep.subr.bf16.mxu0 %v7078_v0  ;;  %v660_v0 = vld [vmem:[%s10344_s5 + $0xa0] sm:$0xff] }
  0x45   :  { %v6207_v11 = vcombine.high %v656_v63, %v660_v0 }
  0x47   :  { %618 = vmatpush2.bf16.msra.mxu0 %v7076_v1  ;;  %v784_v1 = vld [vmem:[%s10344_s5 + $0x480] sm:$0xff] }
  0x48   :  { %619 = vmatprep.subr.bf16.mxu0 %v7084_v3  ;;  %v6215_v3 = vcombine.high %v664_v55, %v668_v56  ;;  %v6335_v12 = vcombine.high %v784_v1, %v788_v2  ;;  %v6334_v14 = vcombine.low %v784_v1, %v788_v2 }
  0x4b   :  { %620 = vmatpush2.bf16.msra.mxu0 %v7082_v4  ;;  %v6343_v4 = vcombine.high %v792_v57, %v796_v58 }
  0x4c   :  { %621 = vmatprep.subr.bf16.mxu0 %v7090_v7  ;;  %v648_v7 = vld [vmem:[%s10344_s5 + $0x40] sm:$0xff] }
  0x4f   :  { %622 = vmatpush2.bf16.msra.mxu0 %v7088_v8  ;;  %v652_v8 = vld [vmem:[%s10344_s5 + $0x60] sm:$0xff] }
  0x50   :  { %2259 = vmatprep.subr.bf16.mxu0 %v6375_v17  ;;  %v6199_v15 = vcombine.high %v648_v7, %v652_v8  ;;  %v640_v17 = vld [vmem:[%s10344_s5] sm:$0xff] }
  0xd2   :  { %v133_v25 = vpop.f32.mrf.mxu0 }
  0xd3   :  { %v134_v26 = vadd.f32 %v133_v25, %v48_v23 }
  0xd4   :  { %v135_v27 = vpop.f32.mrf.mxu0 }
  0xd5   :  { %v140_v28 = vmax.f32 %v134_v26, 0.0  ;;  %v136_v29 = vadd.f32 %v135_v27, %v52_v24 }
  0xd6   :  { %v137_v34 = vpop.f32.mrf.mxu0 }
  0xd7   :  { %v141_v35 = vmax.f32 %v136_v29, 0.0  ;;  %v142_v42 = vpack.c.bf16 %v140_v28, %v140_v28 }
  0xd8   :  { %v138_v36 = vpop.f32.mrf.mxu0 }
  0xd9   :  { %v143_v37 = vpack.c.bf16 %v141_v35, %v141_v35 }
  0xdb   :  { %582 = vmatprep.mubr.bf16.mxu1 %v143_v37  ;;  %623 = vmatprep.mubr.bf16.mxu0 %v143_v37 }
  0xdc   :  { %583 = vmatmul.mubr.bf16.vlgmr.msra.gmra.mxu1 %v142_v42  ;;  %624 = vmatmul.mubr.bf16.vlgmr.msra.gmra.mxu0 %v142_v42 }
  0xdd   :  { %2219 = vmatpush1.bf16.msra.mxu1 %v6246_v13  ;;  %2260 = vmatpush1.bf16.msra.mxu0 %v6374_v16  ;;  %v6206_v13 = vcombine.low %v656_v63, %v660_v0  ;;  %v6327_v16 = vcombine.high %v776_v9, %v780_v10 }
  0xde   :  { %2220 = vmatprep.subr.bf16.mxu1 %v6239_v43  ;;  %2261 = vmatprep.subr.bf16.mxu0 %v6367_v44 }
  0xe1   :  { %2221 = vmatpush1.bf16.msra.mxu1 %v6238_v45  ;;  %2262 = vmatpush1.bf16.msra.mxu0 %v6366_v46 }
  0xe2   :  { %2222 = vmatprep.subr.bf16.mxu1 %v6231_v51  ;;  %2263 = vmatprep.subr.bf16.mxu0 %v6359_v52 }
  0xe5   :  { %2223 = vmatpush1.bf16.msra.mxu1 %v6230_v53  ;;  %2264 = vmatpush1.bf16.msra.mxu0 %v6358_v54 }
  0xe6   :  { %2224 = vmatprep.subr.bf16.mxu1 %v6223_v59  ;;  %2265 = vmatprep.subr.bf16.mxu0 %v6351_v60 }
  0xe9   :  { %2225 = vmatpush1.bf16.msra.mxu1 %v6222_v61  ;;  %2266 = vmatpush1.bf16.msra.mxu0 %v6350_v62 }
  0xea   :  { %2226 = vmatprep.subr.bf16.mxu1 %v6215_v3  ;;  %2267 = vmatprep.subr.bf16.mxu0 %v6343_v4 }
  0xed   :  { %2227 = vmatpush1.bf16.msra.mxu1 %v6214_v5  ;;  %2268 = vmatpush1.bf16.msra.mxu0 %v6342_v6 }
  0xee   :  { %2228 = vmatprep.subr.bf16.mxu1 %v6207_v11  ;;  %2269 = vmatprep.subr.bf16.mxu0 %v6335_v12 }
  0xef   :  { %14 = vsyncpa [#allocation3], 0  ;;  %v644_v18 = vld [vmem:[%s10344_s5 + $0x20] sm:$0xff]  ;;  %v6198_v24 = vcombine.low %v648_v7, %v652_v8  ;;  %v6326_v25 = vcombine.low %v776_v9, %v780_v10  ;;  %vm6101_vm1 = vcmask 130048  }
  0xf0   :  { %v768_v20 = vld [vmem:[%s10344_s5 + $0x400] sm:$0xff]  ;;  %v6191_v26 = vcombine.high %v640_v17, %v644_v18  ;;  %v6190_v32 = vcombine.low %v640_v17, %v644_v18 }
  0xf1   :  { %v772_v23 = vld [vmem:[%s10344_s5 + $0x420] sm:$0xff]  ;;  %2229 = vmatpush1.bf16.msra.mxu1 %v6206_v13  ;;  %2270 = vmatpush1.bf16.msra.mxu0 %v6334_v14 }
  0xf2   :  { %2230 = vmatprep.subr.bf16.mxu1 %v6199_v15  ;;  %2271 = vmatprep.subr.bf16.mxu0 %v6327_v16  ;;  %v6319_v27 = vcombine.high %v768_v20, %v772_v23  ;;  %v760_v28 = vld [vmem:[%s10344_s5 + $0x3c0] sm:$0xff]  ;;  %v6318_v33 = vcombine.low %v768_v20, %v772_v23 }
  0xf3   :  { %v764_v29 = vld [vmem:[%s10344_s5 + $0x3e0] sm:$0xff] }
  0xf4   :  { %v888_v30 = vld [vmem:[%s10344_s5 + $0x7c0] sm:$0xff]  ;;  %v6311_v34 = vcombine.high %v760_v28, %v764_v29  ;;  %v6310_v40 = vcombine.low %v760_v28, %v764_v29 }
  0xf5   :  { %v892_v31 = vld [vmem:[%s10344_s5 + $0x7e0] sm:$0xff]  ;;  %2231 = vmatpush1.bf16.msra.mxu1 %v6198_v24  ;;  %2272 = vmatpush1.bf16.msra.mxu0 %v6326_v25 }
  0xf6   :  { %2232 = vmatprep.subr.bf16.mxu1 %v6191_v26  ;;  %2273 = vmatprep.subr.bf16.mxu0 %v6319_v27  ;;  %v6439_v35 = vcombine.high %v888_v30, %v892_v31  ;;  %v752_v36 = vld [vmem:[%s10344_s5 + $0x380] sm:$0xff]  ;;  %v6438_v41 = vcombine.low %v888_v30, %v892_v31 }
  0xf7   :  { %v756_v37 = vld [vmem:[%s10344_s5 + $0x3a0] sm:$0xff] }
  0xf8   :  { %v880_v38 = vld [vmem:[%s10344_s5 + $0x780] sm:$0xff]  ;;  %v6303_v42 = vcombine.high %v752_v36, %v756_v37  ;;  %v6302_v48 = vcombine.low %v752_v36, %v756_v37  ;;  %v829_v37 = vld [vmem:[%s10344_s5 + $0x5e8] sm:$0xff] }
  0xf9   :  { %v884_v39 = vld [vmem:[%s10344_s5 + $0x7a0] sm:$0xff]  ;;  %2233 = vmatpush1.bf16.msra.mxu1 %v6190_v32  ;;  %2274 = vmatpush1.bf16.msra.mxu0 %v6318_v33  ;;  %v697_v33 = vld [vmem:[%s10344_s5 + $0x1c8] sm:$0xff] }
  0xfa   :  { %2234 = vmatprep.subr.bf16.mxu1 %v6311_v34  ;;  %2275 = vmatprep.subr.bf16.mxu0 %v6439_v35  ;;  %v6431_v43 = vcombine.high %v880_v38, %v884_v39  ;;  %v744_v44 = vld [vmem:[%s10344_s5 + $0x340] sm:$0xff]  ;;  %v6430_v49 = vcombine.low %v880_v38, %v884_v39  ;;  %v701_v34 = vld [vmem:[%s10344_s5 + $0x1e8] sm:$0xff] }
  0xfb   :  { %v748_v45 = vld [vmem:[%s10344_s5 + $0x360] sm:$0xff]  ;;  %v825_v35 = vld [vmem:[%s10344_s5 + $0x5c8] sm:$0xff]  ;;  %v6249_v36 = vcombine.high %v697_v33, %v701_v34  ;;  %v6248_v38 = vcombine.low %v697_v33, %v701_v34 }
  0xfc   :  { %v872_v46 = vld [vmem:[%s10344_s5 + $0x740] sm:$0xff]  ;;  %v6295_v50 = vcombine.high %v744_v44, %v748_v45  ;;  %v6294_v56 = vcombine.low %v744_v44, %v748_v45  ;;  %v6376_v39 = vcombine.low %v825_v35, %v829_v37 }
  0xfd   :  { %v876_v47 = vld [vmem:[%s10344_s5 + $0x760] sm:$0xff]  ;;  %2235 = vmatpush2.bf16.msra.mxu1 %v6310_v40  ;;  %2276 = vmatpush2.bf16.msra.mxu0 %v6438_v41  ;;  %v6377_v40 = vcombine.high %v825_v35, %v829_v37  ;;  %v8258_v41 = vsub.s32 2, %v8052_v19  ;;  %v657_v37 = vld [vmem:[%s10344_s5 + $0x88] sm:$0xff] }
  0xfe   :  { %2236 = vmatprep.subr.bf16.mxu1 %v6303_v42  ;;  %2277 = vmatprep.subr.bf16.mxu0 %v6431_v43  ;;  %v6423_v51 = vcombine.high %v872_v46, %v876_v47  ;;  %v736_v52 = vld [vmem:[%s10344_s5 + $0x300] sm:$0xff]  ;;  %v6422_v57 = vcombine.low %v872_v46, %v876_v47  ;;  %v8264_v43 = vsub.s32 3, %v8052_v19 }
  0xff   :  { %v740_v53 = vld [vmem:[%s10344_s5 + $0x320] sm:$0xff] }
 0x100   :  { %v864_v54 = vld [vmem:[%s10344_s5 + $0x700] sm:$0xff]  ;;  %v6287_v58 = vcombine.high %v736_v52, %v740_v53  ;;  %v6286_v0 = vcombine.low %v736_v52, %v740_v53 }
 0x101   :  { %v868_v55 = vld [vmem:[%s10344_s5 + $0x720] sm:$0xff]  ;;  %2237 = vmatpush2.bf16.msra.mxu1 %v6302_v48  ;;  %2278 = vmatpush2.bf16.msra.mxu0 %v6430_v49 }
 0x102   :  { %2238 = vmatprep.subr.bf16.mxu1 %v6295_v50  ;;  %2279 = vmatprep.subr.bf16.mxu0 %v6423_v51  ;;  %v6415_v59 = vcombine.high %v864_v54, %v868_v55  ;;  %v728_v60 = vld [vmem:[%s10344_s5 + $0x2c0] sm:$0xff]  ;;  %v6414_v1 = vcombine.low %v864_v54, %v868_v55 }
 0x103   :  { %v732_v61 = vld [vmem:[%s10344_s5 + $0x2e0] sm:$0xff] }
 0x104   :  { %v856_v62 = vld [vmem:[%s10344_s5 + $0x6c0] sm:$0xff]  ;;  %v6279_v2 = vcombine.high %v728_v60, %v732_v61  ;;  %v6278_v8 = vcombine.low %v728_v60, %v732_v61 }
 0x105   :  { %v860_v63 = vld [vmem:[%s10344_s5 + $0x6e0] sm:$0xff]  ;;  %2239 = vmatpush2.bf16.msra.mxu1 %v6294_v56  ;;  %2280 = vmatpush2.bf16.msra.mxu0 %v6422_v57 }
 0x106   :  { %2240 = vmatprep.subr.bf16.mxu1 %v6287_v58  ;;  %2281 = vmatprep.subr.bf16.mxu0 %v6415_v59  ;;  %v6407_v3 = vcombine.high %v856_v62, %v860_v63  ;;  %v720_v4 = vld [vmem:[%s10344_s5 + $0x280] sm:$0xff]  ;;  %v6406_v9 = vcombine.low %v856_v62, %v860_v63  ;;  %v689_v62 = vld [vmem:[%s10344_s5 + $0x188] sm:$0xff] }
 0x107   :  { %v724_v5 = vld [vmem:[%s10344_s5 + $0x2a0] sm:$0xff] }
 0x108   :  { %v848_v6 = vld [vmem:[%s10344_s5 + $0x680] sm:$0xff]  ;;  %v6271_v10 = vcombine.high %v720_v4, %v724_v5  ;;  %v6270_v12 = vcombine.low %v720_v4, %v724_v5 }
 0x109   :  { %v852_v7 = vld [vmem:[%s10344_s5 + $0x6a0] sm:$0xff]  ;;  %2241 = vmatpush2.bf16.msra.mxu1 %v6286_v0  ;;  %2282 = vmatpush2.bf16.msra.mxu0 %v6414_v1  ;;  %v693_v1 = vld [vmem:[%s10344_s5 + $0x1a8] sm:$0xff] }
 0x10a   :  { %2242 = vmatprep.subr.bf16.mxu1 %v6279_v2  ;;  %2283 = vmatprep.subr.bf16.mxu0 %v6407_v3  ;;  %v6399_v11 = vcombine.high %v848_v6, %v852_v7  ;;  %v6398_v13 = vcombine.low %v848_v6, %v852_v7  ;;  %v712_v14 = vld [vmem:[%s10344_s5 + $0x240] sm:$0xff]  ;;  %v817_v2 = vld [vmem:[%s10344_s5 + $0x588] sm:$0xff] }
 0x10b   :  { %v716_v15 = vld [vmem:[%s10344_s5 + $0x260] sm:$0xff]  ;;  %v821_v3 = vld [vmem:[%s10344_s5 + $0x5a8] sm:$0xff] }
 0x10c   :  { %v840_v16 = vld [vmem:[%s10344_s5 + $0x640] sm:$0xff]  ;;  %v6263_v17 = vcombine.high %v712_v14, %v716_v15  ;;  %v6262_v20 = vcombine.low %v712_v14, %v716_v15  ;;  %v6240_v14 = vcombine.low %v689_v62, %v693_v1  ;;  %v6368_v15 = vcombine.low %v817_v2, %v821_v3 }
 0x10d   :  { %2243 = vmatpush2.bf16.msra.mxu1 %v6278_v8  ;;  %2284 = vmatpush2.bf16.msra.mxu0 %v6406_v9  ;;  %v844_v18 = vld [vmem:[%s10344_s5 + $0x660] sm:$0xff]  ;;  %v681_v8 = vld [vmem:[%s10344_s5 + $0x148] sm:$0xff]  ;;  %v6241_v9 = vcombine.high %v689_v62, %v693_v1 }
 0x10e   :  { %2244 = vmatprep.subr.bf16.mxu1 %v6271_v10  ;;  %2285 = vmatprep.subr.bf16.mxu0 %v6399_v11  ;;  %v6390_v23 = vcombine.low %v840_v16, %v844_v18  ;;  %v6391_v24 = vcombine.high %v840_v16, %v844_v18  ;;  %v704_v25 = vld [vmem:[%s10344_s5 + $0x200] sm:$0xff]  ;;  %v6369_v10 = vcombine.high %v817_v2, %v821_v3  ;;  %v685_v11 = vld [vmem:[%s10344_s5 + $0x168] sm:$0xff] }
 0x10f   :  { %v708_v26 = vld [vmem:[%s10344_s5 + $0x220] sm:$0xff]  ;;  %v6233_v16 = vcombine.high %v681_v8, %v685_v11  ;;  %v673_v18 = vld [vmem:[%s10344_s5 + $0x108] sm:$0xff] }
 0x110   :  { %v832_v27 = vld [vmem:[%s10344_s5 + $0x600] sm:$0xff]  ;;  %v6255_v28 = vcombine.high %v704_v25, %v708_v26  ;;  %v6254_v30 = vcombine.low %v704_v25, %v708_v26  ;;  %v6232_v25 = vcombine.low %v681_v8, %v685_v11  ;;  %v889_v1 = vld [vmem:[%s10344_s5 + $0x7c8] sm:$0xff] }
 0x111   :  { %2245 = vmatpush2.bf16.msra.mxu1 %v6270_v12  ;;  %2286 = vmatpush2.bf16.msra.mxu0 %v6398_v13  ;;  %v836_v29 = vld [vmem:[%s10344_s5 + $0x620] sm:$0xff]  ;;  %v809_v12 = vld [vmem:[%s10344_s5 + $0x548] sm:$0xff] }
 0x112   :  { %2246 = vmatprep.subr.bf16.mxu1 %v6263_v17  ;;  %2287 = vmatprep.subr.bf16.mxu0 %v6391_v24  ;;  %v6382_v31 = vcombine.low %v832_v27, %v836_v29  ;;  %v6383_v32 = vcombine.high %v832_v27, %v836_v29  ;;  %v208_v42 = vld [vmem:[%s10343_s4] sm:$0xf]  ;;  %v813_v13 = vld [vmem:[%s10344_s5 + $0x568] sm:$0xff] }
 0x113   :  { %v213_v44 = vrot.slane %v208_v42, %v8058_v21  ;;  %v221_v45 = vrot.slane %v208_v42, %v8258_v41  ;;  %v217_v46 = vrot.slane %v208_v42, %v8061_v22  ;;  %v225_v47 = vrot.slane %v208_v42, %v8264_v43  ;;  %v805_v24 = vld [vmem:[%s10344_s5 + $0x528] sm:$0xff] }
 0x114   :  { %v6361_v17 = vcombine.high %v809_v12, %v813_v13  ;;  %v6360_v26 = vcombine.low %v809_v12, %v813_v13  ;;  %v665_v29 = vld [vmem:[%s10344_s5 + $0xc8] sm:$0xff] }
 0x115   :  { %2247 = vmatpush2.bf16.msra.mxu1 %v6262_v20  ;;  %2288 = vmatpush2.bf16.msra.mxu0 %v6390_v23  ;;  %v677_v20 = vld [vmem:[%s10344_s5 + $0x128] sm:$0xff] }
 0x116   :  { %2248 = vmatprep.subr.bf16.mxu1 %v6255_v28  ;;  %2289 = vmatprep.subr.bf16.mxu0 %v6383_v32  ;;  %v801_v23 = vld [vmem:[%s10344_s5 + $0x508] sm:$0xff]  ;;  %v6225_v27 = vcombine.high %v673_v18, %v677_v20  ;;  %v6224_v33 = vcombine.low %v673_v18, %v677_v20 }
 0x117   :  { %v6353_v28 = vcombine.high %v801_v23, %v805_v24  ;;  %v797_v32 = vld [vmem:[%s10344_s5 + $0x4e8] sm:$0xff]  ;;  %v6352_v34 = vcombine.low %v801_v23, %v805_v24 }
 0x118   :  { %v893_v2 = vld [vmem:[%s10344_s5 + $0x7e8] sm:$0xff] }
 0x119   :  { %2249 = vmatpush2.bf16.msra.mxu1 %v6254_v30  ;;  %2290 = vmatpush2.bf16.msra.mxu0 %v6382_v31  ;;  %v669_v30 = vld [vmem:[%s10344_s5 + $0xe8] sm:$0xff] }
 0x11a   :  { %2300 = vmatprep.subr.bf16.mxu1 %v6249_v36  ;;  %2341 = vmatprep.subr.bf16.mxu0 %v6377_v40  ;;  %v793_v31 = vld [vmem:[%s10344_s5 + $0x4c8] sm:$0xff]  ;;  %v6217_v35 = vcombine.high %v665_v29, %v669_v30  ;;  %v6216_v42 = vcombine.low %v665_v29, %v669_v30 }
 0x11b   :  { %v6345_v36 = vcombine.high %v793_v31, %v797_v32  ;;  %v789_v40 = vld [vmem:[%s10344_s5 + $0x4a8] sm:$0xff] }
 0x11c   :  { %v753_v11 = vld [vmem:[%s10344_s5 + $0x388] sm:$0xff] }
 0x11d   :  { %v757_v12 = vld [vmem:[%s10344_s5 + $0x3a8] sm:$0xff] }
 0x11e   :  { %v881_v13 = vld [vmem:[%s10344_s5 + $0x788] sm:$0xff] }
 0x11f   :  { %v745_v20 = vld [vmem:[%s10344_s5 + $0x348] sm:$0xff] }
 0x120   :  { %v749_v23 = vld [vmem:[%s10344_s5 + $0x368] sm:$0xff] }
 0x121   :  { %v873_v24 = vld [vmem:[%s10344_s5 + $0x748] sm:$0xff] }
 0x122   :  { %v737_v30 = vld [vmem:[%s10344_s5 + $0x308] sm:$0xff] }
 0x19c   :  { %v584_v48 = vpop.f32.mrf.mxu1  ;;  %v625_v49 = vpop.f32.mrf.mxu0 }
 0x19d   :  { %v585_v50 = vadd.f32 %v584_v48, %v213_v44  ;;  %v626_v51 = vadd.f32 %v625_v49, %v221_v45  ;;  %v6344_v44 = vcombine.low %v793_v31, %v797_v32  ;;  %v653_v48 = vld [vmem:[%s10344_s5 + $0x68] sm:$0xff] }
 0x19e   :  { %v586_v52 = vpop.f32.mrf.mxu1  ;;  %v627_v53 = vpop.f32.mrf.mxu0  ;;  %v777_v49 = vld [vmem:[%s10344_s5 + $0x448] sm:$0xff] }
 0x19f   :  { %v587_v54 = vadd.f32 %v586_v52, %v217_v46  ;;  %v628_v55 = vadd.f32 %v627_v53, %v225_v47  ;;  %v632_v56 = vmax.f32 %v585_v50, 0.0  ;;  %v634_v57 = vmax.f32 %v626_v51, 0.0  ;;  %v649_v47 = vld [vmem:[%s10344_s5 + $0x48] sm:$0xff] }
 0x1a0   :  { %v588_v58 = vpop.f32.mrf.mxu1  ;;  %v629_v59 = vpop.f32.mrf.mxu0  ;;  %v781_v50 = vld [vmem:[%s10344_s5 + $0x468] sm:$0xff]  ;;  %v6201_v53 = vcombine.high %v649_v47, %v653_v48 }
 0x1a1   :  { %v633_v60 = vmax.f32 %v587_v54, 0.0  ;;  %v635_v61 = vmax.f32 %v628_v55, 0.0  ;;  %v8286_v6 = vpack.c.bf16 %v632_v56, %v632_v56  ;;  %v8288_v7 = vpack.c.bf16 %v634_v57, %v634_v57  ;;  %v641_v55 = vld [vmem:[%s10344_s5 + $0x8] sm:$0xff] }
 0x1a2   :  { %v589_v63 = vpop.f32.mrf.mxu1  ;;  %v630_v0 = vpop.f32.mrf.mxu0  ;;  %v6329_v54 = vcombine.high %v777_v49, %v781_v50  ;;  %v645_v56 = vld [vmem:[%s10344_s5 + $0x28] sm:$0xff]  ;;  %v6200_v59 = vcombine.low %v649_v47, %v653_v48 }
 0x1a3   :  { %v8282_v4 = vpack.c.bf16 %v633_v60, %v633_v60  ;;  %v8284_v5 = vpack.c.bf16 %v635_v61, %v635_v61  ;;  %v769_v57 = vld [vmem:[%s10344_s5 + $0x408] sm:$0xff]  ;;  %v6328_v60 = vcombine.low %v777_v49, %v781_v50  ;;  %v6193_v61 = vcombine.high %v641_v55, %v645_v56 }
 0x1a4   :  { %v773_v58 = vld [vmem:[%s10344_s5 + $0x428] sm:$0xff]  ;;  %v6192_v3 = vcombine.low %v641_v55, %v645_v56 }
 0x1a5   :  { %2250 = vmatprep.mubr.bf16.mxu1 %v8282_v4  ;;  %2291 = vmatprep.mubr.bf16.mxu0 %v8284_v5  ;;  %v6321_v62 = vcombine.high %v769_v57, %v773_v58  ;;  %v761_v63 = vld [vmem:[%s10344_s5 + $0x3c8] sm:$0xff]  ;;  %v6320_v8 = vcombine.low %v769_v57, %v773_v58 }
 0x1a6   :  { %2251 = vmatmul.mubr.bf16.vlgmr.msra.gmra.mxu1 %v8286_v6  ;;  %2292 = vmatmul.mubr.bf16.vlgmr.msra.gmra.mxu0 %v8288_v7  ;;  %v765_v0 = vld [vmem:[%s10344_s5 + $0x3e8] sm:$0xff] }
 0x1a7   :  { %2301 = vmatpush1.bf16.msra.mxu1 %v6248_v38  ;;  %2342 = vmatpush1.bf16.msra.mxu0 %v6376_v39  ;;  %v661_v38 = vld [vmem:[%s10344_s5 + $0xa8] sm:$0xff] }
 0x1a8   :  { %2332 = vmatprep.mubr.bf16.mxu1 %v8282_v4  ;;  %2373 = vmatprep.mubr.bf16.mxu0 %v8284_v5  ;;  %v785_v39 = vld [vmem:[%s10344_s5 + $0x488] sm:$0xff]  ;;  %v6209_v45 = vcombine.high %v657_v37, %v661_v38  ;;  %v6208_v51 = vcombine.low %v657_v37, %v661_v38 }
 0x1a9   :  { %2302 = vmatprep.subr.bf16.mxu1 %v6241_v9  ;;  %2343 = vmatprep.subr.bf16.mxu0 %v6369_v10  ;;  %v6337_v46 = vcombine.high %v785_v39, %v789_v40  ;;  %v6336_v52 = vcombine.low %v785_v39, %v789_v40  ;;  %v6313_v9 = vcombine.high %v761_v63, %v765_v0  ;;  %v741_v31 = vld [vmem:[%s10344_s5 + $0x328] sm:$0xff] }
 0x1aa   :  { %v6441_v10 = vcombine.high %v889_v1, %v893_v2  ;;  %v865_v32 = vld [vmem:[%s10344_s5 + $0x708] sm:$0xff] }
 0x1ab   :  { %2303 = vmatpush1.bf16.msra.mxu1 %v6240_v14  ;;  %2344 = vmatpush1.bf16.msra.mxu0 %v6368_v15  ;;  %v885_v14 = vld [vmem:[%s10344_s5 + $0x7a8] sm:$0xff]  ;;  %v6312_v15 = vcombine.low %v761_v63, %v765_v0 }
 0x1ac   :  { %2304 = vmatprep.subr.bf16.mxu1 %v6233_v16  ;;  %2345 = vmatprep.subr.bf16.mxu0 %v6361_v17  ;;  %v6440_v16 = vcombine.low %v889_v1, %v893_v2  ;;  %v6305_v17 = vcombine.high %v753_v11, %v757_v12  ;;  %v6433_v18 = vcombine.high %v881_v13, %v885_v14  ;;  %v729_v38 = vld [vmem:[%s10344_s5 + $0x2c8] sm:$0xff] }
 0x1ad   :  { %v733_v39 = vld [vmem:[%s10344_s5 + $0x2e8] sm:$0xff] }
 0x1ae   :  { %v857_v40 = vld [vmem:[%s10344_s5 + $0x6c8] sm:$0xff] }
 0x1af   :  { %2305 = vmatpush1.bf16.msra.mxu1 %v6232_v25  ;;  %2346 = vmatpush1.bf16.msra.mxu0 %v6360_v26  ;;  %v877_v25 = vld [vmem:[%s10344_s5 + $0x768] sm:$0xff]  ;;  %v6304_v26 = vcombine.low %v753_v11, %v757_v12  ;;  %v698_v12 = vld [vmem:[%s10344_s5 + $0x1d0] sm:$0xff] }
 0x1b0   :  { %2306 = vmatprep.subr.bf16.mxu1 %v6225_v27  ;;  %2347 = vmatprep.subr.bf16.mxu0 %v6353_v28  ;;  %v6432_v27 = vcombine.low %v881_v13, %v885_v14  ;;  %v6297_v28 = vcombine.high %v745_v20, %v749_v23  ;;  %v6425_v29 = vcombine.high %v873_v24, %v877_v25  ;;  %v721_v48 = vld [vmem:[%s10344_s5 + $0x288] sm:$0xff]  ;;  %v702_v13 = vld [vmem:[%s10344_s5 + $0x1f0] sm:$0xff] }
 0x1b1   :  { %v725_v49 = vld [vmem:[%s10344_s5 + $0x2a8] sm:$0xff]  ;;  %v826_v14 = vld [vmem:[%s10344_s5 + $0x5d0] sm:$0xff] }
 0x1b2   :  { %v849_v50 = vld [vmem:[%s10344_s5 + $0x688] sm:$0xff] }
 0x1b3   :  { %2307 = vmatpush1.bf16.msra.mxu1 %v6224_v33  ;;  %2348 = vmatpush1.bf16.msra.mxu0 %v6352_v34  ;;  %v869_v33 = vld [vmem:[%s10344_s5 + $0x728] sm:$0xff]  ;;  %v6296_v34 = vcombine.low %v745_v20, %v749_v23  ;;  %v690_v23 = vld [vmem:[%s10344_s5 + $0x190] sm:$0xff] }
 0x1b4   :  { %2308 = vmatprep.subr.bf16.mxu1 %v6217_v35  ;;  %2349 = vmatprep.subr.bf16.mxu0 %v6345_v36  ;;  %v6424_v35 = vcombine.low %v873_v24, %v877_v25  ;;  %v6289_v36 = vcombine.high %v737_v30, %v741_v31  ;;  %v6417_v37 = vcombine.high %v865_v32, %v869_v33  ;;  %v713_v56 = vld [vmem:[%s10344_s5 + $0x248] sm:$0xff]  ;;  %v694_v24 = vld [vmem:[%s10344_s5 + $0x1b0] sm:$0xff] }
 0x1b5   :  { %v717_v57 = vld [vmem:[%s10344_s5 + $0x268] sm:$0xff]  ;;  %v818_v25 = vld [vmem:[%s10344_s5 + $0x590] sm:$0xff] }
 0x1b6   :  { %v841_v58 = vld [vmem:[%s10344_s5 + $0x648] sm:$0xff] }
 0x1b7   :  { %2309 = vmatpush1.bf16.msra.mxu1 %v6216_v42  ;;  %2350 = vmatpush1.bf16.msra.mxu0 %v6344_v44  ;;  %v861_v42 = vld [vmem:[%s10344_s5 + $0x6e8] sm:$0xff]  ;;  %v6288_v44 = vcombine.low %v737_v30, %v741_v31  ;;  %v682_v31 = vld [vmem:[%s10344_s5 + $0x150] sm:$0xff] }
 0x1b8   :  { %2310 = vmatprep.subr.bf16.mxu1 %v6209_v45  ;;  %2351 = vmatprep.subr.bf16.mxu0 %v6337_v46  ;;  %v6416_v45 = vcombine.low %v865_v32, %v869_v33  ;;  %v6281_v46 = vcombine.high %v729_v38, %v733_v39  ;;  %v6409_v47 = vcombine.high %v857_v40, %v861_v42  ;;  %v705_v0 = vld [vmem:[%s10344_s5 + $0x208] sm:$0xff]  ;;  %v686_v32 = vld [vmem:[%s10344_s5 + $0x170] sm:$0xff] }
 0x1b9   :  { %v709_v1 = vld [vmem:[%s10344_s5 + $0x228] sm:$0xff]  ;;  %v810_v33 = vld [vmem:[%s10344_s5 + $0x550] sm:$0xff] }
 0x1ba   :  { %v833_v2 = vld [vmem:[%s10344_s5 + $0x608] sm:$0xff] }
 0x1bb   :  { %2311 = vmatpush1.bf16.msra.mxu1 %v6208_v51  ;;  %2352 = vmatpush1.bf16.msra.mxu0 %v6336_v52  ;;  %v853_v51 = vld [vmem:[%s10344_s5 + $0x6a8] sm:$0xff]  ;;  %v6280_v52 = vcombine.low %v729_v38, %v733_v39  ;;  %v674_v39 = vld [vmem:[%s10344_s5 + $0x110] sm:$0xff] }
 0x1bc   :  { %2312 = vmatprep.subr.bf16.mxu1 %v6201_v53  ;;  %2353 = vmatprep.subr.bf16.mxu0 %v6329_v54  ;;  %v6408_v53 = vcombine.low %v857_v40, %v861_v42  ;;  %v6273_v54 = vcombine.high %v721_v48, %v725_v49  ;;  %v6401_v55 = vcombine.high %v849_v50, %v853_v51  ;;  %v678_v40 = vld [vmem:[%s10344_s5 + $0x130] sm:$0xff] }
 0x1bd   :  { %v802_v42 = vld [vmem:[%s10344_s5 + $0x510] sm:$0xff] }
 0x1bf   :  { %2313 = vmatpush1.bf16.msra.mxu1 %v6200_v59  ;;  %2354 = vmatpush1.bf16.msra.mxu0 %v6328_v60  ;;  %v845_v59 = vld [vmem:[%s10344_s5 + $0x668] sm:$0xff]  ;;  %v6272_v60 = vcombine.low %v721_v48, %v725_v49  ;;  %v666_v49 = vld [vmem:[%s10344_s5 + $0xd0] sm:$0xff] }
 0x1c0   :  { %2314 = vmatprep.subr.bf16.mxu1 %v6193_v61  ;;  %2355 = vmatprep.subr.bf16.mxu0 %v6321_v62  ;;  %v6400_v61 = vcombine.low %v849_v50, %v853_v51  ;;  %v6265_v62 = vcombine.high %v713_v56, %v717_v57  ;;  %v6393_v63 = vcombine.high %v841_v58, %v845_v59  ;;  %v670_v50 = vld [vmem:[%s10344_s5 + $0xf0] sm:$0xff] }
 0x1c1   :  { %v794_v51 = vld [vmem:[%s10344_s5 + $0x4d0] sm:$0xff] }
 0x1c3   :  { %2315 = vmatpush1.bf16.msra.mxu1 %v6192_v3  ;;  %2356 = vmatpush1.bf16.msra.mxu0 %v6320_v8  ;;  %v837_v3 = vld [vmem:[%s10344_s5 + $0x628] sm:$0xff]  ;;  %v6264_v8 = vcombine.low %v713_v56, %v717_v57  ;;  %v658_v57 = vld [vmem:[%s10344_s5 + $0x90] sm:$0xff] }
 0x1c4   :  { %2316 = vmatprep.subr.bf16.mxu1 %v6313_v9  ;;  %2357 = vmatprep.subr.bf16.mxu0 %v6441_v10  ;;  %v6392_v9 = vcombine.low %v841_v58, %v845_v59  ;;  %v6257_v10 = vcombine.high %v705_v0, %v709_v1  ;;  %v6385_v11 = vcombine.high %v833_v2, %v837_v3  ;;  %v662_v58 = vld [vmem:[%s10344_s5 + $0xb0] sm:$0xff] }
 0x1c5   :  { %v786_v59 = vld [vmem:[%s10344_s5 + $0x490] sm:$0xff] }
 0x1c7   :  { %2317 = vmatpush2.bf16.msra.mxu1 %v6312_v15  ;;  %2358 = vmatpush2.bf16.msra.mxu0 %v6440_v16  ;;  %v830_v15 = vld [vmem:[%s10344_s5 + $0x5f0] sm:$0xff]  ;;  %v6256_v16 = vcombine.low %v705_v0, %v709_v1 }
 0x1c8   :  { %2318 = vmatprep.subr.bf16.mxu1 %v6305_v17  ;;  %2359 = vmatprep.subr.bf16.mxu0 %v6433_v18  ;;  %v6384_v17 = vcombine.low %v833_v2, %v837_v3  ;;  %v6251_v18 = vcombine.high %v698_v12, %v702_v13  ;;  %v6379_v20 = vcombine.high %v826_v14, %v830_v15  ;;  %v650_v1 = vld [vmem:[%s10344_s5 + $0x50] sm:$0xff] }
 0x1c9   :  { %v654_v2 = vld [vmem:[%s10344_s5 + $0x70] sm:$0xff] }
 0x1ca   :  { %v778_v3 = vld [vmem:[%s10344_s5 + $0x450] sm:$0xff] }
 0x1cb   :  { %2319 = vmatpush2.bf16.msra.mxu1 %v6304_v26  ;;  %2360 = vmatpush2.bf16.msra.mxu0 %v6432_v27  ;;  %v822_v26 = vld [vmem:[%s10344_s5 + $0x5b0] sm:$0xff]  ;;  %v6250_v27 = vcombine.low %v698_v12, %v702_v13 }
 0x1cc   :  { %2320 = vmatprep.subr.bf16.mxu1 %v6297_v28  ;;  %2361 = vmatprep.subr.bf16.mxu0 %v6425_v29  ;;  %v6378_v28 = vcombine.low %v826_v14, %v830_v15  ;;  %v6243_v29 = vcombine.high %v690_v23, %v694_v24  ;;  %v6371_v30 = vcombine.high %v818_v25, %v822_v26  ;;  %v642_v13 = vld [vmem:[%s10344_s5 + $0x10] sm:$0xff] }
 0x1cd   :  { %v646_v14 = vld [vmem:[%s10344_s5 + $0x30] sm:$0xff] }
 0x1ce   :  { %v770_v15 = vld [vmem:[%s10344_s5 + $0x410] sm:$0xff] }
 0x1cf   :  { %2321 = vmatpush2.bf16.msra.mxu1 %v6296_v34  ;;  %2362 = vmatpush2.bf16.msra.mxu0 %v6424_v35  ;;  %v814_v34 = vld [vmem:[%s10344_s5 + $0x570] sm:$0xff]  ;;  %v6242_v35 = vcombine.low %v690_v23, %v694_v24 }
 0x1d0   :  { %2322 = vmatprep.subr.bf16.mxu1 %v6289_v36  ;;  %2363 = vmatprep.subr.bf16.mxu0 %v6417_v37  ;;  %v6370_v36 = vcombine.low %v818_v25, %v822_v26  ;;  %v6235_v37 = vcombine.high %v682_v31, %v686_v32  ;;  %v6363_v38 = vcombine.high %v810_v33, %v814_v34  ;;  %v762_v24 = vld [vmem:[%s10344_s5 + $0x3d0] sm:$0xff] }
 0x1d1   :  { %v766_v25 = vld [vmem:[%s10344_s5 + $0x3f0] sm:$0xff] }
 0x1d2   :  { %v890_v26 = vld [vmem:[%s10344_s5 + $0x7d0] sm:$0xff] }
 0x1d3   :  { %2323 = vmatpush2.bf16.msra.mxu1 %v6288_v44  ;;  %2364 = vmatpush2.bf16.msra.mxu0 %v6416_v45  ;;  %v806_v44 = vld [vmem:[%s10344_s5 + $0x530] sm:$0xff]  ;;  %v6234_v45 = vcombine.low %v682_v31, %v686_v32 }
 0x1d4   :  { %2324 = vmatprep.subr.bf16.mxu1 %v6281_v46  ;;  %2365 = vmatprep.subr.bf16.mxu0 %v6409_v47  ;;  %v6362_v46 = vcombine.low %v810_v33, %v814_v34  ;;  %v6227_v47 = vcombine.high %v674_v39, %v678_v40  ;;  %v6355_v48 = vcombine.high %v802_v42, %v806_v44  ;;  %v754_v32 = vld [vmem:[%s10344_s5 + $0x390] sm:$0xff] }
 0x1d5   :  { %v758_v33 = vld [vmem:[%s10344_s5 + $0x3b0] sm:$0xff] }
 0x1d6   :  { %v882_v34 = vld [vmem:[%s10344_s5 + $0x790] sm:$0xff] }
 0x1d7   :  { %2325 = vmatpush2.bf16.msra.mxu1 %v6280_v52  ;;  %2366 = vmatpush2.bf16.msra.mxu0 %v6408_v53  ;;  %v798_v52 = vld [vmem:[%s10344_s5 + $0x4f0] sm:$0xff]  ;;  %v6226_v53 = vcombine.low %v674_v39, %v678_v40 }
 0x1d8   :  { %2326 = vmatprep.subr.bf16.mxu1 %v6273_v54  ;;  %2367 = vmatprep.subr.bf16.mxu0 %v6401_v55  ;;  %v6354_v54 = vcombine.low %v802_v42, %v806_v44  ;;  %v6219_v55 = vcombine.high %v666_v49, %v670_v50  ;;  %v6347_v56 = vcombine.high %v794_v51, %v798_v52  ;;  %v746_v40 = vld [vmem:[%s10344_s5 + $0x350] sm:$0xff] }
 0x1d9   :  { %v750_v42 = vld [vmem:[%s10344_s5 + $0x370] sm:$0xff] }
 0x1da   :  { %v874_v44 = vld [vmem:[%s10344_s5 + $0x750] sm:$0xff] }
 0x1db   :  { %2327 = vmatpush2.bf16.msra.mxu1 %v6272_v60  ;;  %2368 = vmatpush2.bf16.msra.mxu0 %v6400_v61  ;;  %v790_v60 = vld [vmem:[%s10344_s5 + $0x4b0] sm:$0xff]  ;;  %v6218_v61 = vcombine.low %v666_v49, %v670_v50 }
 0x1dc   :  { %2328 = vmatprep.subr.bf16.mxu1 %v6265_v62  ;;  %2369 = vmatprep.subr.bf16.mxu0 %v6393_v63  ;;  %v6346_v62 = vcombine.low %v794_v51, %v798_v52  ;;  %v6211_v63 = vcombine.high %v658_v57, %v662_v58  ;;  %v6339_v0 = vcombine.high %v786_v59, %v790_v60  ;;  %v738_v50 = vld [vmem:[%s10344_s5 + $0x310] sm:$0xff] }
 0x1dd   :  { %v742_v51 = vld [vmem:[%s10344_s5 + $0x330] sm:$0xff] }
 0x1de   :  { %v866_v52 = vld [vmem:[%s10344_s5 + $0x710] sm:$0xff] }
 0x1df   :  { %2329 = vmatpush2.bf16.msra.mxu1 %v6264_v8  ;;  %2370 = vmatpush2.bf16.msra.mxu0 %v6392_v9  ;;  %v782_v8 = vld [vmem:[%s10344_s5 + $0x470] sm:$0xff]  ;;  %v6210_v9 = vcombine.low %v658_v57, %v662_v58 }
 0x1e0   :  { %2330 = vmatprep.subr.bf16.mxu1 %v6257_v10  ;;  %2371 = vmatprep.subr.bf16.mxu0 %v6385_v11  ;;  %v6338_v10 = vcombine.low %v786_v59, %v790_v60  ;;  %v6203_v11 = vcombine.high %v650_v1, %v654_v2  ;;  %v6331_v12 = vcombine.high %v778_v3, %v782_v8  ;;  %v730_v58 = vld [vmem:[%s10344_s5 + $0x2d0] sm:$0xff] }
 0x1e1   :  { %v734_v59 = vld [vmem:[%s10344_s5 + $0x2f0] sm:$0xff] }
 0x1e2   :  { %v858_v60 = vld [vmem:[%s10344_s5 + $0x6d0] sm:$0xff] }
 0x1e3   :  { %2331 = vmatpush2.bf16.msra.mxu1 %v6256_v16  ;;  %2372 = vmatpush2.bf16.msra.mxu0 %v6384_v17  ;;  %v774_v16 = vld [vmem:[%s10344_s5 + $0x430] sm:$0xff]  ;;  %v6202_v17 = vcombine.low %v650_v1, %v654_v2 }
 0x1e4   :  { %2382 = vmatprep.subr.bf16.mxu1 %v6251_v18  ;;  %2423 = vmatprep.subr.bf16.mxu0 %v6379_v20  ;;  %v6330_v18 = vcombine.low %v778_v3, %v782_v8  ;;  %v6195_v20 = vcombine.high %v642_v13, %v646_v14  ;;  %v6323_v23 = vcombine.high %v770_v15, %v774_v16  ;;  %v722_v2 = vld [vmem:[%s10344_s5 + $0x290] sm:$0xff] }
 0x1e5   :  { %v726_v3 = vld [vmem:[%s10344_s5 + $0x2b0] sm:$0xff] }
 0x1e6   :  { %2333 = vmatmul.mubr.bf16.vlgmr.msra.gmra.mxu1 %v8286_v6  ;;  %2374 = vmatmul.mubr.bf16.vlgmr.msra.gmra.mxu0 %v8288_v7  ;;  %v850_v8 = vld [vmem:[%s10344_s5 + $0x690] sm:$0xff] }
 0x1e7   :  { %2383 = vmatpush1.bf16.msra.mxu1 %v6250_v27  ;;  %2414 = vmatprep.mubr.bf16.mxu1 %v8282_v4  ;;  %v894_v27 = vld [vmem:[%s10344_s5 + $0x7f0] sm:$0xff] }
 0x1e8   :  { %2424 = vmatpush1.bf16.msra.mxu0 %v6378_v28  ;;  %2455 = vmatprep.mubr.bf16.mxu0 %v8284_v5  ;;  %v6194_v28 = vcombine.low %v642_v13, %v646_v14  ;;  %v6443_v31 = vcombine.high %v890_v26, %v894_v27  ;;  %v714_v14 = vld [vmem:[%s10344_s5 + $0x250] sm:$0xff] }
 0x1e9   :  { %2384 = vmatprep.subr.bf16.mxu1 %v6243_v29  ;;  %2425 = vmatprep.subr.bf16.mxu0 %v6371_v30  ;;  %v6322_v29 = vcombine.low %v770_v15, %v774_v16  ;;  %v6315_v30 = vcombine.high %v762_v24, %v766_v25  ;;  %v718_v15 = vld [vmem:[%s10344_s5 + $0x270] sm:$0xff] }
 0x1ea   :  { %v842_v16 = vld [vmem:[%s10344_s5 + $0x650] sm:$0xff] }
 0x1eb   :  { %2385 = vmatpush1.bf16.msra.mxu1 %v6242_v35  ;;  %v886_v35 = vld [vmem:[%s10344_s5 + $0x7b0] sm:$0xff] }
 0x1ec   :  { %2426 = vmatpush1.bf16.msra.mxu0 %v6370_v36  ;;  %2386 = vmatprep.subr.bf16.mxu1 %v6235_v37  ;;  %v6314_v36 = vcombine.low %v762_v24, %v766_v25  ;;  %v6442_v37 = vcombine.low %v890_v26, %v894_v27  ;;  %v6435_v39 = vcombine.high %v882_v34, %v886_v35  ;;  %v706_v25 = vld [vmem:[%s10344_s5 + $0x210] sm:$0xff] }
 0x1ed   :  { %2427 = vmatprep.subr.bf16.mxu0 %v6363_v38  ;;  %v6307_v38 = vcombine.high %v754_v32, %v758_v33  ;;  %v710_v26 = vld [vmem:[%s10344_s5 + $0x230] sm:$0xff] }
 0x1ee   :  { %v834_v27 = vld [vmem:[%s10344_s5 + $0x610] sm:$0xff] }
 0x1ef   :  { %2387 = vmatpush1.bf16.msra.mxu1 %v6234_v45  ;;  %v878_v45 = vld [vmem:[%s10344_s5 + $0x770] sm:$0xff] }
 0x1f0   :  { %2428 = vmatpush1.bf16.msra.mxu0 %v6362_v46  ;;  %2388 = vmatprep.subr.bf16.mxu1 %v6227_v47  ;;  %v6306_v46 = vcombine.low %v754_v32, %v758_v33  ;;  %v6434_v47 = vcombine.low %v882_v34, %v886_v35  ;;  %v6427_v49 = vcombine.high %v874_v44, %v878_v45  ;;  %v699_v33 = vld [vmem:[%s10344_s5 + $0x1d8] sm:$0xff] }
 0x1f1   :  { %2429 = vmatprep.subr.bf16.mxu0 %v6355_v48  ;;  %v6299_v48 = vcombine.high %v746_v40, %v750_v42  ;;  %v703_v34 = vld [vmem:[%s10344_s5 + $0x1f8] sm:$0xff] }
 0x1f2   :  { %v827_v35 = vld [vmem:[%s10344_s5 + $0x5d8] sm:$0xff] }
 0x1f3   :  { %2389 = vmatpush1.bf16.msra.mxu1 %v6226_v53  ;;  %v870_v53 = vld [vmem:[%s10344_s5 + $0x730] sm:$0xff] }
 0x1f4   :  { %2430 = vmatpush1.bf16.msra.mxu0 %v6354_v54  ;;  %2390 = vmatprep.subr.bf16.mxu1 %v6219_v55  ;;  %v6298_v54 = vcombine.low %v746_v40, %v750_v42  ;;  %v6426_v55 = vcombine.low %v874_v44, %v878_v45  ;;  %v6419_v57 = vcombine.high %v866_v52, %v870_v53  ;;  %v691_v42 = vld [vmem:[%s10344_s5 + $0x198] sm:$0xff] }
 0x1f5   :  { %2431 = vmatprep.subr.bf16.mxu0 %v6347_v56  ;;  %v6291_v56 = vcombine.high %v738_v50, %v742_v51  ;;  %v695_v44 = vld [vmem:[%s10344_s5 + $0x1b8] sm:$0xff]  ;;  %v6252_v45 = vcombine.low %v699_v33, %v703_v34 }
 0x1f7   :  { %2391 = vmatpush1.bf16.msra.mxu1 %v6218_v61  ;;  %v862_v61 = vld [vmem:[%s10344_s5 + $0x6f0] sm:$0xff] }
 0x1f8   :  { %2432 = vmatpush1.bf16.msra.mxu0 %v6346_v62  ;;  %2392 = vmatprep.subr.bf16.mxu1 %v6211_v63  ;;  %v6290_v62 = vcombine.low %v738_v50, %v742_v51  ;;  %v6418_v63 = vcombine.low %v866_v52, %v870_v53  ;;  %v6411_v1 = vcombine.high %v858_v60, %v862_v61  ;;  %v683_v50 = vld [vmem:[%s10344_s5 + $0x158] sm:$0xff] }
 0x1f9   :  { %2433 = vmatprep.subr.bf16.mxu0 %v6339_v0  ;;  %v6283_v0 = vcombine.high %v730_v58, %v734_v59  ;;  %v687_v51 = vld [vmem:[%s10344_s5 + $0x178] sm:$0xff] }
 0x1fa   :  { %v811_v53 = vld [vmem:[%s10344_s5 + $0x558] sm:$0xff] }
 0x1fb   :  { %2393 = vmatpush1.bf16.msra.mxu1 %v6210_v9  ;;  %v854_v9 = vld [vmem:[%s10344_s5 + $0x6b0] sm:$0xff] }
 0x1fc   :  { %2434 = vmatpush1.bf16.msra.mxu0 %v6338_v10  ;;  %2394 = vmatprep.subr.bf16.mxu1 %v6203_v11  ;;  %v6282_v10 = vcombine.low %v730_v58, %v734_v59  ;;  %v6410_v11 = vcombine.low %v858_v60, %v862_v61  ;;  %v6403_v13 = vcombine.high %v850_v8, %v854_v9  ;;  %v675_v59 = vld [vmem:[%s10344_s5 + $0x118] sm:$0xff] }
 0x1fd   :  { %2435 = vmatprep.subr.bf16.mxu0 %v6331_v12  ;;  %v6275_v12 = vcombine.high %v722_v2, %v726_v3  ;;  %v679_v60 = vld [vmem:[%s10344_s5 + $0x138] sm:$0xff] }
 0x1fe   :  { %v807_v61 = vld [vmem:[%s10344_s5 + $0x538] sm:$0xff] }
 0x1ff   :  { %2395 = vmatpush1.bf16.msra.mxu1 %v6202_v17  ;;  %v846_v17 = vld [vmem:[%s10344_s5 + $0x670] sm:$0xff] }
 0x200   :  { %2436 = vmatpush1.bf16.msra.mxu0 %v6330_v18  ;;  %2396 = vmatprep.subr.bf16.mxu1 %v6195_v20  ;;  %v6274_v18 = vcombine.low %v722_v2, %v726_v3  ;;  %v6402_v20 = vcombine.low %v850_v8, %v854_v9  ;;  %v6395_v24 = vcombine.high %v842_v16, %v846_v17  ;;  %v671_v2 = vld [vmem:[%s10344_s5 + $0xf8] sm:$0xff] }
 0x201   :  { %2437 = vmatprep.subr.bf16.mxu0 %v6323_v23  ;;  %v6267_v23 = vcombine.high %v714_v14, %v718_v15  ;;  %v795_v3 = vld [vmem:[%s10344_s5 + $0x4d8] sm:$0xff]  ;;  %v6228_v9 = vcombine.low %v675_v59, %v679_v60 }
 0x202   :  { %v799_v8 = vld [vmem:[%s10344_s5 + $0x4f8] sm:$0xff] }
 0x203   :  { %2397 = vmatpush1.bf16.msra.mxu1 %v6194_v28  ;;  %v838_v28 = vld [vmem:[%s10344_s5 + $0x630] sm:$0xff] }
 0x204   :  { %2438 = vmatpush1.bf16.msra.mxu0 %v6322_v29  ;;  %2398 = vmatprep.subr.bf16.mxu1 %v6315_v30  ;;  %v6266_v29 = vcombine.low %v714_v14, %v718_v15  ;;  %v6394_v30 = vcombine.low %v842_v16, %v846_v17  ;;  %v6387_v32 = vcombine.high %v834_v27, %v838_v28  ;;  %v663_v14 = vld [vmem:[%s10344_s5 + $0xb8] sm:$0xff] }
 0x205   :  { %2439 = vmatprep.subr.bf16.mxu0 %v6443_v31  ;;  %v6259_v31 = vcombine.high %v706_v25, %v710_v26  ;;  %v787_v15 = vld [vmem:[%s10344_s5 + $0x498] sm:$0xff] }
 0x206   :  { %v791_v16 = vld [vmem:[%s10344_s5 + $0x4b8] sm:$0xff] }
 0x207   :  { %2399 = vmatpush2.bf16.msra.mxu1 %v6314_v36  ;;  %v831_v36 = vld [vmem:[%s10344_s5 + $0x5f8] sm:$0xff] }
 0x208   :  { %2440 = vmatpush2.bf16.msra.mxu0 %v6442_v37  ;;  %2400 = vmatprep.subr.bf16.mxu1 %v6307_v38  ;;  %v6258_v37 = vcombine.low %v706_v25, %v710_v26  ;;  %v6386_v38 = vcombine.low %v834_v27, %v838_v28  ;;  %v6381_v40 = vcombine.high %v827_v35, %v831_v36  ;;  %v655_v25 = vld [vmem:[%s10344_s5 + $0x78] sm:$0xff] }
 0x209   :  { %2441 = vmatprep.subr.bf16.mxu0 %v6435_v39  ;;  %v6253_v39 = vcombine.high %v699_v33, %v703_v34  ;;  %v779_v26 = vld [vmem:[%s10344_s5 + $0x458] sm:$0xff] }
 0x20a   :  { %v783_v27 = vld [vmem:[%s10344_s5 + $0x478] sm:$0xff] }
 0x20b   :  { %2401 = vmatpush2.bf16.msra.mxu1 %v6306_v46  ;;  %v819_v46 = vld [vmem:[%s10344_s5 + $0x598] sm:$0xff] }
 0x20c   :  { %2442 = vmatpush2.bf16.msra.mxu0 %v6434_v47  ;;  %2402 = vmatprep.subr.bf16.mxu1 %v6299_v48  ;;  %v823_v47 = vld [vmem:[%s10344_s5 + $0x5b8] sm:$0xff]  ;;  %v6380_v48 = vcombine.low %v827_v35, %v831_v36 }
 0x20d   :  { %2443 = vmatprep.subr.bf16.mxu0 %v6427_v49  ;;  %v6245_v49 = vcombine.high %v691_v42, %v695_v44  ;;  %v6373_v52 = vcombine.high %v819_v46, %v823_v47  ;;  %v647_v33 = vld [vmem:[%s10344_s5 + $0x38] sm:$0xff] }
 0x20e   :  { %v771_v34 = vld [vmem:[%s10344_s5 + $0x418] sm:$0xff] }
 0x20f   :  { %2403 = vmatpush2.bf16.msra.mxu1 %v6298_v54  ;;  %v815_v54 = vld [vmem:[%s10344_s5 + $0x578] sm:$0xff] }
 0x210   :  { %2444 = vmatpush2.bf16.msra.mxu0 %v6426_v55  ;;  %2404 = vmatprep.subr.bf16.mxu1 %v6291_v56  ;;  %v6244_v55 = vcombine.low %v691_v42, %v695_v44  ;;  %v6372_v56 = vcombine.low %v819_v46, %v823_v47  ;;  %v6365_v58 = vcombine.high %v811_v53, %v815_v54  ;;  %v775_v35 = vld [vmem:[%s10344_s5 + $0x438] sm:$0xff] }
 0x211   :  { %2445 = vmatprep.subr.bf16.mxu0 %v6419_v57  ;;  %v6237_v57 = vcombine.high %v683_v50, %v687_v51  ;;  %v767_v42 = vld [vmem:[%s10344_s5 + $0x3f8] sm:$0xff]  ;;  %v6324_v47 = vcombine.low %v771_v34, %v775_v35 }
 0x212   :  { %v891_v44 = vld [vmem:[%s10344_s5 + $0x7d8] sm:$0xff] }
 0x213   :  { %2405 = vmatpush2.bf16.msra.mxu1 %v6290_v62  ;;  %v6364_v62 = vcombine.low %v811_v53, %v815_v54  ;;  %v887_v53 = vld [vmem:[%s10344_s5 + $0x7b8] sm:$0xff] }
 0x214   :  { %2446 = vmatpush2.bf16.msra.mxu0 %v6418_v63  ;;  %2406 = vmatprep.subr.bf16.mxu1 %v6283_v0  ;;  %v6229_v63 = vcombine.high %v675_v59, %v679_v60  ;;  %v751_v59 = vld [vmem:[%s10344_s5 + $0x378] sm:$0xff] }
 0x215   :  { %2447 = vmatprep.subr.bf16.mxu0 %v6411_v1  ;;  %v667_v1 = vld [vmem:[%s10344_s5 + $0xd8] sm:$0xff] }
 0x216   :  { %v6220_v17 = vcombine.low %v667_v1, %v671_v2  ;;  %v875_v60 = vld [vmem:[%s10344_s5 + $0x758] sm:$0xff] }
 0x217   :  { %2407 = vmatpush2.bf16.msra.mxu1 %v6282_v10 }
 0x218   :  { %2448 = vmatpush2.bf16.msra.mxu0 %v6410_v11  ;;  %2408 = vmatprep.subr.bf16.mxu1 %v6275_v12  ;;  %v6221_v11 = vcombine.high %v667_v1, %v671_v2  ;;  %v6349_v12 = vcombine.high %v795_v3, %v799_v8  ;;  %v743_v1 = vld [vmem:[%s10344_s5 + $0x338] sm:$0xff] }
 0x219   :  { %2449 = vmatprep.subr.bf16.mxu0 %v6403_v13  ;;  %v659_v13 = vld [vmem:[%s10344_s5 + $0x98] sm:$0xff] }
 0x21a   :  { %v6212_v28 = vcombine.low %v659_v13, %v663_v14  ;;  %v867_v2 = vld [vmem:[%s10344_s5 + $0x718] sm:$0xff] }
 0x21b   :  { %2409 = vmatpush2.bf16.msra.mxu1 %v6274_v18  ;;  %v6348_v18 = vcombine.low %v795_v3, %v799_v8  ;;  %v871_v3 = vld [vmem:[%s10344_s5 + $0x738] sm:$0xff] }
 0x21c   :  { %2450 = vmatpush2.bf16.msra.mxu0 %v6402_v20  ;;  %2410 = vmatprep.subr.bf16.mxu1 %v6267_v23  ;;  %v6213_v20 = vcombine.high %v659_v13, %v663_v14  ;;  %v6341_v23 = vcombine.high %v787_v15, %v791_v16  ;;  %v735_v13 = vld [vmem:[%s10344_s5 + $0x2f8] sm:$0xff] }
 0x21d   :  { %2451 = vmatprep.subr.bf16.mxu0 %v6395_v24  ;;  %v651_v24 = vld [vmem:[%s10344_s5 + $0x58] sm:$0xff] }
 0x21e   :  { %v6204_v36 = vcombine.low %v651_v24, %v655_v25  ;;  %v859_v14 = vld [vmem:[%s10344_s5 + $0x6d8] sm:$0xff] }
 0x21f   :  { %2411 = vmatpush2.bf16.msra.mxu1 %v6266_v29  ;;  %v6340_v29 = vcombine.low %v787_v15, %v791_v16  ;;  %v863_v15 = vld [vmem:[%s10344_s5 + $0x6f8] sm:$0xff] }
 0x220   :  { %2452 = vmatpush2.bf16.msra.mxu0 %v6394_v30  ;;  %2412 = vmatprep.subr.bf16.mxu1 %v6259_v31  ;;  %v6205_v30 = vcombine.high %v651_v24, %v655_v25  ;;  %v6333_v31 = vcombine.high %v779_v26, %v783_v27  ;;  %v727_v24 = vld [vmem:[%s10344_s5 + $0x2b8] sm:$0xff] }
 0x221   :  { %2453 = vmatprep.subr.bf16.mxu0 %v6387_v32  ;;  %v643_v32 = vld [vmem:[%s10344_s5 + $0x18] sm:$0xff] }
 0x222   :  { %v6196_v46 = vcombine.low %v643_v32, %v647_v33  ;;  %v851_v25 = vld [vmem:[%s10344_s5 + $0x698] sm:$0xff] }
 0x223   :  { %2413 = vmatpush2.bf16.msra.mxu1 %v6258_v37  ;;  %v6332_v37 = vcombine.low %v779_v26, %v783_v27  ;;  %v855_v26 = vld [vmem:[%s10344_s5 + $0x6b8] sm:$0xff] }
 0x224   :  { %2454 = vmatpush2.bf16.msra.mxu0 %v6386_v38  ;;  %2464 = vmatprep.subr.bf16.mxu1 %v6253_v39  ;;  %v6197_v38 = vcombine.high %v643_v32, %v647_v33  ;;  %v6325_v39 = vcombine.high %v771_v34, %v775_v35  ;;  %v719_v32 = vld [vmem:[%s10344_s5 + $0x278] sm:$0xff] }
 0x225   :  { %2505 = vmatprep.subr.bf16.mxu0 %v6381_v40  ;;  %v763_v40 = vld [vmem:[%s10344_s5 + $0x3d8] sm:$0xff] }
 0x226   :  { %2415 = vmatmul.mubr.bf16.vlgmr.msra.gmra.mxu1 %v8286_v6  ;;  %v6316_v54 = vcombine.low %v763_v40, %v767_v42  ;;  %v843_v33 = vld [vmem:[%s10344_s5 + $0x658] sm:$0xff] }
 0x227   :  { %2456 = vmatmul.mubr.bf16.vlgmr.msra.gmra.mxu0 %v8288_v7  ;;  %2465 = vmatpush1.bf16.msra.mxu1 %v6252_v45  ;;  %v895_v45 = vld [vmem:[%s10344_s5 + $0x7f8] sm:$0xff] }
 0x228   :  { %2496 = vmatprep.mubr.bf16.mxu1 %v8282_v4  ;;  %2506 = vmatpush1.bf16.msra.mxu0 %v6380_v48  ;;  %v803_v4 = vld [vmem:[%s10344_s5 + $0x518] sm:$0xff]  ;;  %v6317_v48 = vcombine.high %v763_v40, %v767_v42 }
 0x229   :  { %2537 = vmatprep.mubr.bf16.mxu0 %v8284_v5  ;;  %2466 = vmatprep.subr.bf16.mxu1 %v6245_v49  ;;  %v6236_v5 = vcombine.low %v683_v50, %v687_v51  ;;  %v6357_v0 = vcombine.high %v803_v4, %v807_v61  ;;  %v6356_v10 = vcombine.low %v803_v4, %v807_v61  ;;  %v755_v50 = vld [vmem:[%s10344_s5 + $0x398] sm:$0xff] }
 0x22a   :  { %2507 = vmatprep.subr.bf16.mxu0 %v6373_v52  ;;  %v6445_v49 = vcombine.high %v891_v44, %v895_v45  ;;  %v759_v51 = vld [vmem:[%s10344_s5 + $0x3b8] sm:$0xff] }
 0x22b   :  { %2467 = vmatpush1.bf16.msra.mxu1 %v6244_v55  ;;  %v883_v52 = vld [vmem:[%s10344_s5 + $0x798] sm:$0xff]  ;;  %v6444_v55 = vcombine.low %v891_v44, %v895_v45  ;;  %v6308_v61 = vcombine.low %v755_v50, %v759_v51 }
 0x22c   :  { %2508 = vmatpush1.bf16.msra.mxu0 %v6372_v56  ;;  %2468 = vmatprep.subr.bf16.mxu1 %v6237_v57  ;;  %v6309_v56 = vcombine.high %v755_v50, %v759_v51  ;;  %v6437_v57 = vcombine.high %v883_v52, %v887_v53  ;;  %v879_v4 = vld [vmem:[%s10344_s5 + $0x778] sm:$0xff]  ;;  %v7094_v51 = vld [vmem:[%s10346_s7 + $0x18c] ss:$28 sps:$4 sm:$0xff]  }
 0x22d   :  { %2509 = vmatprep.subr.bf16.mxu0 %v6365_v58  ;;  %v747_v58 = vld [vmem:[%s10344_s5 + $0x358] sm:$0xff] }
 0x22e   :  { %v6300_v8 = vcombine.low %v747_v58, %v751_v59  ;;  %v847_v34 = vld [vmem:[%s10344_s5 + $0x678] sm:$0xff] }
 0x22f   :  { %2469 = vmatpush1.bf16.msra.mxu1 %v6236_v5  ;;  %v6436_v5 = vcombine.low %v883_v52, %v887_v53  ;;  %v711_v40 = vld [vmem:[%s10344_s5 + $0x238] sm:$0xff]  ;;  %v7106_v52 = vld [vmem:[%s10346_s7 + $0x50c] ss:$28 sps:$4 sm:$0xff]  }
 0x230   :  { %2510 = vmatpush1.bf16.msra.mxu0 %v6364_v62  ;;  %2470 = vmatprep.subr.bf16.mxu1 %v6229_v63  ;;  %v6301_v62 = vcombine.high %v747_v58, %v751_v59  ;;  %v6429_v63 = vcombine.high %v875_v60, %v879_v4  ;;  %v835_v42 = vld [vmem:[%s10344_s5 + $0x618] sm:$0xff]  ;;  %v7092_v53 = vld [vmem:[%s10346_s7 + $0x188] ss:$28 sps:$4 sm:$0xff]   ;;  %v7112_v58 = vld [vmem:[%s10346_s7 + $0x4d4] ss:$28 sps:$4 sm:$0xff]  }
 0x231   :  { %2511 = vmatprep.subr.bf16.mxu0 %v6357_v0  ;;  %v739_v0 = vld [vmem:[%s10344_s5 + $0x318] sm:$0xff] }
 0x232   :  { %v6292_v16 = vcombine.low %v739_v0, %v743_v1  ;;  %v839_v44 = vld [vmem:[%s10344_s5 + $0x638] sm:$0xff] }
 0x233   :  { %2471 = vmatpush1.bf16.msra.mxu1 %v6228_v9  ;;  %v6428_v9 = vcombine.low %v875_v60, %v879_v4  ;;  %v6388_v50 = vcombine.low %v835_v42, %v839_v44  ;;  %v7095_v4 = vld [vmem:[%s10346_s7 + $0x150] ss:$28 sps:$4 sm:$0xff]  }
 0x234   :  { %2512 = vmatpush1.bf16.msra.mxu0 %v6356_v10  ;;  %2472 = vmatprep.subr.bf16.mxu1 %v6221_v11  ;;  %v6293_v10 = vcombine.high %v739_v0, %v743_v1  ;;  %v6421_v11 = vcombine.high %v867_v2, %v871_v3 }
 0x235   :  { %2513 = vmatprep.subr.bf16.mxu0 %v6349_v12  ;;  %v731_v12 = vld [vmem:[%s10344_s5 + $0x2d8] sm:$0xff] }
 0x236   :  { %v6284_v27 = vcombine.low %v731_v12, %v735_v13 }
 0x237   :  { %2473 = vmatpush1.bf16.msra.mxu1 %v6220_v17  ;;  %v6420_v17 = vcombine.low %v867_v2, %v871_v3  ;;  %v7098_v3 = vld [vmem:[%s10346_s7 + $0x118] ss:$28 sps:$4 sm:$0xff]  }
 0x238   :  { %2514 = vmatpush1.bf16.msra.mxu0 %v6348_v18  ;;  %2474 = vmatprep.subr.bf16.mxu1 %v6213_v20  ;;  %v6285_v18 = vcombine.high %v731_v12, %v735_v13  ;;  %v6413_v20 = vcombine.high %v859_v14, %v863_v15  ;;  %v7124_v13 = vld [vmem:[%s10346_s7 + $0x464] ss:$28 sps:$4 sm:$0xff]  }
 0x239   :  { %2515 = vmatprep.subr.bf16.mxu0 %v6341_v23  ;;  %v723_v23 = vld [vmem:[%s10344_s5 + $0x298] sm:$0xff] }
 0x23a   :  { %v6276_v35 = vcombine.low %v723_v23, %v727_v24 }
 0x23b   :  { %2475 = vmatpush1.bf16.msra.mxu1 %v6212_v28  ;;  %v6412_v28 = vcombine.low %v859_v14, %v863_v15  ;;  %v7101_v15 = vld [vmem:[%s10346_s7 + $0xe0] ss:$28 sps:$4 sm:$0xff]  }
 0x23c   :  { %2516 = vmatpush1.bf16.msra.mxu0 %v6340_v29  ;;  %2476 = vmatprep.subr.bf16.mxu1 %v6205_v30  ;;  %v6277_v29 = vcombine.high %v723_v23, %v727_v24  ;;  %v6405_v30 = vcombine.high %v851_v25, %v855_v26  ;;  %v7115_v23 = vld [vmem:[%s10346_s7 + $0x74] ss:$28 sps:$4 sm:$0xff]   ;;  %v7128_v24 = vld [vmem:[%s10346_s7 + $0x428] ss:$28 sps:$4 sm:$0xff]  }
 0x23d   :  { %2517 = vmatprep.subr.bf16.mxu0 %v6333_v31  ;;  %v715_v31 = vld [vmem:[%s10344_s5 + $0x258] sm:$0xff] }
 0x23e   :  { %v6268_v45 = vcombine.low %v715_v31, %v719_v32 }
 0x23f   :  { %2477 = vmatpush1.bf16.msra.mxu1 %v6204_v36  ;;  %v6404_v36 = vcombine.low %v851_v25, %v855_v26  ;;  %v7136_v25 = vld [vmem:[%s10346_s7 + $0x3f4] ss:$28 sps:$4 sm:$0xff]  }
 0x240   :  { %2518 = vmatpush1.bf16.msra.mxu0 %v6332_v37  ;;  %2478 = vmatprep.subr.bf16.mxu1 %v6197_v38  ;;  %v6269_v37 = vcombine.high %v715_v31, %v719_v32  ;;  %v6397_v38 = vcombine.high %v843_v33, %v847_v34  ;;  %v7113_v26 = vld [vmem:[%s10346_s7 + $0x70] ss:$28 sps:$4 sm:$0xff]   ;;  %v7127_v31 = vld [vmem:[%s10346_s7 + $0x4] ss:$28 sps:$4 sm:$0xff]   ;;  %v7140_v32 = vld [vmem:[%s10346_s7 + $0x3b8] ss:$28 sps:$4 sm:$0xff]  }
 0x241   :  { %2519 = vmatprep.subr.bf16.mxu0 %v6325_v39  ;;  %v707_v39 = vld [vmem:[%s10344_s5 + $0x218] sm:$0xff] }
 0x243   :  { %2479 = vmatpush1.bf16.msra.mxu1 %v6196_v46  ;;  %v6396_v46 = vcombine.low %v843_v33, %v847_v34  ;;  %v7148_v33 = vld [vmem:[%s10346_s7 + $0x384] ss:$28 sps:$4 sm:$0xff]  }
 0x244   :  { %2520 = vmatpush1.bf16.msra.mxu0 %v6324_v47  ;;  %2480 = vmatprep.subr.bf16.mxu1 %v6317_v48  ;;  %v6261_v47 = vcombine.high %v707_v39, %v711_v40  ;;  %v6389_v48 = vcombine.high %v835_v42, %v839_v44  ;;  %v7125_v34 = vld [vmem:[%s10346_s7] ss:$28 sps:$4 sm:$0xff]   ;;  %v7160_v42 = vld [vmem:[%s10346_s7 + $0x694] ss:$28 sps:$4 sm:$0xff]  }
 0x245   :  { %2521 = vmatprep.subr.bf16.mxu0 %v6445_v49  ;;  %v6260_v49 = vcombine.low %v707_v39, %v711_v40  ;;  %v7139_v39 = vld [vmem:[%s10346_s7 + $0x314] ss:$28 sps:$4 sm:$0xff]   ;;  %v7152_v40 = vld [vmem:[%s10346_s7 + $0x6c8] ss:$28 sps:$4 sm:$0xff]  }
 0x246   :  { %v7137_v44 = vld [vmem:[%s10346_s7 + $0x310] ss:$28 sps:$4 sm:$0xff]  }
 0x247   :  { %2481 = vmatpush2.bf16.msra.mxu1 %v6316_v54  ;;  %v8868_v54 = vld [vmem:[%s10345_s6] sm:$0xff] }
 0x248   :  { %2522 = vmatpush2.bf16.msra.mxu0 %v6444_v55  ;;  %2482 = vmatprep.subr.bf16.mxu1 %v6309_v56  ;;  %v7097_v55 = vld [vmem:[%s10346_s7 + $0x154] ss:$28 sps:$4 sm:$0xff]   ;;  %v7104_v56 = vld [vmem:[%s10346_s7 + $0x508] ss:$28 sps:$4 sm:$0xff]  }
 0x249   :  { %2523 = vmatprep.subr.bf16.mxu0 %v6437_v57  ;;  %v905_v57 = vrot.slane %v8868_v54, %v8061_v22 }
 0x24b   :  { %2483 = vmatpush2.bf16.msra.mxu1 %v6308_v61 }
 0x24c   :  { %2524 = vmatpush2.bf16.msra.mxu0 %v6436_v5  ;;  %2484 = vmatprep.subr.bf16.mxu1 %v6301_v62  ;;  %v7100_v62 = vld [vmem:[%s10346_s7 + $0x11c] ss:$28 sps:$4 sm:$0xff]  }
 0x24d   :  { %2525 = vmatprep.subr.bf16.mxu0 %v6429_v63 }
 0x24f   :  { %2485 = vmatpush2.bf16.msra.mxu1 %v6300_v8 }
 0x250   :  { %2526 = vmatpush2.bf16.msra.mxu0 %v6428_v9  ;;  %2486 = vmatprep.subr.bf16.mxu1 %v6293_v10  ;;  %v7103_v10 = vld [vmem:[%s10346_s7 + $0xe4] ss:$28 sps:$4 sm:$0xff]  }
 0x251   :  { %2527 = vmatprep.subr.bf16.mxu0 %v6421_v11  ;;  %v7116_v11 = vld [vmem:[%s10346_s7 + $0x498] ss:$28 sps:$4 sm:$0xff]  }
 0x253   :  { %2487 = vmatpush2.bf16.msra.mxu1 %v6292_v16  ;;  %v7109_v16 = vld [vmem:[%s10346_s7 + $0xac] ss:$28 sps:$4 sm:$0xff]  }
 0x254   :  { %2528 = vmatpush2.bf16.msra.mxu0 %v6420_v17  ;;  %2488 = vmatprep.subr.bf16.mxu1 %v6285_v18  ;;  %v7122_v17 = vld [vmem:[%s10346_s7 + $0x460] ss:$28 sps:$4 sm:$0xff]   ;;  %v7130_v18 = vld [vmem:[%s10346_s7 + $0x42c] ss:$28 sps:$4 sm:$0xff]  }
 0x255   :  { %2529 = vmatprep.subr.bf16.mxu0 %v6413_v20  ;;  %v7107_v20 = vld [vmem:[%s10346_s7 + $0xa8] ss:$28 sps:$4 sm:$0xff]  }
 0x257   :  { %2489 = vmatpush2.bf16.msra.mxu1 %v6284_v27  ;;  %v7121_v27 = vld [vmem:[%s10346_s7 + $0x3c] ss:$28 sps:$4 sm:$0xff]  }
 0x258   :  { %2530 = vmatpush2.bf16.msra.mxu0 %v6412_v28  ;;  %2490 = vmatprep.subr.bf16.mxu1 %v6277_v29  ;;  %v7134_v28 = vld [vmem:[%s10346_s7 + $0x3f0] ss:$28 sps:$4 sm:$0xff]   ;;  %v7142_v29 = vld [vmem:[%s10346_s7 + $0x3bc] ss:$28 sps:$4 sm:$0xff]  }
 0x259   :  { %2531 = vmatprep.subr.bf16.mxu0 %v6405_v30  ;;  %v7119_v30 = vld [vmem:[%s10346_s7 + $0x38] ss:$28 sps:$4 sm:$0xff]  }
 0x25b   :  { %2491 = vmatpush2.bf16.msra.mxu1 %v6276_v35  ;;  %v7133_v35 = vld [vmem:[%s10346_s7 + $0x34c] ss:$28 sps:$4 sm:$0xff]  }
 0x25c   :  { %2532 = vmatpush2.bf16.msra.mxu0 %v6404_v36  ;;  %2492 = vmatprep.subr.bf16.mxu1 %v6269_v37  ;;  %v7146_v36 = vld [vmem:[%s10346_s7 + $0x380] ss:$28 sps:$4 sm:$0xff]   ;;  %v7154_v37 = vld [vmem:[%s10346_s7 + $0x6cc] ss:$28 sps:$4 sm:$0xff]  }
 0x25d   :  { %2533 = vmatprep.subr.bf16.mxu0 %v6397_v38  ;;  %v7131_v38 = vld [vmem:[%s10346_s7 + $0x348] ss:$28 sps:$4 sm:$0xff]  }
 0x25f   :  { %2493 = vmatpush2.bf16.msra.mxu1 %v6268_v45  ;;  %v7145_v45 = vld [vmem:[%s10346_s7 + $0x2dc] ss:$28 sps:$4 sm:$0xff]  }
 0x260   :  { %2534 = vmatpush2.bf16.msra.mxu0 %v6396_v46  ;;  %2494 = vmatprep.subr.bf16.mxu1 %v6261_v47  ;;  %v7158_v46 = vld [vmem:[%s10346_s7 + $0x690] ss:$28 sps:$4 sm:$0xff]   ;;  %v7166_v47 = vld [vmem:[%s10346_s7 + $0x65c] ss:$28 sps:$4 sm:$0xff]  }
 0x261   :  { %2535 = vmatprep.subr.bf16.mxu0 %v6389_v48  ;;  %v7143_v48 = vld [vmem:[%s10346_s7 + $0x2d8] ss:$28 sps:$4 sm:$0xff]  }
 0x263   :  { %2495 = vmatpush2.bf16.msra.mxu1 %v6260_v49  ;;  %v7151_v49 = vld [vmem:[%s10346_s7 + $0x2a4] ss:$28 sps:$4 sm:$0xff]  }
 0x264   :  { %2536 = vmatpush2.bf16.msra.mxu0 %v6388_v50  ;;  %5415 = vmatprep.subr.bf16.mxu1 %v7094_v51  ;;  %v7164_v50 = vld [vmem:[%s10346_s7 + $0x658] ss:$28 sps:$4 sm:$0xff]   ;;  %v7172_v51 = vld [vmem:[%s10346_s7 + $0x624] ss:$28 sps:$4 sm:$0xff]  }
 0x265   :  { %5456 = vmatprep.subr.bf16.mxu0 %v7106_v52  ;;  %v7149_v52 = vld [vmem:[%s10346_s7 + $0x2a0] ss:$28 sps:$4 sm:$0xff]  }
 0x266   :  { %2497 = vmatmul.mubr.bf16.vlgmr.msra.gmra.mxu1 %v8286_v6  ;;  %v8882_v59 = vpop.f32.mrf.mxu1  ;;  %v8884_v60 = vpop.f32.mrf.mxu0  ;;  %v7110_v6 = vld [vmem:[%s10346_s7 + $0x4d0] ss:$28 sps:$4 sm:$0xff]  }
 0x267   :  { %2538 = vmatmul.mubr.bf16.vlgmr.msra.gmra.mxu0 %v8288_v7  ;;  %5416 = vmatpush1.bf16.msra.mxu1 %v7092_v53  ;;  %v7118_v7 = vld [vmem:[%s10346_s7 + $0x49c] ss:$28 sps:$4 sm:$0xff]   ;;  %v7157_v53 = vld [vmem:[%s10346_s7 + $0x26c] ss:$28 sps:$4 sm:$0xff]  }
 0x268   :  { %v2254_v61 = vpop.f32.mrf.mxu1  ;;  %v2295_v5 = vpop.f32.mrf.mxu0  ;;  %5417 = vmatprep.subr.bf16.mxu1 %v7097_v55  ;;  %5457 = vmatpush1.bf16.msra.mxu0 %v7104_v56  ;;  %v7170_v55 = vld [vmem:[%s10346_s7 + $0x620] ss:$28 sps:$4 sm:$0xff]   ;;  %v7178_v56 = vld [vmem:[%s10346_s7 + $0x5ec] ss:$28 sps:$4 sm:$0xff]  }
 0x269   :  { %v2255_v63 = vadd.f32 %v2254_v61, %v905_v57  ;;  %5458 = vmatprep.subr.bf16.mxu0 %v7112_v58  ;;  %v7155_v57 = vld [vmem:[%s10346_s7 + $0x268] ss:$28 sps:$4 sm:$0xff]   ;;  %v901_v58 = vrot.slane %v8868_v54, %v8058_v21 }
 0x26a   :  { %v2256_v0 = vpop.f32.mrf.mxu1  ;;  %v2297_v1 = vpop.f32.mrf.mxu0  ;;  %v7176_v61 = vld [vmem:[%s10346_s7 + $0x5e8] ss:$28 sps:$4 sm:$0xff]  }
 0x26b   :  { %v2296_v2 = vadd.f32 %v2295_v5, %v2255_v63  ;;  %5418 = vmatpush1.bf16.msra.mxu1 %v7095_v4  ;;  %v7163_v4 = vld [vmem:[%s10346_s7 + $0x234] ss:$28 sps:$4 sm:$0xff]   ;;  %v7169_v63 = vld [vmem:[%s10346_s7 + $0x1fc] ss:$28 sps:$4 sm:$0xff]  }
 0x26c   :  { %v2257_v8 = vpop.f32.mrf.mxu1  ;;  %v2298_v9 = vpop.f32.mrf.mxu0  ;;  %5419 = vmatprep.subr.bf16.mxu1 %v7100_v62  ;;  %5459 = vmatpush1.bf16.msra.mxu0 %v7110_v6  ;;  %v7181_v5 = vld [vmem:[%s10346_s7 + $0x5b4] ss:$28 sps:$4 sm:$0xff]   ;;  %v2253_v6 = vadd.f32 %v8882_v59, %v901_v58  ;;  %v7184_v0 = vld [vmem:[%s10346_s7 + $0x57c] ss:$28 sps:$4 sm:$0xff]  }
 0x26d   :  { %v2547_v12 = vmax.f32 %v2296_v2, 0.0  ;;  %5460 = vmatprep.subr.bf16.mxu0 %v7118_v7  ;;  %v7161_v62 = vld [vmem:[%s10346_s7 + $0x230] ss:$28 sps:$4 sm:$0xff]   ;;  %v7167_v59 = vld [vmem:[%s10346_s7 + $0x1f8] ss:$28 sps:$4 sm:$0xff]  }
 0x26e   :  { %v7179_v7 = vld [vmem:[%s10346_s7 + $0x5b0] ss:$28 sps:$4 sm:$0xff]   ;;  %v2294_v1 = vadd.f32 %v8884_v60, %v2253_v6  ;;  %v7175_v2 = vld [vmem:[%s10346_s7 + $0x1c4] ss:$28 sps:$4 sm:$0xff]  }
 0x26f   :  { %v8911_v14 = vpack.c.bf16 %v2547_v12, %v2547_v12  ;;  %5420 = vmatpush1.bf16.msra.mxu1 %v7098_v3  ;;  %v7182_v3 = vld [vmem:[%s10346_s7 + $0x578] ss:$28 sps:$4 sm:$0xff]   ;;  %v7187_v8 = vld [vmem:[%s10346_s7 + $0x544] ss:$28 sps:$4 sm:$0xff]   ;;  %v7238_v12 = vld [vmem:[%s10346_s7 + $0xc0c] ss:$28 sps:$4 sm:$0xff]  }
 0x270   :  { %5421 = vmatprep.subr.bf16.mxu1 %v7103_v10  ;;  %5461 = vmatpush1.bf16.msra.mxu0 %v7116_v11  ;;  %v7173_v60 = vld [vmem:[%s10346_s7 + $0x1c0] ss:$28 sps:$4 sm:$0xff]   ;;  %v2546_v9 = vmax.f32 %v2294_v1, 0.0  ;;  %v7190_v11 = vld [vmem:[%s10346_s7 + $0x88c] ss:$28 sps:$4 sm:$0xff]  }
 0x271   :  { %5447 = vmatprep.mubr.bf16.mxu1 %v8911_v14  ;;  %5462 = vmatprep.subr.bf16.mxu0 %v7124_v13  ;;  %v7185_v10 = vld [vmem:[%s10346_s7 + $0x540] ss:$28 sps:$4 sm:$0xff]   ;;  %v909_v13 = vrot.slane %v8868_v54, %v8258_v41  ;;  %v7214_v6 = vld [vmem:[%s10346_s7 + $0xa4c] ss:$28 sps:$4 sm:$0xff]  }
 0x272   :  { %v7254_v58 = vld [vmem:[%s10346_s7 + $0xb60] ss:$28 sps:$4 sm:$0xff]  }
 0x273   :  { %5422 = vmatpush1.bf16.msra.mxu1 %v7101_v15  ;;  %v7188_v15 = vld [vmem:[%s10346_s7 + $0x888] ss:$28 sps:$4 sm:$0xff]   ;;  %v7274_v1 = vld [vmem:[%s10346_s7 + $0xabc] ss:$28 sps:$4 sm:$0xff]  }
 0x274   :  { %5423 = vmatprep.subr.bf16.mxu1 %v7109_v16  ;;  %5463 = vmatpush1.bf16.msra.mxu0 %v7122_v17  ;;  %v9079_v16 = vpack.c.bf16 %v2546_v9, %v2546_v9  ;;  %v7193_v17 = vld [vmem:[%s10346_s7 + $0x854] ss:$28 sps:$4 sm:$0xff]  }
 0x275   :  { %5464 = vmatprep.subr.bf16.mxu0 %v7130_v18  ;;  %v913_v18 = vrot.slane %v8868_v54, %v8264_v43  ;;  %v7218_v9 = vld [vmem:[%s10346_s7 + $0x9d8] ss:$28 sps:$4 sm:$0xff]  }
 0x277   :  { %5424 = vmatpush1.bf16.msra.mxu1 %v7107_v20 }
 0x278   :  { %5425 = vmatprep.subr.bf16.mxu1 %v7115_v23  ;;  %5465 = vmatpush1.bf16.msra.mxu0 %v7128_v24 }
 0x279   :  { %5466 = vmatprep.subr.bf16.mxu0 %v7136_v25  ;;  %v7191_v25 = vld [vmem:[%s10346_s7 + $0x850] ss:$28 sps:$4 sm:$0xff]  }
 0x27b   :  { %5426 = vmatpush1.bf16.msra.mxu1 %v7113_v26 }
 0x27c   :  { %5427 = vmatprep.subr.bf16.mxu1 %v7121_v27  ;;  %5467 = vmatpush1.bf16.msra.mxu0 %v7134_v28  ;;  %v7196_v28 = vld [vmem:[%s10346_s7 + $0x81c] ss:$28 sps:$4 sm:$0xff]  }
 0x27d   :  { %5468 = vmatprep.subr.bf16.mxu0 %v7142_v29 }
 0x27f   :  { %5428 = vmatpush1.bf16.msra.mxu1 %v7119_v30 }
 0x280   :  { %5429 = vmatprep.subr.bf16.mxu1 %v7127_v31  ;;  %5469 = vmatpush1.bf16.msra.mxu0 %v7140_v32 }
 0x281   :  { %5470 = vmatprep.subr.bf16.mxu0 %v7148_v33 }
 0x283   :  { %5430 = vmatpush1.bf16.msra.mxu1 %v7125_v34  ;;  %v7194_v34 = vld [vmem:[%s10346_s7 + $0x818] ss:$28 sps:$4 sm:$0xff]  }
 0x284   :  { %5431 = vmatprep.subr.bf16.mxu1 %v7133_v35  ;;  %5471 = vmatpush1.bf16.msra.mxu0 %v7146_v36 }
 0x285   :  { %5472 = vmatprep.subr.bf16.mxu0 %v7154_v37 }
 0x287   :  { %5432 = vmatpush2.bf16.msra.mxu1 %v7131_v38  ;;  %v7199_v38 = vld [vmem:[%s10346_s7 + $0x7e4] ss:$28 sps:$4 sm:$0xff]  }
 0x288   :  { %5433 = vmatprep.subr.bf16.mxu1 %v7139_v39  ;;  %5473 = vmatpush2.bf16.msra.mxu0 %v7152_v40 }
 0x289   :  { %5474 = vmatprep.subr.bf16.mxu0 %v7160_v42  ;;  %v7197_v42 = vld [vmem:[%s10346_s7 + $0x7e0] ss:$28 sps:$4 sm:$0xff]  }
 0x28b   :  { %5434 = vmatpush2.bf16.msra.mxu1 %v7137_v44  ;;  %v7236_v44 = vld [vmem:[%s10346_s7 + $0xc08] ss:$28 sps:$4 sm:$0xff]  }
 0x28c   :  { %5435 = vmatprep.subr.bf16.mxu1 %v7145_v45  ;;  %5475 = vmatpush2.bf16.msra.mxu0 %v7158_v46  ;;  %v7202_v46 = vld [vmem:[%s10346_s7 + $0x7ac] ss:$28 sps:$4 sm:$0xff]  }
 0x28d   :  { %5476 = vmatprep.subr.bf16.mxu0 %v7166_v47  ;;  %v7244_v47 = vld [vmem:[%s10346_s7 + $0xbd4] ss:$28 sps:$4 sm:$0xff]  }
 0x28f   :  { %5436 = vmatpush2.bf16.msra.mxu1 %v7143_v48  ;;  %v7200_v48 = vld [vmem:[%s10346_s7 + $0x7a8] ss:$28 sps:$4 sm:$0xff]  }
 0x290   :  { %5437 = vmatprep.subr.bf16.mxu1 %v7151_v49  ;;  %5477 = vmatpush2.bf16.msra.mxu0 %v7164_v50  ;;  %v7242_v49 = vld [vmem:[%s10346_s7 + $0xbd0] ss:$28 sps:$4 sm:$0xff]  }
 0x291   :  { %5478 = vmatprep.subr.bf16.mxu0 %v7172_v51  ;;  %v7205_v50 = vld [vmem:[%s10346_s7 + $0x774] ss:$28 sps:$4 sm:$0xff]   ;;  %v7250_v51 = vld [vmem:[%s10346_s7 + $0xb9c] ss:$28 sps:$4 sm:$0xff]  }
 0x293   :  { %5438 = vmatpush2.bf16.msra.mxu1 %v7149_v52  ;;  %v7203_v52 = vld [vmem:[%s10346_s7 + $0x770] ss:$28 sps:$4 sm:$0xff]  }
 0x294   :  { %5439 = vmatprep.subr.bf16.mxu1 %v7157_v53  ;;  %5479 = vmatpush2.bf16.msra.mxu0 %v7170_v55  ;;  %v7248_v53 = vld [vmem:[%s10346_s7 + $0xb98] ss:$28 sps:$4 sm:$0xff]  }
 0x295   :  { %5480 = vmatprep.subr.bf16.mxu0 %v7178_v56  ;;  %v7208_v55 = vld [vmem:[%s10346_s7 + $0x73c] ss:$28 sps:$4 sm:$0xff]   ;;  %v7256_v56 = vld [vmem:[%s10346_s7 + $0xb64] ss:$28 sps:$4 sm:$0xff]  }
 0x297   :  { %5440 = vmatpush2.bf16.msra.mxu1 %v7155_v57  ;;  %v7206_v57 = vld [vmem:[%s10346_s7 + $0x738] ss:$28 sps:$4 sm:$0xff]  }
 0x298   :  { %5441 = vmatprep.subr.bf16.mxu1 %v7163_v4  ;;  %5481 = vmatpush2.bf16.msra.mxu0 %v7176_v61  ;;  %v7211_v4 = vld [vmem:[%s10346_s7 + $0x704] ss:$28 sps:$4 sm:$0xff]   ;;  %v7262_v61 = vld [vmem:[%s10346_s7 + $0xb2c] ss:$28 sps:$4 sm:$0xff]  }
 0x299   :  { %5482 = vmatprep.subr.bf16.mxu0 %v7181_v5  ;;  %v7209_v5 = vld [vmem:[%s10346_s7 + $0x700] ss:$28 sps:$4 sm:$0xff]  }
 0x29b   :  { %5442 = vmatpush2.bf16.msra.mxu1 %v7161_v62  ;;  %v7260_v62 = vld [vmem:[%s10346_s7 + $0xb28] ss:$28 sps:$4 sm:$0xff]  }
 0x29c   :  { %5443 = vmatprep.subr.bf16.mxu1 %v7169_v63  ;;  %5483 = vmatpush2.bf16.msra.mxu0 %v7179_v7  ;;  %v7268_v63 = vld [vmem:[%s10346_s7 + $0xaf4] ss:$28 sps:$4 sm:$0xff]   ;;  %v7212_v7 = vld [vmem:[%s10346_s7 + $0xa48] ss:$28 sps:$4 sm:$0xff]  }
 0x29d   :  { %5484 = vmatprep.subr.bf16.mxu0 %v7184_v0  ;;  %v7266_v0 = vld [vmem:[%s10346_s7 + $0xaf0] ss:$28 sps:$4 sm:$0xff]  }
 0x29f   :  { %5444 = vmatpush2.bf16.msra.mxu1 %v7167_v59  ;;  %v7217_v59 = vld [vmem:[%s10346_s7 + $0xa14] ss:$28 sps:$4 sm:$0xff]  }
 0x2a0   :  { %5445 = vmatprep.subr.bf16.mxu1 %v7175_v2  ;;  %5485 = vmatpush2.bf16.msra.mxu0 %v7182_v3  ;;  %v7215_v2 = vld [vmem:[%s10346_s7 + $0xa10] ss:$28 sps:$4 sm:$0xff]   ;;  %v7272_v3 = vld [vmem:[%s10346_s7 + $0xab8] ss:$28 sps:$4 sm:$0xff]  }
 0x2a1   :  { %5486 = vmatprep.subr.bf16.mxu0 %v7187_v8  ;;  %v7220_v8 = vld [vmem:[%s10346_s7 + $0x9dc] ss:$28 sps:$4 sm:$0xff]  }
 0x2a3   :  { %5446 = vmatpush2.bf16.msra.mxu1 %v7173_v60  ;;  %v7280_v60 = vld [vmem:[%s10346_s7 + $0xa84] ss:$28 sps:$4 sm:$0xff]  }
 0x2a4   :  { %5487 = vmatpush2.bf16.msra.mxu0 %v7185_v10  ;;  %5497 = vmatprep.subr.bf16.mxu1 %v7190_v11  ;;  %v7278_v10 = vld [vmem:[%s10346_s7 + $0xa80] ss:$28 sps:$4 sm:$0xff]  }
 0x2a5   :  { %5538 = vmatprep.subr.bf16.mxu0 %v7238_v12  ;;  %v7223_v11 = vld [vmem:[%s10346_s7 + $0x9a4] ss:$28 sps:$4 sm:$0xff]   ;;  %v7286_v12 = vld [vmem:[%s10346_s7 + $0xdcc] ss:$28 sps:$4 sm:$0xff]  }
 0x2a6   :  { %v2334_v20 = vpop.f32.mrf.mxu1  ;;  %v2375_v23 = vpop.f32.mrf.mxu0  ;;  %5448 = vmatmul.mubr.bf16.vlgmr.msra.gmra.mxu1 %v9079_v16 }
 0x2a7   :  { %v2335_v24 = vadd.f32 %v2334_v20, %v909_v13  ;;  %5498 = vmatpush1.bf16.msra.mxu1 %v7188_v15  ;;  %v7221_v13 = vld [vmem:[%s10346_s7 + $0x9a0] ss:$28 sps:$4 sm:$0xff]   ;;  %v7284_v15 = vld [vmem:[%s10346_s7 + $0xdc8] ss:$28 sps:$4 sm:$0xff]  }
 0x2a8   :  { %v2336_v26 = vpop.f32.mrf.mxu1  ;;  %v2377_v27 = vpop.f32.mrf.mxu0  ;;  %5499 = vmatprep.subr.bf16.mxu1 %v7193_v17  ;;  %v7226_v17 = vld [vmem:[%s10346_s7 + $0x96c] ss:$28 sps:$4 sm:$0xff]  }
 0x2a9   :  { %v2376_v29 = vadd.f32 %v2375_v23, %v2335_v24  ;;  %v2337_v30 = vadd.f32 %v2336_v26, %v913_v18  ;;  %v7292_v18 = vld [vmem:[%s10346_s7 + $0xd94] ss:$28 sps:$4 sm:$0xff]   ;;  %v7224_v20 = vld [vmem:[%s10346_s7 + $0x968] ss:$28 sps:$4 sm:$0xff]  }
 0x2aa   :  { %v2338_v31 = vpop.f32.mrf.mxu1  ;;  %v2379_v32 = vpop.f32.mrf.mxu0  ;;  %v7290_v23 = vld [vmem:[%s10346_s7 + $0xd90] ss:$28 sps:$4 sm:$0xff]  }
 0x2ab   :  { %v2378_v33 = vadd.f32 %v2377_v27, %v2337_v30  ;;  %5500 = vmatpush1.bf16.msra.mxu1 %v7191_v25  ;;  %v2548_v35 = vmax.f32 %v2376_v29, 0.0  ;;  %v7229_v24 = vld [vmem:[%s10346_s7 + $0x934] ss:$28 sps:$4 sm:$0xff]   ;;  %v7298_v25 = vld [vmem:[%s10346_s7 + $0xd5c] ss:$28 sps:$4 sm:$0xff]  }
 0x2ac   :  { %v2339_v36 = vpop.f32.mrf.mxu1  ;;  %v2380_v37 = vpop.f32.mrf.mxu0  ;;  %5501 = vmatprep.subr.bf16.mxu1 %v7196_v28  ;;  %v7227_v26 = vld [vmem:[%s10346_s7 + $0x930] ss:$28 sps:$4 sm:$0xff]   ;;  %v7296_v27 = vld [vmem:[%s10346_s7 + $0xd58] ss:$28 sps:$4 sm:$0xff]   ;;  %v7304_v29 = vld [vmem:[%s10346_s7 + $0xd24] ss:$28 sps:$4 sm:$0xff]  }
 0x2ad   :  { %v2549_v39 = vmax.f32 %v2378_v33, 0.0  ;;  %v9107_v45 = vpack.c.bf16 %v2548_v35, %v2548_v35  ;;  %v7232_v28 = vld [vmem:[%s10346_s7 + $0x8fc] ss:$28 sps:$4 sm:$0xff]   ;;  %v7235_v32 = vld [vmem:[%s10346_s7 + $0x8c4] ss:$28 sps:$4 sm:$0xff]  }
 0x2ae   :  { %v7230_v30 = vld [vmem:[%s10346_s7 + $0x8f8] ss:$28 sps:$4 sm:$0xff]   ;;  %v7302_v31 = vld [vmem:[%s10346_s7 + $0xd20] ss:$28 sps:$4 sm:$0xff]   ;;  %v7310_v33 = vld [vmem:[%s10346_s7 + $0xcec] ss:$28 sps:$4 sm:$0xff]  }
 0x2af   :  { %v9099_v40 = vpack.c.bf16 %v2549_v39, %v2549_v39  ;;  %5502 = vmatpush1.bf16.msra.mxu1 %v7194_v34  ;;  %v916_v34 = vsub.s32 4, %v8052_v19  ;;  %v7233_v35 = vld [vmem:[%s10346_s7 + $0x8c0] ss:$28 sps:$4 sm:$0xff]   ;;  %v7308_v36 = vld [vmem:[%s10346_s7 + $0xce8] ss:$28 sps:$4 sm:$0xff]   ;;  %v920_v39 = vsub.s32 5, %v8052_v19 }
 0x2b0   :  { %5503 = vmatprep.subr.bf16.mxu1 %v7199_v38  ;;  %v7241_v37 = vld [vmem:[%s10346_s7 + $0x194] ss:$28 sps:$4 sm:$0xff]  }
 0x2b1   :  { %5488 = vmatprep.mubr.bf16.mxu0 %v9099_v40  ;;  %v7316_v38 = vld [vmem:[%s10346_s7 + $0xcb4] ss:$28 sps:$4 sm:$0xff]  }
 0x2b2   :  { %5489 = vmatmul.mubr.bf16.vlgmr.msra.gmra.mxu0 %v9107_v45 }
 0x2b3   :  { %5504 = vmatpush1.bf16.msra.mxu1 %v7197_v42  ;;  %5539 = vmatpush1.bf16.msra.mxu0 %v7236_v44  ;;  %v917_v42 = vrot.slane %v8868_v54, %v916_v34  ;;  %v7314_v44 = vld [vmem:[%s10346_s7 + $0xcb0] ss:$28 sps:$4 sm:$0xff]  }
 0x2b4   :  { %5505 = vmatprep.subr.bf16.mxu1 %v7202_v46  ;;  %5540 = vmatprep.subr.bf16.mxu0 %v7244_v47  ;;  %v7322_v46 = vld [vmem:[%s10346_s7 + $0xc7c] ss:$28 sps:$4 sm:$0xff]   ;;  %v921_v47 = vrot.slane %v8868_v54, %v920_v39 }
 0x2b7   :  { %5506 = vmatpush1.bf16.msra.mxu1 %v7200_v48  ;;  %5541 = vmatpush1.bf16.msra.mxu0 %v7242_v49 }
 0x2b8   :  { %5507 = vmatprep.subr.bf16.mxu1 %v7205_v50  ;;  %5542 = vmatprep.subr.bf16.mxu0 %v7250_v51  ;;  %v7320_v51 = vld [vmem:[%s10346_s7 + $0xc78] ss:$28 sps:$4 sm:$0xff]  }
 0x2bb   :  { %5508 = vmatpush1.bf16.msra.mxu1 %v7203_v52  ;;  %5543 = vmatpush1.bf16.msra.mxu0 %v7248_v53  ;;  %v7328_v53 = vld [vmem:[%s10346_s7 + $0xc44] ss:$28 sps:$4 sm:$0xff]  }
 0x2bc   :  { %5509 = vmatprep.subr.bf16.mxu1 %v7208_v55  ;;  %5544 = vmatprep.subr.bf16.mxu0 %v7256_v56 }
 0x2bf   :  { %5510 = vmatpush1.bf16.msra.mxu1 %v7206_v57  ;;  %5545 = vmatpush1.bf16.msra.mxu0 %v7254_v58 }
 0x2c0   :  { %5511 = vmatprep.subr.bf16.mxu1 %v7211_v4  ;;  %5546 = vmatprep.subr.bf16.mxu0 %v7262_v61 }
 0x2c3   :  { %5512 = vmatpush1.bf16.msra.mxu1 %v7209_v5  ;;  %5547 = vmatpush1.bf16.msra.mxu0 %v7260_v62  ;;  %v7326_v5 = vld [vmem:[%s10346_s7 + $0xc40] ss:$28 sps:$4 sm:$0xff]  }
 0x2c4   :  { %5513 = vmatprep.subr.bf16.mxu1 %v7214_v6  ;;  %5548 = vmatprep.subr.bf16.mxu0 %v7268_v63  ;;  %v7334_v63 = vld [vmem:[%s10346_s7 + $0x514] ss:$28 sps:$4 sm:$0xff]  }
 0x2c7   :  { %5514 = vmatpush2.bf16.msra.mxu1 %v7212_v7  ;;  %5549 = vmatpush1.bf16.msra.mxu0 %v7266_v0 }
 0x2c8   :  { %5515 = vmatprep.subr.bf16.mxu1 %v7217_v59  ;;  %5550 = vmatprep.subr.bf16.mxu0 %v7274_v1  ;;  %v7239_v1 = vld [vmem:[%s10346_s7 + $0x190] ss:$28 sps:$4 sm:$0xff]  }
 0x2cb   :  { %5516 = vmatpush2.bf16.msra.mxu1 %v7215_v2  ;;  %5551 = vmatpush1.bf16.msra.mxu0 %v7272_v3  ;;  %v7247_v3 = vld [vmem:[%s10346_s7 + $0x15c] ss:$28 sps:$4 sm:$0xff]  }
 0x2cc   :  { %5517 = vmatprep.subr.bf16.mxu1 %v7220_v8  ;;  %5552 = vmatprep.subr.bf16.mxu0 %v7280_v60  ;;  %v7245_v8 = vld [vmem:[%s10346_s7 + $0x158] ss:$28 sps:$4 sm:$0xff]   ;;  %v7253_v60 = vld [vmem:[%s10346_s7 + $0x124] ss:$28 sps:$4 sm:$0xff]  }
 0x2cf   :  { %5518 = vmatpush2.bf16.msra.mxu1 %v7218_v9  ;;  %5553 = vmatpush1.bf16.msra.mxu0 %v7278_v10  ;;  %v7251_v9 = vld [vmem:[%s10346_s7 + $0x120] ss:$28 sps:$4 sm:$0xff]   ;;  %v7259_v10 = vld [vmem:[%s10346_s7 + $0xec] ss:$28 sps:$4 sm:$0xff]  }
 0x2d0   :  { %5519 = vmatprep.subr.bf16.mxu1 %v7223_v11  ;;  %5554 = vmatprep.subr.bf16.mxu0 %v7286_v12  ;;  %v7257_v11 = vld [vmem:[%s10346_s7 + $0xe8] ss:$28 sps:$4 sm:$0xff]   ;;  %v7265_v12 = vld [vmem:[%s10346_s7 + $0xb4] ss:$28 sps:$4 sm:$0xff]  }
 0x2d3   :  { %5520 = vmatpush2.bf16.msra.mxu1 %v7221_v13  ;;  %5555 = vmatpush2.bf16.msra.mxu0 %v7284_v15  ;;  %v7263_v13 = vld [vmem:[%s10346_s7 + $0xb0] ss:$28 sps:$4 sm:$0xff]   ;;  %v7271_v15 = vld [vmem:[%s10346_s7 + $0x7c] ss:$28 sps:$4 sm:$0xff]  }
 0x2d4   :  { %5521 = vmatprep.subr.bf16.mxu1 %v7226_v17  ;;  %5556 = vmatprep.subr.bf16.mxu0 %v7292_v18  ;;  %v7269_v17 = vld [vmem:[%s10346_s7 + $0x78] ss:$28 sps:$4 sm:$0xff]   ;;  %v7277_v18 = vld [vmem:[%s10346_s7 + $0x44] ss:$28 sps:$4 sm:$0xff]  }
 0x2d7   :  { %5522 = vmatpush2.bf16.msra.mxu1 %v7224_v20  ;;  %5557 = vmatpush2.bf16.msra.mxu0 %v7290_v23  ;;  %v7275_v20 = vld [vmem:[%s10346_s7 + $0x40] ss:$28 sps:$4 sm:$0xff]   ;;  %v7283_v23 = vld [vmem:[%s10346_s7 + $0xc] ss:$28 sps:$4 sm:$0xff]  }
 0x2d8   :  { %5523 = vmatprep.subr.bf16.mxu1 %v7229_v24  ;;  %5558 = vmatprep.subr.bf16.mxu0 %v7298_v25  ;;  %v7281_v24 = vld [vmem:[%s10346_s7 + $0x8] ss:$28 sps:$4 sm:$0xff]   ;;  %v7289_v25 = vld [vmem:[%s10346_s7 + $0x354] ss:$28 sps:$4 sm:$0xff]  }
 0x2db   :  { %5524 = vmatpush2.bf16.msra.mxu1 %v7227_v26  ;;  %5559 = vmatpush2.bf16.msra.mxu0 %v7296_v27  ;;  %v7287_v26 = vld [vmem:[%s10346_s7 + $0x350] ss:$28 sps:$4 sm:$0xff]   ;;  %v7295_v27 = vld [vmem:[%s10346_s7 + $0x31c] ss:$28 sps:$4 sm:$0xff]  }
 0x2dc   :  { %5525 = vmatprep.subr.bf16.mxu1 %v7232_v28  ;;  %5560 = vmatprep.subr.bf16.mxu0 %v7304_v29  ;;  %v7293_v28 = vld [vmem:[%s10346_s7 + $0x318] ss:$28 sps:$4 sm:$0xff]   ;;  %v7301_v29 = vld [vmem:[%s10346_s7 + $0x2e4] ss:$28 sps:$4 sm:$0xff]  }
 0x2df   :  { %5526 = vmatpush2.bf16.msra.mxu1 %v7230_v30  ;;  %5561 = vmatpush2.bf16.msra.mxu0 %v7302_v31  ;;  %v7299_v30 = vld [vmem:[%s10346_s7 + $0x2e0] ss:$28 sps:$4 sm:$0xff]   ;;  %v7307_v31 = vld [vmem:[%s10346_s7 + $0x2ac] ss:$28 sps:$4 sm:$0xff]  }
 0x2e0   :  { %5527 = vmatprep.subr.bf16.mxu1 %v7235_v32  ;;  %5562 = vmatprep.subr.bf16.mxu0 %v7310_v33  ;;  %v7305_v32 = vld [vmem:[%s10346_s7 + $0x2a8] ss:$28 sps:$4 sm:$0xff]   ;;  %v7313_v33 = vld [vmem:[%s10346_s7 + $0x274] ss:$28 sps:$4 sm:$0xff]  }
 0x2e3   :  { %5528 = vmatpush2.bf16.msra.mxu1 %v7233_v35  ;;  %5563 = vmatpush2.bf16.msra.mxu0 %v7308_v36  ;;  %v7311_v35 = vld [vmem:[%s10346_s7 + $0x270] ss:$28 sps:$4 sm:$0xff]   ;;  %v924_v36 = vsub.s32 6, %v8052_v19 }
 0x2e4   :  { %5579 = vmatprep.subr.bf16.mxu1 %v7241_v37  ;;  %5564 = vmatprep.subr.bf16.mxu0 %v7316_v38  ;;  %v7319_v37 = vld [vmem:[%s10346_s7 + $0x23c] ss:$28 sps:$4 sm:$0xff]   ;;  %v928_v38 = vsub.s32 7, %v8052_v19 }
 0x2e6   :  { %v2416_v48 = vpop.f32.mrf.mxu1 }
 0x2e7   :  { %v2417_v49 = vadd.f32 %v2416_v48, %v917_v42  ;;  %v2457_v50 = vpop.f32.mrf.mxu0  ;;  %5565 = vmatpush2.bf16.msra.mxu0 %v7314_v44  ;;  %v7317_v42 = vld [vmem:[%s10346_s7 + $0x238] ss:$28 sps:$4 sm:$0xff]   ;;  %v925_v44 = vrot.slane %v8868_v54, %v924_v36 }
 0x2e8   :  { %v2418_v52 = vpop.f32.mrf.mxu1  ;;  %5566 = vmatprep.subr.bf16.mxu0 %v7322_v46  ;;  %v7325_v46 = vld [vmem:[%s10346_s7 + $0x204] ss:$28 sps:$4 sm:$0xff]  }
 0x2e9   :  { %v2458_v55 = vadd.f32 %v2457_v50, %v2417_v49  ;;  %v2419_v56 = vadd.f32 %v2418_v52, %v921_v47  ;;  %v2459_v57 = vpop.f32.mrf.mxu0  ;;  %v929_v47 = vrot.slane %v8868_v54, %v928_v38  ;;  %v7371_v38 = vld [vmem:[%s10346_s7 + $0x740] ss:$28 sps:$4 sm:$0xff]  }
 0x2ea   :  { %v2420_v58 = vpop.f32.mrf.mxu1 }
 0x2eb   :  { %v2460_v4 = vadd.f32 %v2459_v57, %v2419_v56  ;;  %v2461_v61 = vpop.f32.mrf.mxu0  ;;  %5567 = vmatpush2.bf16.msra.mxu0 %v7320_v51  ;;  %v2550_v62 = vmax.f32 %v2458_v55, 0.0  ;;  %v7323_v51 = vld [vmem:[%s10346_s7 + $0x200] ss:$28 sps:$4 sm:$0xff]  }
 0x2ec   :  { %v2421_v6 = vpop.f32.mrf.mxu1  ;;  %5568 = vmatprep.subr.bf16.mxu0 %v7328_v53  ;;  %v7331_v53 = vld [vmem:[%s10346_s7 + $0x1cc] ss:$28 sps:$4 sm:$0xff]  }
 0x2ed   :  { %v2551_v7 = vmax.f32 %v2460_v4, 0.0  ;;  %v2462_v0 = vpop.f32.mrf.mxu0  ;;  %v9292_v2 = vpack.c.bf16 %v2550_v62, %v2550_v62  ;;  %v7329_v61 = vld [vmem:[%s10346_s7 + $0x1c8] ss:$28 sps:$4 sm:$0xff]   ;;  %v7337_v6 = vld [vmem:[%s10346_s7 + $0x894] ss:$28 sps:$4 sm:$0xff]  }
 0x2ef   :  { %v9287_v59 = vpack.c.bf16 %v2551_v7, %v2551_v7  ;;  %5569 = vmatpush2.bf16.msra.mxu0 %v7326_v5 }
 0x2f0   :  { %5620 = vmatprep.subr.bf16.mxu0 %v7334_v63 }
 0x2f1   :  { %5529 = vmatprep.mubr.bf16.mxu1 %v9287_v59 }
 0x2f2   :  { %5530 = vmatmul.mubr.bf16.vlgmr.msra.gmra.mxu1 %v9292_v2 }
 0x2f3   :  { %5580 = vmatpush1.bf16.msra.mxu1 %v7239_v1  ;;  %5611 = vmatprep.mubr.bf16.mxu1 %v8911_v14  ;;  %v7332_v1 = vld [vmem:[%s10346_s7 + $0x510] ss:$28 sps:$4 sm:$0xff]  }
 0x2f4   :  { %5581 = vmatprep.subr.bf16.mxu1 %v7247_v3  ;;  %v7335_v3 = vld [vmem:[%s10346_s7 + $0x890] ss:$28 sps:$4 sm:$0xff]  }
 0x2f7   :  { %5582 = vmatpush1.bf16.msra.mxu1 %v7245_v8 }
 0x2f8   :  { %5583 = vmatprep.subr.bf16.mxu1 %v7253_v60  ;;  %v7340_v60 = vld [vmem:[%s10346_s7 + $0x4dc] ss:$28 sps:$4 sm:$0xff]  }
 0x2fb   :  { %5584 = vmatpush1.bf16.msra.mxu1 %v7251_v9  ;;  %v7343_v9 = vld [vmem:[%s10346_s7 + $0x85c] ss:$28 sps:$4 sm:$0xff]  }
 0x2fc   :  { %5585 = vmatprep.subr.bf16.mxu1 %v7259_v10  ;;  %v7338_v10 = vld [vmem:[%s10346_s7 + $0x4d8] ss:$28 sps:$4 sm:$0xff]  }
 0x2ff   :  { %5586 = vmatpush1.bf16.msra.mxu1 %v7257_v11  ;;  %v7341_v11 = vld [vmem:[%s10346_s7 + $0x858] ss:$28 sps:$4 sm:$0xff]  }
 0x300   :  { %5587 = vmatprep.subr.bf16.mxu1 %v7265_v12  ;;  %v7346_v12 = vld [vmem:[%s10346_s7 + $0x4a4] ss:$28 sps:$4 sm:$0xff]  }
 0x303   :  { %5588 = vmatpush1.bf16.msra.mxu1 %v7263_v13  ;;  %v7349_v13 = vld [vmem:[%s10346_s7 + $0x824] ss:$28 sps:$4 sm:$0xff]  }
 0x304   :  { %5589 = vmatprep.subr.bf16.mxu1 %v7271_v15  ;;  %v7344_v15 = vld [vmem:[%s10346_s7 + $0x4a0] ss:$28 sps:$4 sm:$0xff]  }
 0x307   :  { %5590 = vmatpush1.bf16.msra.mxu1 %v7269_v17  ;;  %v7347_v17 = vld [vmem:[%s10346_s7 + $0x820] ss:$28 sps:$4 sm:$0xff]  }
 0x308   :  { %5591 = vmatprep.subr.bf16.mxu1 %v7277_v18  ;;  %v7352_v18 = vld [vmem:[%s10346_s7 + $0x46c] ss:$28 sps:$4 sm:$0xff]  }
 0x30b   :  { %5592 = vmatpush1.bf16.msra.mxu1 %v7275_v20  ;;  %v7355_v20 = vld [vmem:[%s10346_s7 + $0x7ec] ss:$28 sps:$4 sm:$0xff]  }
 0x30c   :  { %5593 = vmatprep.subr.bf16.mxu1 %v7283_v23  ;;  %v7350_v23 = vld [vmem:[%s10346_s7 + $0x468] ss:$28 sps:$4 sm:$0xff]  }
 0x30f   :  { %5594 = vmatpush1.bf16.msra.mxu1 %v7281_v24  ;;  %v7353_v24 = vld [vmem:[%s10346_s7 + $0x7e8] ss:$28 sps:$4 sm:$0xff]  }
 0x310   :  { %5595 = vmatprep.subr.bf16.mxu1 %v7289_v25  ;;  %v7358_v25 = vld [vmem:[%s10346_s7 + $0x434] ss:$28 sps:$4 sm:$0xff]  }
 0x313   :  { %5596 = vmatpush2.bf16.msra.mxu1 %v7287_v26  ;;  %v7361_v26 = vld [vmem:[%s10346_s7 + $0x7b4] ss:$28 sps:$4 sm:$0xff]  }
 0x314   :  { %5597 = vmatprep.subr.bf16.mxu1 %v7295_v27  ;;  %v7356_v27 = vld [vmem:[%s10346_s7 + $0x430] ss:$28 sps:$4 sm:$0xff]  }
 0x317   :  { %5598 = vmatpush2.bf16.msra.mxu1 %v7293_v28  ;;  %v7359_v28 = vld [vmem:[%s10346_s7 + $0x7b0] ss:$28 sps:$4 sm:$0xff]  }
 0x318   :  { %5599 = vmatprep.subr.bf16.mxu1 %v7301_v29  ;;  %v7364_v29 = vld [vmem:[%s10346_s7 + $0x3fc] ss:$28 sps:$4 sm:$0xff]  }
 0x31b   :  { %5600 = vmatpush2.bf16.msra.mxu1 %v7299_v30  ;;  %v7367_v30 = vld [vmem:[%s10346_s7 + $0x77c] ss:$28 sps:$4 sm:$0xff]  }
 0x31c   :  { %5601 = vmatprep.subr.bf16.mxu1 %v7307_v31  ;;  %v7362_v31 = vld [vmem:[%s10346_s7 + $0x3f8] ss:$28 sps:$4 sm:$0xff]  }
 0x31f   :  { %5602 = vmatpush2.bf16.msra.mxu1 %v7305_v32  ;;  %v7365_v32 = vld [vmem:[%s10346_s7 + $0x778] ss:$28 sps:$4 sm:$0xff]  }
 0x320   :  { %5603 = vmatprep.subr.bf16.mxu1 %v7313_v33  ;;  %v7370_v33 = vld [vmem:[%s10346_s7 + $0x3c4] ss:$28 sps:$4 sm:$0xff]  }
 0x323   :  { %5604 = vmatpush2.bf16.msra.mxu1 %v7311_v35  ;;  %v7373_v35 = vld [vmem:[%s10346_s7 + $0x744] ss:$28 sps:$4 sm:$0xff]  }
 0x324   :  { %5605 = vmatprep.subr.bf16.mxu1 %v7319_v37  ;;  %v7368_v37 = vld [vmem:[%s10346_s7 + $0x3c0] ss:$28 sps:$4 sm:$0xff]  }
 0x326   :  { %v2498_v48 = vpop.f32.mrf.mxu1 }
 0x327   :  { %v2499_v49 = vadd.f32 %v2498_v48, %v925_v44  ;;  %v2539_v50 = vpop.f32.mrf.mxu0  ;;  %5606 = vmatpush2.bf16.msra.mxu1 %v7317_v42  ;;  %v7376_v42 = vld [vmem:[%s10346_s7 + $0x38c] ss:$28 sps:$4 sm:$0xff]   ;;  %v7382_v48 = vld [vmem:[%s10346_s7 + $0x6d4] ss:$28 sps:$4 sm:$0xff]  }
 0x328   :  { %v2500_v52 = vpop.f32.mrf.mxu1  ;;  %5607 = vmatprep.subr.bf16.mxu1 %v7325_v46  ;;  %v7379_v44 = vld [vmem:[%s10346_s7 + $0x70c] ss:$28 sps:$4 sm:$0xff]  }
 0x329   :  { %v2540_v55 = vadd.f32 %v2539_v50, %v2499_v49  ;;  %v2501_v56 = vadd.f32 %v2500_v52, %v929_v47  ;;  %v2541_v57 = vpop.f32.mrf.mxu0  ;;  %v7374_v46 = vld [vmem:[%s10346_s7 + $0x388] ss:$28 sps:$4 sm:$0xff]   ;;  %v7385_v49 = vld [vmem:[%s10346_s7 + $0xa54] ss:$28 sps:$4 sm:$0xff]   ;;  %v7388_v52 = vld [vmem:[%s10346_s7 + $0x69c] ss:$28 sps:$4 sm:$0xff]  }
 0x32a   :  { %v2502_v58 = vpop.f32.mrf.mxu1  ;;  %v7377_v47 = vld [vmem:[%s10346_s7 + $0x708] ss:$28 sps:$4 sm:$0xff]   ;;  %v7380_v50 = vld [vmem:[%s10346_s7 + $0x6d0] ss:$28 sps:$4 sm:$0xff]  }
 0x32b   :  { %v2542_v4 = vadd.f32 %v2541_v57, %v2501_v56  ;;  %v2543_v54 = vpop.f32.mrf.mxu0  ;;  %5608 = vmatpush2.bf16.msra.mxu1 %v7323_v51  ;;  %v2552_v5 = vmax.f32 %v2540_v55, 0.0  ;;  %v7383_v51 = vld [vmem:[%s10346_s7 + $0xa50] ss:$28 sps:$4 sm:$0xff]   ;;  %v7386_v55 = vld [vmem:[%s10346_s7 + $0x698] ss:$28 sps:$4 sm:$0xff]  }
 0x32c   :  { %v2503_v62 = vpop.f32.mrf.mxu1  ;;  %5609 = vmatprep.subr.bf16.mxu1 %v7331_v53  ;;  %v7391_v53 = vld [vmem:[%s10346_s7 + $0xa1c] ss:$28 sps:$4 sm:$0xff]   ;;  %v7394_v57 = vld [vmem:[%s10346_s7 + $0x664] ss:$28 sps:$4 sm:$0xff]  }
 0x32d   :  { %v2553_v63 = vmax.f32 %v2542_v4, 0.0  ;;  %v2544_v7 = vpop.f32.mrf.mxu0  ;;  %v9404_v8 = vpack.c.bf16 %v2552_v5, %v2552_v5  ;;  %v7389_v56 = vld [vmem:[%s10346_s7 + $0xa18] ss:$28 sps:$4 sm:$0xff]   ;;  %v7397_v58 = vld [vmem:[%s10346_s7 + $0x9e4] ss:$28 sps:$4 sm:$0xff]  }
 0x32e   :  { %v7392_v4 = vld [vmem:[%s10346_s7 + $0x660] ss:$28 sps:$4 sm:$0xff]   ;;  %v7403_v5 = vld [vmem:[%s10346_s7 + $0x9ac] ss:$28 sps:$4 sm:$0xff]   ;;  %v7409_v7 = vld [vmem:[%s10346_s7 + $0x974] ss:$28 sps:$4 sm:$0xff]  }
 0x32f   :  { %v9396_v0 = vpack.c.bf16 %v2553_v63, %v2553_v63  ;;  %5610 = vmatpush2.bf16.msra.mxu1 %v7329_v61  ;;  %v7395_v54 = vld [vmem:[%s10346_s7 + $0x9e0] ss:$28 sps:$4 sm:$0xff]   ;;  %v7400_v61 = vld [vmem:[%s10346_s7 + $0x62c] ss:$28 sps:$4 sm:$0xff]   ;;  %v7406_v63 = vld [vmem:[%s10346_s7 + $0x5f4] ss:$28 sps:$4 sm:$0xff]  }
 0x330   :  { %5661 = vmatprep.subr.bf16.mxu1 %v7337_v6  ;;  %v7398_v62 = vld [vmem:[%s10346_s7 + $0x628] ss:$28 sps:$4 sm:$0xff]  }
 0x331   :  { %5570 = vmatprep.mubr.bf16.mxu0 %v9396_v0  ;;  %v7401_v6 = vld [vmem:[%s10346_s7 + $0x9a8] ss:$28 sps:$4 sm:$0xff]  }
 0x332   :  { %5612 = vmatmul.mubr.bf16.vlgmr.msra.gmra.mxu1 %v9079_v16  ;;  %5571 = vmatmul.mubr.bf16.vlgmr.msra.gmra.mxu0 %v9404_v8 }
 0x333   :  { %5621 = vmatpush1.bf16.msra.mxu0 %v7332_v1  ;;  %5662 = vmatpush1.bf16.msra.mxu1 %v7335_v3  ;;  %v7404_v1 = vld [vmem:[%s10346_s7 + $0x5f0] ss:$28 sps:$4 sm:$0xff]  }
 0x334   :  { %5693 = vmatprep.mubr.bf16.mxu1 %v9287_v59  ;;  %5652 = vmatprep.mubr.bf16.mxu0 %v9099_v40  ;;  %v7407_v3 = vld [vmem:[%s10346_s7 + $0x970] ss:$28 sps:$4 sm:$0xff]  }
 0x335   :  { %5622 = vmatprep.subr.bf16.mxu0 %v7340_v60  ;;  %5663 = vmatprep.subr.bf16.mxu1 %v7343_v9  ;;  %v7412_v60 = vld [vmem:[%s10346_s7 + $0x5bc] ss:$28 sps:$4 sm:$0xff]  }
 0x336   :  { %v7415_v9 = vld [vmem:[%s10346_s7 + $0x93c] ss:$28 sps:$4 sm:$0xff]  }
 0x337   :  { %5623 = vmatpush1.bf16.msra.mxu0 %v7338_v10  ;;  %5664 = vmatpush1.bf16.msra.mxu1 %v7341_v11  ;;  %v7410_v10 = vld [vmem:[%s10346_s7 + $0x5b8] ss:$28 sps:$4 sm:$0xff]  }
 0x338   :  { %5624 = vmatprep.subr.bf16.mxu0 %v7346_v12  ;;  %5665 = vmatprep.subr.bf16.mxu1 %v7349_v13  ;;  %v7413_v11 = vld [vmem:[%s10346_s7 + $0x938] ss:$28 sps:$4 sm:$0xff]   ;;  %v7418_v12 = vld [vmem:[%s10346_s7 + $0x584] ss:$28 sps:$4 sm:$0xff]  }
 0x339   :  { %v7421_v13 = vld [vmem:[%s10346_s7 + $0x904] ss:$28 sps:$4 sm:$0xff]  }
 0x33b   :  { %5625 = vmatpush1.bf16.msra.mxu0 %v7344_v15  ;;  %5666 = vmatpush1.bf16.msra.mxu1 %v7347_v17  ;;  %v7416_v17 = vld [vmem:[%s10346_s7 + $0x580] ss:$28 sps:$4 sm:$0xff]  }
 0x33c   :  { %5626 = vmatprep.subr.bf16.mxu0 %v7352_v18  ;;  %5667 = vmatprep.subr.bf16.mxu1 %v7355_v20  ;;  %v7419_v18 = vld [vmem:[%s10346_s7 + $0x900] ss:$28 sps:$4 sm:$0xff]  }
 0x33f   :  { %5627 = vmatpush1.bf16.msra.mxu0 %v7350_v23  ;;  %5668 = vmatpush1.bf16.msra.mxu1 %v7353_v24  ;;  %v7424_v23 = vld [vmem:[%s10346_s7 + $0x54c] ss:$28 sps:$4 sm:$0xff]  }
 0x340   :  { %5628 = vmatprep.subr.bf16.mxu0 %v7358_v25  ;;  %5669 = vmatprep.subr.bf16.mxu1 %v7361_v26  ;;  %v7427_v24 = vld [vmem:[%s10346_s7 + $0x8cc] ss:$28 sps:$4 sm:$0xff]   ;;  %v3074_v25 = vld [vmem:[%s10347_s8] sm:$0x7f] }
 0x343   :  { %5629 = vmatpush1.bf16.msra.mxu0 %v7356_v27  ;;  %5670 = vmatpush1.bf16.msra.mxu1 %v7359_v28  ;;  %v7422_v27 = vld [vmem:[%s10346_s7 + $0x548] ss:$28 sps:$4 sm:$0xff]  }
 0x344   :  { %5630 = vmatprep.subr.bf16.mxu0 %v7364_v29  ;;  %5671 = vmatprep.subr.bf16.mxu1 %v7367_v30  ;;  %v7425_v28 = vld [vmem:[%s10346_s7 + $0x8c8] ss:$28 sps:$4 sm:$0xff]   ;;  %v7430_v30 = vld [vmem:[%s10346_s7 + $0xc14] ss:$28 sps:$4 sm:$0xff]  }
 0x347   :  { %5631 = vmatpush1.bf16.msra.mxu0 %v7362_v31  ;;  %5672 = vmatpush1.bf16.msra.mxu1 %v7365_v32  ;;  %v7433_v31 = vld [vmem:[%s10346_s7 + $0x19c] ss:$28 sps:$4 sm:$0xff]   ;;  %v3079_v32 = vrot.slane %v3074_v25, %v8058_v21  ;;  %v7439_v21 = vld [vmem:[%s10346_s7 + $0x164] ss:$28 sps:$4 sm:$0xff]  }
 0x348   :  { %5632 = vmatprep.subr.bf16.mxu0 %v7370_v33  ;;  %5673 = vmatprep.subr.bf16.mxu1 %v7373_v35  ;;  %v3083_v33 = vrot.slane %v3074_v25, %v8061_v22  ;;  %v7428_v35 = vld [vmem:[%s10346_s7 + $0xc10] ss:$28 sps:$4 sm:$0xff]   ;;  %v7479_v25 = vld [vmem:[%s10346_s7 + $0x358] ss:$28 sps:$4 sm:$0xff]  }
 0x34b   :  { %5633 = vmatpush1.bf16.msra.mxu0 %v7368_v37  ;;  %5674 = vmatpush1.bf16.msra.mxu1 %v7371_v38  ;;  %v7431_v37 = vld [vmem:[%s10346_s7 + $0x198] ss:$28 sps:$4 sm:$0xff]  }
 0x34c   :  { %5634 = vmatprep.subr.bf16.mxu0 %v7376_v42  ;;  %5675 = vmatprep.subr.bf16.mxu1 %v7379_v44  ;;  %v7436_v42 = vld [vmem:[%s10346_s7 + $0xbdc] ss:$28 sps:$4 sm:$0xff]  }
 0x34f   :  { %5635 = vmatpush1.bf16.msra.mxu0 %v7374_v46  ;;  %5676 = vmatpush1.bf16.msra.mxu1 %v7377_v47  ;;  %v7434_v47 = vld [vmem:[%s10346_s7 + $0xbd8] ss:$28 sps:$4 sm:$0xff]  }
 0x350   :  { %5636 = vmatprep.subr.bf16.mxu0 %v7382_v48  ;;  %5677 = vmatprep.subr.bf16.mxu1 %v7385_v49  ;;  %v7437_v49 = vld [vmem:[%s10346_s7 + $0x160] ss:$28 sps:$4 sm:$0xff]  }
 0x353   :  { %5637 = vmatpush2.bf16.msra.mxu0 %v7380_v50  ;;  %5678 = vmatpush2.bf16.msra.mxu1 %v7383_v51  ;;  %v7442_v50 = vld [vmem:[%s10346_s7 + $0xba4] ss:$28 sps:$4 sm:$0xff]  }
 0x354   :  { %5638 = vmatprep.subr.bf16.mxu0 %v7388_v52  ;;  %5679 = vmatprep.subr.bf16.mxu1 %v7391_v53  ;;  %v7445_v52 = vld [vmem:[%s10346_s7 + $0x12c] ss:$28 sps:$4 sm:$0xff]  }
 0x357   :  { %5639 = vmatpush2.bf16.msra.mxu0 %v7386_v55  ;;  %5680 = vmatpush2.bf16.msra.mxu1 %v7389_v56  ;;  %v7440_v55 = vld [vmem:[%s10346_s7 + $0xba0] ss:$28 sps:$4 sm:$0xff]  }
 0x358   :  { %5640 = vmatprep.subr.bf16.mxu0 %v7394_v57  ;;  %5681 = vmatprep.subr.bf16.mxu1 %v7397_v58  ;;  %v7443_v57 = vld [vmem:[%s10346_s7 + $0x128] ss:$28 sps:$4 sm:$0xff]  }
 0x359   :  { %v7448_v58 = vld [vmem:[%s10346_s7 + $0xb6c] ss:$28 sps:$4 sm:$0xff]  }
 0x35b   :  { %5641 = vmatpush2.bf16.msra.mxu0 %v7392_v4  ;;  %5682 = vmatpush2.bf16.msra.mxu1 %v7395_v54  ;;  %v7451_v4 = vld [vmem:[%s10346_s7 + $0xf4] ss:$28 sps:$4 sm:$0xff]   ;;  %v7446_v54 = vld [vmem:[%s10346_s7 + $0xb68] ss:$28 sps:$4 sm:$0xff]  }
 0x35c   :  { %5642 = vmatprep.subr.bf16.mxu0 %v7400_v61  ;;  %5683 = vmatprep.subr.bf16.mxu1 %v7403_v5  ;;  %v7449_v61 = vld [vmem:[%s10346_s7 + $0xf0] ss:$28 sps:$4 sm:$0xff]  }
 0x35d   :  { %v7454_v5 = vld [vmem:[%s10346_s7 + $0xb34] ss:$28 sps:$4 sm:$0xff]  }
 0x35f   :  { %5643 = vmatpush2.bf16.msra.mxu0 %v7398_v62  ;;  %5684 = vmatpush2.bf16.msra.mxu1 %v7401_v6  ;;  %v7457_v62 = vld [vmem:[%s10346_s7 + $0xbc] ss:$28 sps:$4 sm:$0xff]   ;;  %v7452_v6 = vld [vmem:[%s10346_s7 + $0xb30] ss:$28 sps:$4 sm:$0xff]  }
 0x360   :  { %5644 = vmatprep.subr.bf16.mxu0 %v7406_v63  ;;  %5685 = vmatprep.subr.bf16.mxu1 %v7409_v7  ;;  %v7455_v63 = vld [vmem:[%s10346_s7 + $0xb8] ss:$28 sps:$4 sm:$0xff]  }
 0x361   :  { %v7460_v7 = vld [vmem:[%s10346_s7 + $0xafc] ss:$28 sps:$4 sm:$0xff]  }
 0x363   :  { %5645 = vmatpush2.bf16.msra.mxu0 %v7404_v1  ;;  %5686 = vmatpush2.bf16.msra.mxu1 %v7407_v3  ;;  %v7463_v1 = vld [vmem:[%s10346_s7 + $0x84] ss:$28 sps:$4 sm:$0xff]   ;;  %v7458_v3 = vld [vmem:[%s10346_s7 + $0xaf8] ss:$28 sps:$4 sm:$0xff]  }
 0x364   :  { %5646 = vmatprep.subr.bf16.mxu0 %v7412_v60  ;;  %5687 = vmatprep.subr.bf16.mxu1 %v7415_v9  ;;  %v7461_v60 = vld [vmem:[%s10346_s7 + $0x80] ss:$28 sps:$4 sm:$0xff]  }
 0x365   :  { %v7466_v9 = vld [vmem:[%s10346_s7 + $0xac4] ss:$28 sps:$4 sm:$0xff]  }
 0x366   :  { %v5449_v15 = vpop.f32.mrf.mxu1 }
 0x367   :  { %5647 = vmatpush2.bf16.msra.mxu0 %v7410_v10  ;;  %5688 = vmatpush2.bf16.msra.mxu1 %v7413_v11  ;;  %v5450_v38 = vadd.f32 %v5449_v15, %v3079_v32  ;;  %v7469_v10 = vld [vmem:[%s10346_s7 + $0x4c] ss:$28 sps:$4 sm:$0xff]   ;;  %v7464_v11 = vld [vmem:[%s10346_s7 + $0xac0] ss:$28 sps:$4 sm:$0xff]   ;;  %v7475_v15 = vld [vmem:[%s10346_s7 + $0x14] ss:$28 sps:$4 sm:$0xff]  }
 0x368   :  { %v5451_v20 = vpop.f32.mrf.mxu1  ;;  %5648 = vmatprep.subr.bf16.mxu0 %v7418_v12  ;;  %5689 = vmatprep.subr.bf16.mxu1 %v7421_v13  ;;  %v7467_v12 = vld [vmem:[%s10346_s7 + $0x48] ss:$28 sps:$4 sm:$0xff]   ;;  %v7488_v32 = vld [vmem:[%s10346_s7 + $0xd60] ss:$28 sps:$4 sm:$0xff]  }
 0x369   :  { %v5452_v44 = vadd.f32 %v5451_v20, %v3083_v33  ;;  %v7472_v13 = vld [vmem:[%s10346_s7 + $0xa8c] ss:$28 sps:$4 sm:$0xff]   ;;  %v7478_v20 = vld [vmem:[%s10346_s7 + $0xdd4] ss:$28 sps:$4 sm:$0xff]  }
 0x36a   :  { %v5453_v26 = vpop.f32.mrf.mxu1  ;;  %v7491_v33 = vld [vmem:[%s10346_s7 + $0x2e8] ss:$28 sps:$4 sm:$0xff]  }
 0x36b   :  { %5649 = vmatpush2.bf16.msra.mxu0 %v7416_v17  ;;  %5690 = vmatpush2.bf16.msra.mxu1 %v7419_v18  ;;  %v7470_v17 = vld [vmem:[%s10346_s7 + $0xa88] ss:$28 sps:$4 sm:$0xff]   ;;  %v7473_v18 = vld [vmem:[%s10346_s7 + $0x10] ss:$28 sps:$4 sm:$0xff]   ;;  %v7484_v26 = vld [vmem:[%s10346_s7 + $0xd9c] ss:$28 sps:$4 sm:$0xff]  }
 0x36c   :  { %v5454_v29 = vpop.f32.mrf.mxu1  ;;  %5650 = vmatprep.subr.bf16.mxu0 %v7424_v23  ;;  %5691 = vmatprep.subr.bf16.mxu1 %v7427_v24  ;;  %v7481_v23 = vld [vmem:[%s10346_s7 + $0x35c] ss:$28 sps:$4 sm:$0xff]   ;;  %v7476_v24 = vld [vmem:[%s10346_s7 + $0xdd0] ss:$28 sps:$4 sm:$0xff]  }
 0x36d   :  { %v7485_v29 = vld [vmem:[%s10346_s7 + $0x320] ss:$28 sps:$4 sm:$0xff]  }
 0x36f   :  { %5651 = vmatpush2.bf16.msra.mxu0 %v7422_v27  ;;  %5692 = vmatpush2.bf16.msra.mxu1 %v7425_v28  ;;  %v7487_v27 = vld [vmem:[%s10346_s7 + $0x324] ss:$28 sps:$4 sm:$0xff]   ;;  %v7482_v28 = vld [vmem:[%s10346_s7 + $0xd98] ss:$28 sps:$4 sm:$0xff]  }
 0x370   :  { %5702 = vmatprep.subr.bf16.mxu0 %v7430_v30  ;;  %5743 = vmatprep.subr.bf16.mxu1 %v7433_v31  ;;  %v7490_v30 = vld [vmem:[%s10346_s7 + $0xd64] ss:$28 sps:$4 sm:$0xff]   ;;  %v7493_v31 = vld [vmem:[%s10346_s7 + $0x2ec] ss:$28 sps:$4 sm:$0xff]  }
 0x372   :  { %5653 = vmatmul.mubr.bf16.vlgmr.msra.gmra.mxu0 %v9107_v45  ;;  %5694 = vmatmul.mubr.bf16.vlgmr.msra.gmra.mxu1 %v9292_v2  ;;  %v5490_v22 = vpop.f32.mrf.mxu0 }
 0x373   :  { %v9616_v46 = vadd.f32 %v5490_v22, %v5450_v38  ;;  %5703 = vmatpush1.bf16.msra.mxu0 %v7428_v35  ;;  %5734 = vmatprep.mubr.bf16.mxu0 %v9396_v0  ;;  %v7496_v35 = vld [vmem:[%s10346_s7 + $0xd2c] ss:$28 sps:$4 sm:$0xff]   ;;  %v7505_v22 = vld [vmem:[%s10346_s7 + $0x27c] ss:$28 sps:$4 sm:$0xff]  }
 0x374   :  { %5744 = vmatpush1.bf16.msra.mxu1 %v7431_v37  ;;  %5775 = vmatprep.mubr.bf16.mxu1 %v8911_v14  ;;  %v5492_v48 = vpop.f32.mrf.mxu0  ;;  %v7499_v37 = vld [vmem:[%s10346_s7 + $0x2b4] ss:$28 sps:$4 sm:$0xff]   ;;  %v7494_v38 = vld [vmem:[%s10346_s7 + $0xd28] ss:$28 sps:$4 sm:$0xff]  }
 0x375   :  { %v9629_v51 = vadd.f32 %v5492_v48, %v5452_v44  ;;  %5704 = vmatprep.subr.bf16.mxu0 %v7436_v42  ;;  %5745 = vmatprep.subr.bf16.mxu1 %v7439_v21  ;;  %v7497_v42 = vld [vmem:[%s10346_s7 + $0x2b0] ss:$28 sps:$4 sm:$0xff]   ;;  %v7508_v48 = vld [vmem:[%s10346_s7 + $0xcbc] ss:$28 sps:$4 sm:$0xff]  }
 0x376   :  { %v5494_v53 = vpop.f32.mrf.mxu0  ;;  %v7502_v21 = vld [vmem:[%s10346_s7 + $0xcf4] ss:$28 sps:$4 sm:$0xff]  }
 0x377   :  { %5705 = vmatpush1.bf16.msra.mxu0 %v7434_v47  ;;  %v7500_v44 = vld [vmem:[%s10346_s7 + $0xcf0] ss:$28 sps:$4 sm:$0xff]   ;;  %v7503_v47 = vld [vmem:[%s10346_s7 + $0x278] ss:$28 sps:$4 sm:$0xff]   ;;  %v7514_v53 = vld [vmem:[%s10346_s7 + $0xc84] ss:$28 sps:$4 sm:$0xff]  }
 0x378   :  { %5746 = vmatpush1.bf16.msra.mxu1 %v7437_v49  ;;  %v5495_v56 = vpop.f32.mrf.mxu0  ;;  %5706 = vmatprep.subr.bf16.mxu0 %v7442_v50  ;;  %v7511_v49 = vld [vmem:[%s10346_s7 + $0x244] ss:$28 sps:$4 sm:$0xff]   ;;  %v7506_v50 = vld [vmem:[%s10346_s7 + $0xcb8] ss:$28 sps:$4 sm:$0xff]  }
 0x379   :  { %5747 = vmatprep.subr.bf16.mxu1 %v7445_v52  ;;  %v7509_v52 = vld [vmem:[%s10346_s7 + $0x240] ss:$28 sps:$4 sm:$0xff]  }
 0x37a   :  { %v7512_v56 = vld [vmem:[%s10346_s7 + $0xc80] ss:$28 sps:$4 sm:$0xff]  }
 0x37b   :  { %5707 = vmatpush1.bf16.msra.mxu0 %v7440_v55  ;;  %v7517_v55 = vld [vmem:[%s10346_s7 + $0x20c] ss:$28 sps:$4 sm:$0xff]  }
 0x37c   :  { %5748 = vmatpush1.bf16.msra.mxu1 %v7443_v57  ;;  %5708 = vmatprep.subr.bf16.mxu0 %v7448_v58  ;;  %v7515_v57 = vld [vmem:[%s10346_s7 + $0x208] ss:$28 sps:$4 sm:$0xff]  }
 0x37d   :  { %5749 = vmatprep.subr.bf16.mxu1 %v7451_v4  ;;  %v7520_v58 = vld [vmem:[%s10346_s7 + $0xc4c] ss:$28 sps:$4 sm:$0xff]   ;;  %v7523_v4 = vld [vmem:[%s10346_s7 + $0x1d4] ss:$28 sps:$4 sm:$0xff]  }
 0x37f   :  { %5709 = vmatpush1.bf16.msra.mxu0 %v7446_v54  ;;  %v7518_v54 = vld [vmem:[%s10346_s7 + $0xc48] ss:$28 sps:$4 sm:$0xff]  }
 0x380   :  { %5750 = vmatpush1.bf16.msra.mxu1 %v7449_v61  ;;  %5710 = vmatprep.subr.bf16.mxu0 %v7454_v5  ;;  %v7521_v61 = vld [vmem:[%s10346_s7 + $0x1d0] ss:$28 sps:$4 sm:$0xff]   ;;  %v7526_v5 = vld [vmem:[%s10346_s7 + $0x51c] ss:$28 sps:$4 sm:$0xff]  }
 0x381   :  { %5751 = vmatprep.subr.bf16.mxu1 %v7457_v62  ;;  %v7529_v62 = vld [vmem:[%s10346_s7 + $0x89c] ss:$28 sps:$4 sm:$0xff]  }
 0x383   :  { %5711 = vmatpush1.bf16.msra.mxu0 %v7452_v6  ;;  %v7524_v6 = vld [vmem:[%s10346_s7 + $0x518] ss:$28 sps:$4 sm:$0xff]  }
 0x384   :  { %5752 = vmatpush1.bf16.msra.mxu1 %v7455_v63  ;;  %5712 = vmatprep.subr.bf16.mxu0 %v7460_v7  ;;  %v7527_v63 = vld [vmem:[%s10346_s7 + $0x898] ss:$28 sps:$4 sm:$0xff]   ;;  %v7532_v7 = vld [vmem:[%s10346_s7 + $0x4e4] ss:$28 sps:$4 sm:$0xff]  }
 0x385   :  { %5753 = vmatprep.subr.bf16.mxu1 %v7463_v1 }
 0x387   :  { %5713 = vmatpush1.bf16.msra.mxu0 %v7458_v3  ;;  %v7535_v3 = vld [vmem:[%s10346_s7 + $0x864] ss:$28 sps:$4 sm:$0xff]  }
 0x388   :  { %5754 = vmatpush1.bf16.msra.mxu1 %v7461_v60  ;;  %5714 = vmatprep.subr.bf16.mxu0 %v7466_v9  ;;  %v7530_v60 = vld [vmem:[%s10346_s7 + $0x4e0] ss:$28 sps:$4 sm:$0xff]  }
 0x389   :  { %5755 = vmatprep.subr.bf16.mxu1 %v7469_v10  ;;  %v7533_v10 = vld [vmem:[%s10346_s7 + $0x860] ss:$28 sps:$4 sm:$0xff]  }
 0x38b   :  { %5715 = vmatpush1.bf16.msra.mxu0 %v7464_v11  ;;  %v7538_v11 = vld [vmem:[%s10346_s7 + $0x4ac] ss:$28 sps:$4 sm:$0xff]  }
 0x38c   :  { %5756 = vmatpush1.bf16.msra.mxu1 %v7467_v12  ;;  %5716 = vmatprep.subr.bf16.mxu0 %v7472_v13  ;;  %v7541_v12 = vld [vmem:[%s10346_s7 + $0x82c] ss:$28 sps:$4 sm:$0xff]  }
 0x38d   :  { %5757 = vmatprep.subr.bf16.mxu1 %v7475_v15  ;;  %v7536_v15 = vld [vmem:[%s10346_s7 + $0x4a8] ss:$28 sps:$4 sm:$0xff]  }
 0x38f   :  { %5717 = vmatpush1.bf16.msra.mxu0 %v7470_v17 }
 0x390   :  { %5758 = vmatpush1.bf16.msra.mxu1 %v7473_v18  ;;  %5718 = vmatprep.subr.bf16.mxu0 %v7478_v20  ;;  %v7539_v18 = vld [vmem:[%s10346_s7 + $0x828] ss:$28 sps:$4 sm:$0xff]   ;;  %v7544_v20 = vld [vmem:[%s10346_s7 + $0x474] ss:$28 sps:$4 sm:$0xff]  }
 0x391   :  { %5759 = vmatprep.subr.bf16.mxu1 %v7481_v23  ;;  %v7547_v23 = vld [vmem:[%s10346_s7 + $0x7f4] ss:$28 sps:$4 sm:$0xff]  }
 0x393   :  { %5719 = vmatpush2.bf16.msra.mxu0 %v7476_v24  ;;  %v7542_v24 = vld [vmem:[%s10346_s7 + $0x470] ss:$28 sps:$4 sm:$0xff]  }
 0x394   :  { %5760 = vmatpush2.bf16.msra.mxu1 %v7479_v25  ;;  %5720 = vmatprep.subr.bf16.mxu0 %v7484_v26  ;;  %v7545_v25 = vld [vmem:[%s10346_s7 + $0x7f0] ss:$28 sps:$4 sm:$0xff]   ;;  %v7550_v26 = vld [vmem:[%s10346_s7 + $0x43c] ss:$28 sps:$4 sm:$0xff]  }
 0x395   :  { %5761 = vmatprep.subr.bf16.mxu1 %v7487_v27  ;;  %v7553_v27 = vld [vmem:[%s10346_s7 + $0x7bc] ss:$28 sps:$4 sm:$0xff]  }
 0x397   :  { %5721 = vmatpush2.bf16.msra.mxu0 %v7482_v28  ;;  %v7548_v28 = vld [vmem:[%s10346_s7 + $0x438] ss:$28 sps:$4 sm:$0xff]  }
 0x398   :  { %5762 = vmatpush2.bf16.msra.mxu1 %v7485_v29  ;;  %5722 = vmatprep.subr.bf16.mxu0 %v7490_v30  ;;  %v7551_v29 = vld [vmem:[%s10346_s7 + $0x7b8] ss:$28 sps:$4 sm:$0xff]   ;;  %v7556_v30 = vld [vmem:[%s10346_s7 + $0x404] ss:$28 sps:$4 sm:$0xff]  }
 0x399   :  { %5763 = vmatprep.subr.bf16.mxu1 %v7493_v31  ;;  %v7559_v31 = vld [vmem:[%s10346_s7 + $0x784] ss:$28 sps:$4 sm:$0xff]  }
 0x39b   :  { %5723 = vmatpush2.bf16.msra.mxu0 %v7488_v32  ;;  %v7554_v32 = vld [vmem:[%s10346_s7 + $0x400] ss:$28 sps:$4 sm:$0xff]  }
 0x39c   :  { %5764 = vmatpush2.bf16.msra.mxu1 %v7491_v33  ;;  %5724 = vmatprep.subr.bf16.mxu0 %v7496_v35  ;;  %v7557_v33 = vld [vmem:[%s10346_s7 + $0x780] ss:$28 sps:$4 sm:$0xff]   ;;  %v7562_v35 = vld [vmem:[%s10346_s7 + $0x3cc] ss:$28 sps:$4 sm:$0xff]  }
 0x39d   :  { %5765 = vmatprep.subr.bf16.mxu1 %v7499_v37  ;;  %v7565_v37 = vld [vmem:[%s10346_s7 + $0x74c] ss:$28 sps:$4 sm:$0xff]  }
 0x39f   :  { %5725 = vmatpush2.bf16.msra.mxu0 %v7494_v38  ;;  %v7560_v38 = vld [vmem:[%s10346_s7 + $0x3c8] ss:$28 sps:$4 sm:$0xff]  }
 0x3a0   :  { %5766 = vmatpush2.bf16.msra.mxu1 %v7497_v42  ;;  %5726 = vmatprep.subr.bf16.mxu0 %v7502_v21  ;;  %v7563_v42 = vld [vmem:[%s10346_s7 + $0x748] ss:$28 sps:$4 sm:$0xff]   ;;  %v7568_v21 = vld [vmem:[%s10346_s7 + $0x394] ss:$28 sps:$4 sm:$0xff]  }
 0x3a1   :  { %5767 = vmatprep.subr.bf16.mxu1 %v7505_v22  ;;  %v7571_v22 = vld [vmem:[%s10346_s7 + $0x714] ss:$28 sps:$4 sm:$0xff]  }
 0x3a3   :  { %5727 = vmatpush2.bf16.msra.mxu0 %v7500_v44  ;;  %v7566_v44 = vld [vmem:[%s10346_s7 + $0x390] ss:$28 sps:$4 sm:$0xff]  }
 0x3a4   :  { %5768 = vmatpush2.bf16.msra.mxu1 %v7503_v47  ;;  %5728 = vmatprep.subr.bf16.mxu0 %v7508_v48  ;;  %v7569_v47 = vld [vmem:[%s10346_s7 + $0x710] ss:$28 sps:$4 sm:$0xff]   ;;  %v7574_v48 = vld [vmem:[%s10346_s7 + $0x6dc] ss:$28 sps:$4 sm:$0xff]  }
 0x3a5   :  { %5769 = vmatprep.subr.bf16.mxu1 %v7511_v49  ;;  %v7577_v49 = vld [vmem:[%s10346_s7 + $0xa5c] ss:$28 sps:$4 sm:$0xff]  }
 0x3a7   :  { %5729 = vmatpush2.bf16.msra.mxu0 %v7506_v50  ;;  %v7572_v50 = vld [vmem:[%s10346_s7 + $0x6d8] ss:$28 sps:$4 sm:$0xff]  }
 0x3a8   :  { %5770 = vmatpush2.bf16.msra.mxu1 %v7509_v52  ;;  %5730 = vmatprep.subr.bf16.mxu0 %v7514_v53  ;;  %v7575_v52 = vld [vmem:[%s10346_s7 + $0xa58] ss:$28 sps:$4 sm:$0xff]   ;;  %v7580_v53 = vld [vmem:[%s10346_s7 + $0x6a4] ss:$28 sps:$4 sm:$0xff]  }
 0x3a9   :  { %5771 = vmatprep.subr.bf16.mxu1 %v7517_v55  ;;  %v7583_v55 = vld [vmem:[%s10346_s7 + $0xa24] ss:$28 sps:$4 sm:$0xff]  }
 0x3ab   :  { %5731 = vmatpush2.bf16.msra.mxu0 %v7512_v56  ;;  %v7578_v56 = vld [vmem:[%s10346_s7 + $0x6a0] ss:$28 sps:$4 sm:$0xff]  }
 0x3ac   :  { %5772 = vmatpush2.bf16.msra.mxu1 %v7515_v57  ;;  %5732 = vmatprep.subr.bf16.mxu0 %v7520_v58  ;;  %v7581_v57 = vld [vmem:[%s10346_s7 + $0xa20] ss:$28 sps:$4 sm:$0xff]   ;;  %v7586_v58 = vld [vmem:[%s10346_s7 + $0x66c] ss:$28 sps:$4 sm:$0xff]  }
 0x3ad   :  { %5773 = vmatprep.subr.bf16.mxu1 %v7523_v4  ;;  %v7589_v4 = vld [vmem:[%s10346_s7 + $0x9ec] ss:$28 sps:$4 sm:$0xff]  }
 0x3af   :  { %5733 = vmatpush2.bf16.msra.mxu0 %v7518_v54  ;;  %v7584_v54 = vld [vmem:[%s10346_s7 + $0x668] ss:$28 sps:$4 sm:$0xff]  }
 0x3b0   :  { %5774 = vmatpush2.bf16.msra.mxu1 %v7521_v61  ;;  %5784 = vmatprep.subr.bf16.mxu0 %v7526_v5  ;;  %v7587_v61 = vld [vmem:[%s10346_s7 + $0x9e8] ss:$28 sps:$4 sm:$0xff]   ;;  %v7592_v5 = vld [vmem:[%s10346_s7 + $0x634] ss:$28 sps:$4 sm:$0xff]  }
 0x3b1   :  { %5825 = vmatprep.subr.bf16.mxu1 %v7529_v62  ;;  %v7595_v62 = vld [vmem:[%s10346_s7 + $0x9b4] ss:$28 sps:$4 sm:$0xff]  }
 0x3b2   :  { %5735 = vmatmul.mubr.bf16.vlgmr.msra.gmra.mxu0 %v9404_v8  ;;  %v9812_v1 = vpop.f32.mrf.mxu1 }
 0x3b3   :  { %5776 = vmatmul.mubr.bf16.vlgmr.msra.gmra.mxu1 %v9079_v16  ;;  %5785 = vmatpush1.bf16.msra.mxu0 %v7524_v6  ;;  %v7590_v6 = vld [vmem:[%s10346_s7 + $0x630] ss:$28 sps:$4 sm:$0xff]  }
 0x3b4   :  { %5816 = vmatprep.mubr.bf16.mxu0 %v9099_v40  ;;  %5826 = vmatpush1.bf16.msra.mxu1 %v7527_v63  ;;  %v9822_v9 = vpop.f32.mrf.mxu1  ;;  %v7593_v63 = vld [vmem:[%s10346_s7 + $0x9b0] ss:$28 sps:$4 sm:$0xff]  }
 0x3b5   :  { %5857 = vmatprep.mubr.bf16.mxu1 %v9287_v59  ;;  %5786 = vmatprep.subr.bf16.mxu0 %v7532_v7  ;;  %v7598_v7 = vld [vmem:[%s10346_s7 + $0x5fc] ss:$28 sps:$4 sm:$0xff]  }
 0x3b6   :  { %5827 = vmatprep.subr.bf16.mxu1 %v7535_v3  ;;  %v5535_v13 = vpop.f32.mrf.mxu1  ;;  %v7601_v3 = vld [vmem:[%s10346_s7 + $0x97c] ss:$28 sps:$4 sm:$0xff]  }
 0x3b7   :  { %5787 = vmatpush1.bf16.msra.mxu0 %v7530_v60  ;;  %v7596_v60 = vld [vmem:[%s10346_s7 + $0x5f8] ss:$28 sps:$4 sm:$0xff]   ;;  %v7602_v13 = vld [vmem:[%s10346_s7 + $0x5c0] ss:$28 sps:$4 sm:$0xff]  }
 0x3b8   :  { %5828 = vmatpush1.bf16.msra.mxu1 %v7533_v10  ;;  %v5536_v17 = vpop.f32.mrf.mxu1  ;;  %5788 = vmatprep.subr.bf16.mxu0 %v7538_v11  ;;  %v7599_v10 = vld [vmem:[%s10346_s7 + $0x978] ss:$28 sps:$4 sm:$0xff]   ;;  %v7604_v11 = vld [vmem:[%s10346_s7 + $0x5c4] ss:$28 sps:$4 sm:$0xff]  }
 0x3b9   :  { %5829 = vmatprep.subr.bf16.mxu1 %v7541_v12  ;;  %v7607_v12 = vld [vmem:[%s10346_s7 + $0x944] ss:$28 sps:$4 sm:$0xff]   ;;  %v7610_v17 = vld [vmem:[%s10346_s7 + $0x58c] ss:$28 sps:$4 sm:$0xff]  }
 0x3bb   :  { %5789 = vmatpush1.bf16.msra.mxu0 %v7536_v15  ;;  %v7605_v15 = vld [vmem:[%s10346_s7 + $0x940] ss:$28 sps:$4 sm:$0xff]  }
 0x3bc   :  { %5830 = vmatpush1.bf16.msra.mxu1 %v7539_v18  ;;  %5790 = vmatprep.subr.bf16.mxu0 %v7544_v20  ;;  %v7613_v18 = vld [vmem:[%s10346_s7 + $0x90c] ss:$28 sps:$4 sm:$0xff]  }
 0x3bd   :  { %5831 = vmatprep.subr.bf16.mxu1 %v7547_v23  ;;  %v7608_v20 = vld [vmem:[%s10346_s7 + $0x588] ss:$28 sps:$4 sm:$0xff]  }
 0x3be   :  { %v7611_v23 = vld [vmem:[%s10346_s7 + $0x908] ss:$28 sps:$4 sm:$0xff]  }
 0x3bf   :  { %5791 = vmatpush1.bf16.msra.mxu0 %v7542_v24  ;;  %v7616_v24 = vld [vmem:[%s10346_s7 + $0x554] ss:$28 sps:$4 sm:$0xff]  }
 0x3c0   :  { %5832 = vmatpush1.bf16.msra.mxu1 %v7545_v25  ;;  %5792 = vmatprep.subr.bf16.mxu0 %v7550_v26  ;;  %v7619_v25 = vld [vmem:[%s10346_s7 + $0x8d4] ss:$28 sps:$4 sm:$0xff]  }
 0x3c1   :  { %5833 = vmatprep.subr.bf16.mxu1 %v7553_v27  ;;  %v7614_v26 = vld [vmem:[%s10346_s7 + $0x550] ss:$28 sps:$4 sm:$0xff]  }
 0x3c2   :  { %v7617_v27 = vld [vmem:[%s10346_s7 + $0x8d0] ss:$28 sps:$4 sm:$0xff]  }
 0x3c3   :  { %5793 = vmatpush1.bf16.msra.mxu0 %v7548_v28  ;;  %v7622_v28 = vld [vmem:[%s10346_s7 + $0xc1c] ss:$28 sps:$4 sm:$0xff]  }
 0x3c4   :  { %5834 = vmatpush1.bf16.msra.mxu1 %v7551_v29  ;;  %5794 = vmatprep.subr.bf16.mxu0 %v7556_v30  ;;  %v7623_v29 = vld [vmem:[%s10346_s7 + $0x360] ss:$28 sps:$4 sm:$0xff]   ;;  %v7620_v30 = vld [vmem:[%s10346_s7 + $0xc18] ss:$28 sps:$4 sm:$0xff]  }
 0x3c5   :  { %5835 = vmatprep.subr.bf16.mxu1 %v7559_v31  ;;  %v7624_v31 = vld [vmem:[%s10346_s7 + $0x1a0] ss:$28 sps:$4 sm:$0xff]  }
 0x3c7   :  { %5795 = vmatpush1.bf16.msra.mxu0 %v7554_v32  ;;  %v5532_v32 = vadd.f32 %v9812_v1, %v9616_v46  ;;  %v7625_v1 = vld [vmem:[%s10346_s7 + $0xbe0] ss:$28 sps:$4 sm:$0xff]  }
 0x3c8   :  { %5836 = vmatpush1.bf16.msra.mxu1 %v7557_v33  ;;  %5796 = vmatprep.subr.bf16.mxu0 %v7562_v35  ;;  %v7627_v33 = vld [vmem:[%s10346_s7 + $0xbe4] ss:$28 sps:$4 sm:$0xff]  }
 0x3c9   :  { %5837 = vmatprep.subr.bf16.mxu1 %v7565_v37 }
 0x3cb   :  { %5797 = vmatpush1.bf16.msra.mxu0 %v7560_v38  ;;  %v7628_v38 = vld [vmem:[%s10346_s7 + $0x328] ss:$28 sps:$4 sm:$0xff]  }
 0x3cc   :  { %5838 = vmatpush1.bf16.msra.mxu1 %v7563_v42  ;;  %5798 = vmatprep.subr.bf16.mxu0 %v7568_v21  ;;  %v5534_v42 = vadd.f32 %v9822_v9, %v9629_v51  ;;  %v7632_v51 = vld [vmem:[%s10346_s7 + $0xbac] ss:$28 sps:$4 sm:$0xff]  }
 0x3cd   :  { %5839 = vmatprep.subr.bf16.mxu1 %v7571_v22 }
 0x3cf   :  { %5799 = vmatpush1.bf16.msra.mxu0 %v7566_v44  ;;  %v7629_v44 = vld [vmem:[%s10346_s7 + $0x168] ss:$28 sps:$4 sm:$0xff]  }
 0x3d0   :  { %5840 = vmatpush1.bf16.msra.mxu1 %v7569_v47  ;;  %5800 = vmatprep.subr.bf16.mxu0 %v7574_v48  ;;  %v7633_v48 = vld [vmem:[%s10346_s7 + $0x2f0] ss:$28 sps:$4 sm:$0xff]  }
 0x3d1   :  { %5841 = vmatprep.subr.bf16.mxu1 %v7577_v49 }
 0x3d3   :  { %5801 = vmatpush2.bf16.msra.mxu0 %v7572_v50 }
 0x3d4   :  { %5842 = vmatpush2.bf16.msra.mxu1 %v7575_v52  ;;  %5802 = vmatprep.subr.bf16.mxu0 %v7580_v53  ;;  %v7630_v53 = vld [vmem:[%s10346_s7 + $0xba8] ss:$28 sps:$4 sm:$0xff]  }
 0x3d5   :  { %5843 = vmatprep.subr.bf16.mxu1 %v7583_v55 }
 0x3d7   :  { %5803 = vmatpush2.bf16.msra.mxu0 %v7578_v56 }
 0x3d8   :  { %5844 = vmatpush2.bf16.msra.mxu1 %v7581_v57  ;;  %5804 = vmatprep.subr.bf16.mxu0 %v7586_v58  ;;  %v7637_v57 = vld [vmem:[%s10346_s7 + $0xb74] ss:$28 sps:$4 sm:$0xff]  }
 0x3d9   :  { %5845 = vmatprep.subr.bf16.mxu1 %v7589_v4  ;;  %v7638_v58 = vld [vmem:[%s10346_s7 + $0x2b8] ss:$28 sps:$4 sm:$0xff]   ;;  %v7635_v4 = vld [vmem:[%s10346_s7 + $0xb70] ss:$28 sps:$4 sm:$0xff]  }
 0x3db   :  { %5805 = vmatpush2.bf16.msra.mxu0 %v7584_v54  ;;  %v7639_v54 = vld [vmem:[%s10346_s7 + $0xf8] ss:$28 sps:$4 sm:$0xff]  }
 0x3dc   :  { %5846 = vmatpush2.bf16.msra.mxu1 %v7587_v61  ;;  %5806 = vmatprep.subr.bf16.mxu0 %v7592_v5  ;;  %v7642_v61 = vld [vmem:[%s10346_s7 + $0xb3c] ss:$28 sps:$4 sm:$0xff]  }
 0x3dd   :  { %5847 = vmatprep.subr.bf16.mxu1 %v7595_v62  ;;  %v7643_v5 = vld [vmem:[%s10346_s7 + $0x280] ss:$28 sps:$4 sm:$0xff]   ;;  %v7640_v62 = vld [vmem:[%s10346_s7 + $0xb38] ss:$28 sps:$4 sm:$0xff]  }
 0x3df   :  { %5807 = vmatpush2.bf16.msra.mxu0 %v7590_v6  ;;  %v7644_v6 = vld [vmem:[%s10346_s7 + $0xc0] ss:$28 sps:$4 sm:$0xff]  }
 0x3e0   :  { %5848 = vmatpush2.bf16.msra.mxu1 %v7593_v63  ;;  %5808 = vmatprep.subr.bf16.mxu0 %v7598_v7  ;;  %v7647_v63 = vld [vmem:[%s10346_s7 + $0xb04] ss:$28 sps:$4 sm:$0xff]  }
 0x3e1   :  { %5849 = vmatprep.subr.bf16.mxu1 %v7601_v3  ;;  %v7648_v7 = vld [vmem:[%s10346_s7 + $0x248] ss:$28 sps:$4 sm:$0xff]   ;;  %v7645_v3 = vld [vmem:[%s10346_s7 + $0xb00] ss:$28 sps:$4 sm:$0xff]  }
 0x3e3   :  { %5809 = vmatpush2.bf16.msra.mxu0 %v7596_v60 }
 0x3e4   :  { %5850 = vmatpush2.bf16.msra.mxu1 %v7599_v10  ;;  %5810 = vmatprep.subr.bf16.mxu0 %v7604_v11  ;;  %v7649_v10 = vld [vmem:[%s10346_s7 + $0x88] ss:$28 sps:$4 sm:$0xff]  }
 0x3e5   :  { %5851 = vmatprep.subr.bf16.mxu1 %v7607_v12  ;;  %v7652_v11 = vld [vmem:[%s10346_s7 + $0xacc] ss:$28 sps:$4 sm:$0xff]  }
 0x3e7   :  { %5811 = vmatpush2.bf16.msra.mxu0 %v7602_v13  ;;  %v7653_v13 = vld [vmem:[%s10346_s7 + $0x210] ss:$28 sps:$4 sm:$0xff]  }
 0x3e8   :  { %5852 = vmatpush2.bf16.msra.mxu1 %v7605_v15  ;;  %5812 = vmatprep.subr.bf16.mxu0 %v7610_v17 }
 0x3e9   :  { %5853 = vmatprep.subr.bf16.mxu1 %v7613_v18 }
 0x3eb   :  { %5813 = vmatpush2.bf16.msra.mxu0 %v7608_v20  ;;  %v7650_v20 = vld [vmem:[%s10346_s7 + $0xac8] ss:$28 sps:$4 sm:$0xff]  }
 0x3ec   :  { %5854 = vmatpush2.bf16.msra.mxu1 %v7611_v23  ;;  %5814 = vmatprep.subr.bf16.mxu0 %v7616_v24  ;;  %v7654_v23 = vld [vmem:[%s10346_s7 + $0x50] ss:$28 sps:$4 sm:$0xff]  }
 0x3ed   :  { %5855 = vmatprep.subr.bf16.mxu1 %v7619_v25  ;;  %v7657_v24 = vld [vmem:[%s10346_s7 + $0xa94] ss:$28 sps:$4 sm:$0xff]  }
 0x3ef   :  { %5815 = vmatpush2.bf16.msra.mxu0 %v7614_v26  ;;  %v7658_v26 = vld [vmem:[%s10346_s7 + $0x1d8] ss:$28 sps:$4 sm:$0xff]  }
 0x3f0   :  { %5856 = vmatpush2.bf16.msra.mxu1 %v7617_v27  ;;  %5866 = vmatprep.subr.bf16.mxu0 %v7622_v28  ;;  %v7655_v27 = vld [vmem:[%s10346_s7 + $0xa90] ss:$28 sps:$4 sm:$0xff]   ;;  %v7659_v28 = vld [vmem:[%s10346_s7 + $0x18] ss:$28 sps:$4 sm:$0xff]  }
 0x3f1   :  { %6894 = vmatprep.subr.bf16.mxu1 %v7623_v29  ;;  %v7662_v29 = vld [vmem:[%s10346_s7 + $0xddc] ss:$28 sps:$4 sm:$0xff]  }
 0x3f2   :  { %v10013_v35 = vpop.f32.mrf.mxu1  ;;  %5817 = vmatmul.mubr.bf16.vlgmr.msra.gmra.mxu0 %v9107_v45  ;;  %v5572_v37 = vpop.f32.mrf.mxu0 }
 0x3f3   :  { %5858 = vmatmul.mubr.bf16.vlgmr.msra.gmra.mxu1 %v9292_v2  ;;  %v5573_v46 = vadd.f32 %v5572_v37, %v5532_v32  ;;  %5867 = vmatpush1.bf16.msra.mxu0 %v7620_v30  ;;  %v7663_v30 = vld [vmem:[%s10346_s7 + $0xa60] ss:$28 sps:$4 sm:$0xff]   ;;  %v7668_v37 = vld [vmem:[%s10346_s7 + $0xa28] ss:$28 sps:$4 sm:$0xff]  }
 0x3f4   :  { %5898 = vmatprep.mubr.bf16.mxu0 %v9396_v0  ;;  %6895 = vmatpush3.bf16.msra.mxu1 %v7624_v31  ;;  %v10026_v21 = vpop.f32.mrf.mxu1  ;;  %v5574_v22 = vpop.f32.mrf.mxu0  ;;  %v7660_v31 = vld [vmem:[%s10346_s7 + $0xdd8] ss:$28 sps:$4 sm:$0xff]   ;;  %v7664_v32 = vld [vmem:[%s10346_s7 + $0x8a0] ss:$28 sps:$4 sm:$0xff]  }
 0x3f5   :  { %v6067_v9 = vmul.f32 0.5, %v5573_v46  ;;  %5939 = vmatprep.mubr.bf16.mxu1 %v8911_v14  ;;  %v5575_v47 = vadd.f32 %v5574_v22, %v5534_v42  ;;  %5868 = vmatprep.subr.bf16.mxu0 %v7627_v33  ;;  %v7634_v14 = vld [vmem:[%s10346_s7 + $0x130] ss:$28 sps:$4 sm:$0xff]   ;;  %v7667_v33 = vld [vmem:[%s10346_s7 + $0xda4] ss:$28 sps:$4 sm:$0xff]  }
 0x3f6   :  { %v5617_v49 = vpop.f32.mrf.mxu1  ;;  %6896 = vmatprep.subr.bf16.mxu1 %v7628_v38  ;;  %v5576_v50 = vpop.f32.mrf.mxu0  ;;  %v7665_v38 = vld [vmem:[%s10346_s7 + $0xda0] ss:$28 sps:$4 sm:$0xff]   ;;  %v7669_v42 = vld [vmem:[%s10346_s7 + $0x868] ss:$28 sps:$4 sm:$0xff]   ;;  %v7677_v22 = vld [vmem:[%s10346_s7 + $0xd34] ss:$28 sps:$4 sm:$0xff]  }
 0x3f7   :  { %7732 = vtanh.f32 %v6067_v9  ;;  %v6068_v52 = vmul.f32 0.5, %v5575_v47  ;;  %5869 = vmatpush1.bf16.msra.mxu0 %v7625_v1  ;;  %v7672_v46 = vld [vmem:[%s10346_s7 + $0xd6c] ss:$28 sps:$4 sm:$0xff]   ;;  %v7679_v9 = vld [vmem:[%s10346_s7 + $0x7f8] ss:$28 sps:$4 sm:$0xff]  }
 0x3f8   :  { %6897 = vmatpush3.bf16.msra.mxu1 %v7629_v44  ;;  %v5618_v55 = vpop.f32.mrf.mxu1  ;;  %v5577_v56 = vpop.f32.mrf.mxu0  ;;  %5870 = vmatprep.subr.bf16.mxu0 %v7632_v51  ;;  %v7670_v1 = vld [vmem:[%s10346_s7 + $0xd68] ss:$28 sps:$4 sm:$0xff]   ;;  %v7678_v44 = vld [vmem:[%s10346_s7 + $0x9b8] ss:$28 sps:$4 sm:$0xff]   ;;  %v7675_v51 = vld [vmem:[%s10346_s7 + $0xd30] ss:$28 sps:$4 sm:$0xff]  }
 0x3f9   :  { %7734 = vtanh.f32 %v6068_v52  ;;  %6898 = vmatprep.subr.bf16.mxu1 %v7633_v48  ;;  %v7682_v47 = vld [vmem:[%s10346_s7 + $0xcfc] ss:$28 sps:$4 sm:$0xff]   ;;  %v7687_v52 = vld [vmem:[%s10346_s7 + $0xcc4] ss:$28 sps:$4 sm:$0xff]  }
 0x3fa   :  { %v7683_v48 = vld [vmem:[%s10346_s7 + $0x980] ss:$28 sps:$4 sm:$0xff]   ;;  %v7680_v49 = vld [vmem:[%s10346_s7 + $0xcf8] ss:$28 sps:$4 sm:$0xff]   ;;  %v7689_v56 = vld [vmem:[%s10346_s7 + $0x788] ss:$28 sps:$4 sm:$0xff]  }
 0x3fb   :  { %5871 = vmatpush1.bf16.msra.mxu0 %v7630_v53  ;;  %v7684_v50 = vld [vmem:[%s10346_s7 + $0x7c0] ss:$28 sps:$4 sm:$0xff]   ;;  %v7688_v53 = vld [vmem:[%s10346_s7 + $0x948] ss:$28 sps:$4 sm:$0xff]  }
 0x3fc   :  { %6899 = vmatpush3.bf16.msra.mxu1 %v7634_v14  ;;  %5872 = vmatprep.subr.bf16.mxu0 %v7637_v57  ;;  %v7685_v55 = vld [vmem:[%s10346_s7 + $0xcc0] ss:$28 sps:$4 sm:$0xff]   ;;  %v7692_v14 = vld [vmem:[%s10346_s7 + $0xc8c] ss:$28 sps:$4 sm:$0xff]  }
 0x3fd   :  { %6900 = vmatprep.subr.bf16.mxu1 %v7638_v58  ;;  %v7693_v57 = vld [vmem:[%s10346_s7 + $0x910] ss:$28 sps:$4 sm:$0xff]   ;;  %v7690_v58 = vld [vmem:[%s10346_s7 + $0xc88] ss:$28 sps:$4 sm:$0xff]  }
 0x3ff   :  { %5873 = vmatpush1.bf16.msra.mxu0 %v7635_v4  ;;  %v7694_v4 = vld [vmem:[%s10346_s7 + $0x750] ss:$28 sps:$4 sm:$0xff]  }
 0x400   :  { %6901 = vmatpush3.bf16.msra.mxu1 %v7639_v54  ;;  %5874 = vmatprep.subr.bf16.mxu0 %v7642_v61  ;;  %v7697_v54 = vld [vmem:[%s10346_s7 + $0xc54] ss:$28 sps:$4 sm:$0xff]  }
 0x401   :  { %6902 = vmatprep.subr.bf16.mxu1 %v7643_v5  ;;  %v7698_v61 = vld [vmem:[%s10346_s7 + $0x8d8] ss:$28 sps:$4 sm:$0xff]   ;;  %v7695_v5 = vld [vmem:[%s10346_s7 + $0xc50] ss:$28 sps:$4 sm:$0xff]  }
 0x403   :  { %5875 = vmatpush1.bf16.msra.mxu0 %v7640_v62  ;;  %v7699_v62 = vld [vmem:[%s10346_s7 + $0x718] ss:$28 sps:$4 sm:$0xff]  }
 0x404   :  { %v7733_v60 = vpop.eup %7732  ;;  %6903 = vmatpush3.bf16.msra.mxu1 %v7644_v6  ;;  %5876 = vmatprep.subr.bf16.mxu0 %v7647_v63  ;;  %v7700_v6 = vld [vmem:[%s10346_s7 + $0x6e0] ss:$28 sps:$4 sm:$0xff]  }
 0x405   :  { %v6081_v12 = vmul.f32 0.5, %v7733_v60  ;;  %6904 = vmatprep.subr.bf16.mxu1 %v7648_v7  ;;  %v7701_v63 = vld [vmem:[%s10346_s7 + $0x520] ss:$28 sps:$4 sm:$0xff]   ;;  %v7702_v7 = vld [vmem:[%s10346_s7 + $0x6a8] ss:$28 sps:$4 sm:$0xff]  }
 0x406   :  { %v7735_v15 = vpop.eup %7734 }
 0x407   :  { %v6088_v17 = vadd.f32 0.5, %v6081_v12  ;;  %v6082_v18 = vmul.f32 0.5, %v7735_v15  ;;  %5877 = vmatpush1.bf16.msra.mxu0 %v7645_v3 }
 0x408   :  { %6905 = vmatpush3.bf16.msra.mxu1 %v7649_v10  ;;  %5878 = vmatprep.subr.bf16.mxu0 %v7652_v11  ;;  %v7703_v10 = vld [vmem:[%s10346_s7 + $0x4e8] ss:$28 sps:$4 sm:$0xff]  }
 0x409   :  { %6095 = vst [vmem:[#allocation2] sm:$0xff] %v6088_v17  ;;  %v6089_v25 = vadd.f32 0.5, %v6082_v18  ;;  %6906 = vmatprep.subr.bf16.mxu1 %v7653_v13  ;;  %v7704_v13 = vld [vmem:[%s10346_s7 + $0x670] ss:$28 sps:$4 sm:$0xff]  }
 0x40b   :  { %6096 = vst [vmem:[#allocation2 + $0x8] sm:$0xff] %v6089_v25  ;;  %5879 = vmatpush1.bf16.msra.mxu0 %v7650_v20  ;;  %v7709_v25 = vld [vmem:[%s10346_s7 + $0x440] ss:$28 sps:$4 sm:$0xff]  }
 0x40c   :  { %6907 = vmatpush3.bf16.msra.mxu1 %v7654_v23  ;;  %5880 = vmatprep.subr.bf16.mxu0 %v7657_v24  ;;  %v7707_v23 = vld [vmem:[%s10346_s7 + $0x478] ss:$28 sps:$4 sm:$0xff]   ;;  %v7708_v24 = vld [vmem:[%s10346_s7 + $0x600] ss:$28 sps:$4 sm:$0xff]  }
 0x40d   :  { %6908 = vmatprep.subr.bf16.mxu1 %v7658_v26  ;;  %v7710_v26 = vld [vmem:[%s10346_s7 + $0x5c8] ss:$28 sps:$4 sm:$0xff]  }
 0x40f   :  { %5881 = vmatpush1.bf16.msra.mxu0 %v7655_v27  ;;  %v7711_v27 = vld [vmem:[%s10346_s7 + $0x408] ss:$28 sps:$4 sm:$0xff]  }
 0x410   :  { %6909 = vmatpush3.bf16.msra.mxu1 %v7659_v28  ;;  %5882 = vmatprep.subr.bf16.mxu0 %v7662_v29  ;;  %v7712_v28 = vld [vmem:[%s10346_s7 + $0x590] ss:$28 sps:$4 sm:$0xff]  }
 0x411   :  { %6938 = vmatprep.subr.bf16.mxu1 %v7663_v30  ;;  %v7713_v29 = vld [vmem:[%s10346_s7 + $0x3d0] ss:$28 sps:$4 sm:$0xff]   ;;  %v7714_v30 = vld [vmem:[%s10346_s7 + $0x558] ss:$28 sps:$4 sm:$0xff]  }
 0x413   :  { %5940 = vmatmul.mubr.bf16.vlgmr.msra.gmra.mxu1 %v9079_v16  ;;  %5883 = vmatpush2.bf16.msra.mxu0 %v7660_v31  ;;  %v7673_v16 = vld [vmem:[%s10346_s7 + $0x9f0] ss:$28 sps:$4 sm:$0xff]   ;;  %v7715_v31 = vld [vmem:[%s10346_s7 + $0x398] ss:$28 sps:$4 sm:$0xff]  }
 0x414   :  { %6939 = vmatpush3.bf16.msra.mxu1 %v7664_v32  ;;  %6019 = vmatprep.mubr.bf16.mxu1 %v9287_v59  ;;  %v7674_v59 = vld [vmem:[%s10346_s7 + $0x830] ss:$28 sps:$4 sm:$0xff]   ;;  %v7716_v32 = vld [vmem:[%s10346_s7 + $0xde0] ss:$28 sps:$4 sm:$0xff]  }
 0x415   :  { %5884 = vmatprep.subr.bf16.mxu0 %v7667_v33  ;;  %6940 = vmatprep.subr.bf16.mxu1 %v7668_v37  ;;  %v7717_v33 = vld [vmem:[%s10346_s7 + $0xc20] ss:$28 sps:$4 sm:$0xff]   ;;  %v7718_v37 = vld [vmem:[%s10346_s7 + $0xda8] ss:$28 sps:$4 sm:$0xff]  }
 0x417   :  { %5885 = vmatpush2.bf16.msra.mxu0 %v7665_v38  ;;  %v7719_v38 = vld [vmem:[%s10346_s7 + $0xbe8] ss:$28 sps:$4 sm:$0xff]  }
 0x418   :  { %6941 = vmatpush3.bf16.msra.mxu1 %v7669_v42  ;;  %5886 = vmatprep.subr.bf16.mxu0 %v7672_v46  ;;  %v7720_v42 = vld [vmem:[%s10346_s7 + $0xd70] ss:$28 sps:$4 sm:$0xff]  }
 0x419   :  { %6942 = vmatprep.subr.bf16.mxu1 %v7673_v16  ;;  %v7721_v46 = vld [vmem:[%s10346_s7 + $0xbb0] ss:$28 sps:$4 sm:$0xff]   ;;  %v7724_v16 = vld [vmem:[%s10346_s7 + $0xd00] ss:$28 sps:$4 sm:$0xff]  }
 0x41b   :  { %5887 = vmatpush2.bf16.msra.mxu0 %v7670_v1  ;;  %v7725_v1 = vld [vmem:[%s10346_s7 + $0xb40] ss:$28 sps:$4 sm:$0xff]  }
 0x41c   :  { %6943 = vmatpush3.bf16.msra.mxu1 %v7674_v59  ;;  %5888 = vmatprep.subr.bf16.mxu0 %v7677_v22  ;;  %v7726_v59 = vld [vmem:[%s10346_s7 + $0xcc8] ss:$28 sps:$4 sm:$0xff]  }
 0x41d   :  { %6944 = vmatprep.subr.bf16.mxu1 %v7678_v44  ;;  %v7727_v22 = vld [vmem:[%s10346_s7 + $0xb08] ss:$28 sps:$4 sm:$0xff]   ;;  %v7728_v44 = vld [vmem:[%s10346_s7 + $0xc90] ss:$28 sps:$4 sm:$0xff]  }
 0x41f   :  { %5889 = vmatpush2.bf16.msra.mxu0 %v7675_v51  ;;  %v10305_v51 = vld [vmem:[%s10347_s8] sm:$0x7f] }
 0x420   :  { %6945 = vmatpush3.bf16.msra.mxu1 %v7679_v9  ;;  %5890 = vmatprep.subr.bf16.mxu0 %v7682_v47  ;;  %v3087_v9 = vrot.slane %v10305_v51, %v8258_v41  ;;  %v7729_v47 = vld [vmem:[%s10346_s7 + $0xad0] ss:$28 sps:$4 sm:$0xff]   ;;  %v7731_v41 = vld [vmem:[%s10346_s7 + $0xa98] ss:$28 sps:$4 sm:$0xff]  }
 0x421   :  { %6946 = vmatprep.subr.bf16.mxu1 %v7683_v48  ;;  %v7730_v48 = vld [vmem:[%s10346_s7 + $0xc58] ss:$28 sps:$4 sm:$0xff]  }
 0x423   :  { %5891 = vmatpush2.bf16.msra.mxu0 %v7680_v49  ;;  %v3091_v49 = vrot.slane %v10305_v51, %v8264_v43 }
 0x424   :  { %6947 = vmatpush3.bf16.msra.mxu1 %v7684_v50  ;;  %5892 = vmatprep.subr.bf16.mxu0 %v7687_v52  ;;  %v5614_v50 = vadd.f32 %v10013_v35, %v3087_v9 }
 0x425   :  { %6948 = vmatprep.subr.bf16.mxu1 %v7688_v53  ;;  %v5616_v52 = vadd.f32 %v10026_v21, %v3091_v49 }
 0x427   :  { %5893 = vmatpush2.bf16.msra.mxu0 %v7685_v55 }
 0x428   :  { %6949 = vmatpush3.bf16.msra.mxu1 %v7689_v56  ;;  %5894 = vmatprep.subr.bf16.mxu0 %v7692_v14 }
 0x429   :  { %6950 = vmatprep.subr.bf16.mxu1 %v7693_v57 }
 0x42b   :  { %5895 = vmatpush2.bf16.msra.mxu0 %v7690_v58 }
 0x42c   :  { %6951 = vmatpush3.bf16.msra.mxu1 %v7694_v4  ;;  %5896 = vmatprep.subr.bf16.mxu0 %v7697_v54 }
 0x42d   :  { %6952 = vmatprep.subr.bf16.mxu1 %v7698_v61 }
 0x42f   :  { %5897 = vmatpush2.bf16.msra.mxu0 %v7695_v5 }
 0x430   :  { %6953 = vmatpush3.bf16.msra.mxu1 %v7699_v62  ;;  %6916 = vmatprep.subr.bf16.mxu0 %v7700_v6 }
 0x432   :  { %v10211_v3 = vpop.f32.mrf.mxu0  ;;  %v10213_v60 = vpop.f32.mrf.mxu1  ;;  %5899 = vmatmul.mubr.bf16.vlgmr.msra.gmra.mxu0 %v9404_v8 }
 0x433   :  { %6020 = vmatmul.mubr.bf16.vlgmr.msra.gmra.mxu1 %v9292_v2  ;;  %6917 = vmatpush3.bf16.msra.mxu0 %v7701_v63  ;;  %v7705_v2 = vld [vmem:[%s10346_s7 + $0x4b0] ss:$28 sps:$4 sm:$0xff]   ;;  %v5655_v53 = vadd.f32 %v10211_v3, %v5614_v50 }
 0x434   :  { %5979 = vmatprep.mubr.bf16.mxu0 %v9099_v40  ;;  %v10221_v11 = vpop.f32.mrf.mxu0  ;;  %v10223_v12 = vpop.f32.mrf.mxu1  ;;  %6918 = vmatprep.subr.bf16.mxu0 %v7702_v7  ;;  %v7706_v40 = vld [vmem:[%s10346_s7 + $0x638] ss:$28 sps:$4 sm:$0xff]  }
 0x435   :  { %v5657_v55 = vadd.f32 %v10221_v11, %v5616_v52  ;;  %v5696_v56 = vadd.f32 %v10213_v60, %v5655_v53 }
 0x436   :  { %v5658_v15 = vpop.f32.mrf.mxu0  ;;  %v5699_v17 = vpop.f32.mrf.mxu1 }
 0x437   :  { %6919 = vmatpush3.bf16.msra.mxu0 %v7703_v10  ;;  %v5698_v43 = vadd.f32 %v10223_v12, %v5657_v55 }
 0x438   :  { %v5659_v18 = vpop.f32.mrf.mxu0  ;;  %v5700_v20 = vpop.f32.mrf.mxu1  ;;  %6920 = vmatprep.subr.bf16.mxu0 %v7704_v13 }
 0x43b   :  { %6921 = vmatpush3.bf16.msra.mxu0 %v7705_v2 }
 0x43c   :  { %6922 = vmatprep.subr.bf16.mxu0 %v7706_v40 }
 0x43f   :  { %6923 = vmatpush3.bf16.msra.mxu0 %v7707_v23 }
 0x440   :  { %6924 = vmatprep.subr.bf16.mxu0 %v7708_v24 }
 0x443   :  { %6925 = vmatpush3.bf16.msra.mxu0 %v7709_v25 }
 0x444   :  { %6926 = vmatprep.subr.bf16.mxu0 %v7710_v26 }
 0x447   :  { %6927 = vmatpush3.bf16.msra.mxu0 %v7711_v27 }
 0x448   :  { %6928 = vmatprep.subr.bf16.mxu0 %v7712_v28  ;;  %v3095_v28 = vrot.slane %v10305_v51, %v916_v34 }
 0x44b   :  { %6929 = vmatpush3.bf16.msra.mxu0 %v7713_v29  ;;  %v3099_v29 = vrot.slane %v10305_v51, %v920_v39 }
 0x44c   :  { %6930 = vmatprep.subr.bf16.mxu0 %v7714_v30 }
 0x44f   :  { %6931 = vmatpush3.bf16.msra.mxu0 %v7715_v31 }
 0x450   :  { %6960 = vmatprep.subr.bf16.mxu0 %v7716_v32 }
 0x452   :  { %5980 = vmatmul.mubr.bf16.vlgmr.msra.gmra.mxu0 %v9107_v45  ;;  %v7722_v45 = vld [vmem:[%s10346_s7 + $0xd38] ss:$28 sps:$4 sm:$0xff]  }
 0x453   :  { %6961 = vmatpush3.bf16.msra.mxu0 %v7717_v33  ;;  %6059 = vmatprep.mubr.bf16.mxu0 %v9396_v0  ;;  %v7723_v0 = vld [vmem:[%s10346_s7 + $0xb78] ss:$28 sps:$4 sm:$0xff]   ;;  %s7770_s7 = smov [#allocation2]  }
 0x454   :  { %6962 = vmatprep.subr.bf16.mxu0 %v7718_v37  ;;  %s6109_s23 = sshll.u32 %s7770_s7, 4  ;;  %s6110_s23 = int_to_ptr.vmem [resolvable:$true] %s6109_s23 }
 0x455   :  { %s7747_s24 = scalar_lea.vmem %s6110_s23, 896  ;;  %p7752_p1 = scmp.lt.s32.totalorder %s6110_s23, %s6110_s23 }
 0x456   :  { %p7748_p0 = scmp.ne.s32.totalorder %s6110_s23, %s7747_s24  ;;  %p7753_p2 = scmp.lt.s32.totalorder %s7747_s24, %s7747_s24 }
 0x457   :  { %6963 = vmatpush3.bf16.msra.mxu0 %v7719_v38 }
 0x458   :  { %6964 = vmatprep.subr.bf16.mxu0 %v7720_v42  ;;  %p7754_p3 = por %p7753_p2, %p7752_p1 }
 0x45a   :  { %p7755_p4 = pnand %p7754_p3, %p7748_p0 }
 0x45b   :  { %6965 = vmatpush3.bf16.msra.mxu0 %v7721_v46 }
 0x45c   :  { %6966 = vmatprep.subr.bf16.mxu0 %v7722_v45 }
 0x45f   :  { %6967 = vmatpush3.bf16.msra.mxu0 %v7723_v0 }
 0x460   :  { %6968 = vmatprep.subr.bf16.mxu0 %v7724_v16 }
 0x463   :  { %6969 = vmatpush3.bf16.msra.mxu0 %v7725_v1 }
 0x464   :  { %6970 = vmatprep.subr.bf16.mxu0 %v7726_v59 }
 0x467   :  { %6971 = vmatpush3.bf16.msra.mxu0 %v7727_v22 }
 0x468   :  { %6972 = vmatprep.subr.bf16.mxu0 %v7728_v44 }
 0x46b   :  { %6973 = vmatpush3.bf16.msra.mxu0 %v7729_v47 }
 0x46c   :  { %6974 = vmatprep.subr.bf16.mxu0 %v7730_v48 }
 0x46f   :  { %6975 = vmatpush3.bf16.msra.mxu0 %v7731_v41 }
 0x472   :  { %v5736_v14 = vpop.f32.mrf.mxu0  ;;  %6060 = vmatmul.mubr.bf16.vlgmr.msra.gmra.mxu0 %v9404_v8 }
 0x473   :  { %v5737_v35 = vadd.f32 %v5736_v14, %v5696_v56  ;;  %v5777_v57 = vpop.f32.mrf.mxu1 }
 0x474   :  { %v5738_v58 = vpop.f32.mrf.mxu0  ;;  %v5778_v30 = vadd.f32 %v5777_v57, %v3095_v28 }
 0x475   :  { %v6069_v4 = vmul.f32 0.5, %v5737_v35  ;;  %v5739_v54 = vadd.f32 %v5738_v58, %v5698_v43  ;;  %v5779_v61 = vpop.f32.mrf.mxu1  ;;  %v3103_v43 = vrot.slane %v10305_v51, %v924_v36 }
 0x476   :  { %v5740_v5 = vpop.f32.mrf.mxu0  ;;  %v5780_v31 = vadd.f32 %v5779_v61, %v3099_v29 }
 0x477   :  { %7736 = vtanh.f32 %v6069_v4  ;;  %v6070_v21 = vmul.f32 0.5, %v5739_v54  ;;  %v5781_v62 = vpop.f32.mrf.mxu1 }
 0x478   :  { %v5741_v6 = vpop.f32.mrf.mxu0 }
 0x479   :  { %7738 = vtanh.f32 %v6070_v21  ;;  %v5782_v63 = vpop.f32.mrf.mxu1 }
 0x484   :  { %v7737_v7 = vpop.eup %7736 }
 0x485   :  { %v6083_v3 = vmul.f32 0.5, %v7737_v7 }
 0x486   :  { %v7739_v60 = vpop.eup %7738 }
 0x487   :  { %v6090_v10 = vadd.f32 0.5, %v6083_v3  ;;  %v6084_v8 = vmul.f32 0.5, %v7739_v60 }
 0x489   :  { %6097 = vst [vmem:[#allocation2 + $0x10] sm:$0xff] %v6090_v10  ;;  %v6091_v11 = vadd.f32 0.5, %v6084_v8 }
 0x48b   :  { %6098 = vst [vmem:[#allocation2 + $0x18] sm:$0xff] %v6091_v11 }
 0x4b2   :  { %v5818_v12 = vpop.f32.mrf.mxu0 }
 0x4b3   :  { %v5859_v13 = vpop.f32.mrf.mxu1  ;;  %v5819_v32 = vadd.f32 %v5818_v12, %v5778_v30 }
 0x4b4   :  { %v5820_v15 = vpop.f32.mrf.mxu0 }
 0x4b5   :  { %v5861_v17 = vpop.f32.mrf.mxu1  ;;  %v5821_v33 = vadd.f32 %v5820_v15, %v5780_v31  ;;  %v5860_v37 = vadd.f32 %v5859_v13, %v5819_v32 }
 0x4b6   :  { %v5822_v2 = vpop.f32.mrf.mxu0 }
 0x4b7   :  { %v5863_v18 = vpop.f32.mrf.mxu1  ;;  %v5862_v42 = vadd.f32 %v5861_v17, %v5821_v33 }
 0x4b8   :  { %v5823_v20 = vpop.f32.mrf.mxu0 }
 0x4b9   :  { %v5864_v40 = vpop.f32.mrf.mxu1 }
 0x4d3   :  { %v6910_v23 = vpop.f32.mrf.mxu1 }
 0x4d5   :  { %v6911_v24 = vpop.f32.mrf.mxu1 }
 0x4d6   :  { %v6912_v25 = vadd.f32 %v6911_v24, %v6910_v23 }
 0x4d7   :  { %v6913_v26 = vpop.f32.mrf.mxu1 }
 0x4d8   :  { %v5942_v57 = vadd.f32 %v6912_v25, %v3103_v43 }
 0x4d9   :  { %v6914_v27 = vpop.f32.mrf.mxu1 }
 0x4f2   :  { %v5900_v38 = vpop.f32.mrf.mxu0 }
 0x4f3   :  { %v5901_v46 = vadd.f32 %v5900_v38, %v5860_v37  ;;  %v6954_v45 = vpop.f32.mrf.mxu1 }
 0x4f4   :  { %v5902_v0 = vpop.f32.mrf.mxu0 }
 0x4f5   :  { %v6071_v16 = vmul.f32 0.5, %v5901_v46  ;;  %v5903_v1 = vadd.f32 %v5902_v0, %v5862_v42  ;;  %v6955_v59 = vpop.f32.mrf.mxu1 }
 0x4f6   :  { %v5904_v22 = vpop.f32.mrf.mxu0  ;;  %v6956_v54 = vadd.f32 %v6955_v59, %v6954_v45 }
 0x4f7   :  { %7740 = vtanh.f32 %v6071_v16  ;;  %v6072_v34 = vmul.f32 0.5, %v5903_v1  ;;  %v6957_v44 = vpop.f32.mrf.mxu1 }
 0x4f8   :  { %v5905_v9 = vpop.f32.mrf.mxu0 }
 0x4f9   :  { %7742 = vtanh.f32 %v6072_v34  ;;  %v6958_v39 = vpop.f32.mrf.mxu1 }
 0x504   :  { %v7741_v47 = vpop.eup %7740 }
 0x505   :  { %v6085_v48 = vmul.f32 0.5, %v7741_v47 }
 0x506   :  { %v7743_v49 = vpop.eup %7742 }
 0x507   :  { %v6092_v50 = vadd.f32 0.5, %v6085_v48  ;;  %v6086_v41 = vmul.f32 0.5, %v7743_v49 }
 0x509   :  { %6099 = vst [vmem:[#allocation2 + $0x20] sm:$0xff] %v6092_v50  ;;  %v6093_v52 = vadd.f32 0.5, %v6086_v41 }
 0x50b   :  { %6100 = vst [vmem:[#allocation2 + $0x28] sm:$0xff] %v6093_v52 }
 0x512   :  { %v6932_v53 = vpop.f32.mrf.mxu0 }
 0x514   :  { %v6933_v55 = vpop.f32.mrf.mxu0 }
 0x515   :  { %v6934_v35 = vadd.f32 %v6933_v55, %v6932_v53 }
 0x516   :  { %v6935_v56 = vpop.f32.mrf.mxu0 }
 0x517   :  { %v5982_v58 = vadd.f32 %v6934_v35, %v5942_v57 }
 0x518   :  { %v6936_v14 = vpop.f32.mrf.mxu0 }
 0x519   :  { %v6022_v5 = vadd.f32 %v6956_v54, %v5982_v58 }
 0x532   :  { %v6976_v4 = vpop.f32.mrf.mxu0 }
 0x534   :  { %v6977_v61 = vpop.f32.mrf.mxu0 }
 0x535   :  { %v6978_v21 = vadd.f32 %v6977_v61, %v6976_v4 }
 0x536   :  { %v6979_v62 = vpop.f32.mrf.mxu0 }
 0x537   :  { %v6062_v6 = vadd.f32 %v6978_v21, %v6022_v5 }
 0x538   :  { %v6980_v63 = vpop.f32.mrf.mxu0 }
 0x539   :  { %v6073_v7 = vmul.f32 0.5, %v6062_v6 }
 0x53b   :  { %7744 = vtanh.f32 %v6073_v7 }
 0x548   :  { %v7745_v3 = vpop.eup %7744 }
 0x549   :  { %v6087_v60 = vmul.f32 0.5, %v7745_v3 }
 0x54b   :  { %v6094_v19 = vadd.f32 0.5, %v6087_v60 }
 0x54d   :  { %6102 = vst.msk [vmem:[#allocation2 + $0x30] sm:$0xff] %vm6101_vm1, %v6094_v19 }
 0x54e   :  { %7758 = shalt.err (!%p7755_p4)
}
 0x54f   :  { %6112 = dma.vmem_to_hbm [thread:$0]  %s6110_s23, 896, %s10348_s9, [#allocation3]  }
 0x550   :  { %7767 = dma.done.wait [#allocation3], 896  }
 0x551   :  { %7768 = vsyncadd [#allocation3], 4294966400 }
 0x552   :  { %6116 = vsyncpa [#allocation3], 1 }

</bundles_post_ra>
